<compile_context>
chip_gen: v5e
topology: v5e:2x2
jax: 0.10.0
libtpu: 0.0.40
codegen_flags: <defaults>
</compile_context>

<pallas_src>
import functools
import math

import jax
import jax.numpy as jnp
from jax import lax
from jax.experimental import pallas as pl
from jax.experimental.pallas import tpu as pltpu


def _layernorm(y, alpha, bias, eps):
    # Matches the PyTorch LayerNormalization: scalar alpha/bias, torch.std (unbiased, d-1),
    # eps added to the std (not the variance).  Exact division (EUP has slack; keeps the
    # residual stream clean).
    d = y.shape[-1]
    mean = jnp.mean(y, axis=-1, keepdims=True)
    var = jnp.sum((y - mean) ** 2, axis=-1, keepdims=True) * (1.0 / (d - 1))
    return alpha * (y - mean) / (jnp.sqrt(var) + eps) + bias


def encoder_block_kernel(
    ln_ref,                 # SMEM (4,) f32: [alpha1, bias1, alpha2, bias2]
    x_ref,                  # (Bb, S, D) f32
    maskb_ref,              # (Bb, 1, S) f32 additive bias (0 = keep, -1e30 = masked)
    wqkv_ref, bqkv_ref,     # (D, 3*Dp) bf16, (1, 3*Dp) f32   (head-dim padded, fused Q|K|V)
    wo_ref, bo_ref,         # (Dp, D) bf16, (1, D) f32
    w1_ref, b1_ref,         # (D, dffb) bf16, (1, dffb) f32   (dff-tiled)
    w2_ref, b2_ref,         # (dffb, D) bf16, (1, D) f32
    o_ref,                  # (Bb, S, D)
    qkv_ref,                # VMEM (rows, 3*Dp) bf16   fused QKV (head-padded)
    ctx_ref,                # VMEM (rows, Dp)   bf16   per-head attention context
    x1_ref,                 # VMEM (rows, D)    f32    attention residual
    n2_ref,                 # VMEM (rows, D)    bf16   LN2(x1), matmul-ready
    acc_ref,                # VMEM (rows, D)    f32    FFN accumulator
    *, num_heads, eps,
):
    Bb, S, D = x_ref.shape
    rows = Bb * S
    h = num_heads
    dk = D // h
    Dp = wo_ref.shape[0]
    dkp = Dp // h                       # lane-aligned (padded) head dim, multiple of 128
    k_idx = pl.program_id(1)
    nk = pl.num_programs(1)

    # ---- grid step k == 0: LN1 + fused QKV + attention + residual + LN2 ------------------
    @pl.when(k_idx == 0)
    def _attention():
        x = x_ref[...].reshape(rows, D).astype(jnp.float32)
        n1 = _layernorm(x, ln_ref[0], ln_ref[1], eps)

        # fused QKV projection: one wide MXU op (bf16 in, f32 accumulate), parked in VMEM.
        qkv = (jnp.dot(n1.astype(jnp.bfloat16), wqkv_ref[...],
                       preferred_element_type=jnp.float32)
               + bqkv_ref[...])                                          # (rows, 3*Dp) f32
        qkv_ref[...] = qkv.astype(jnp.bfloat16)

        scale = jnp.float32(1.0 / math.sqrt(dk))

        def batch_body(b, carry):
            r0 = b * S
            if S % 8 == 0:
                r0 = pl.multiple_of(r0, 8)
            mb = maskb_ref[b]                           # (1, S) additive mask bias
            for hd in range(h):                         # static, 128-aligned lane slices
                c0 = hd * dkp
                qh = qkv_ref[pl.ds(r0, S), c0:c0 + dkp]
                kh = qkv_ref[pl.ds(r0, S), Dp + c0:Dp + c0 + dkp]
                vh = qkv_ref[pl.ds(r0, S), 2 * Dp + c0:2 * Dp + c0 + dkp]
                s = lax.dot_general(qh, kh, (((1,), (1,)), ((), ())),
                                    preferred_element_type=jnp.float32)
                s = s * scale + mb                      # additive mask: one VALU add
                m = jnp.max(s, axis=-1, keepdims=True)
                e = jnp.exp(s - m)                      # softmax stats kept in f32
                p = e * pl.reciprocal(jnp.sum(e, axis=-1, keepdims=True), approx=True)
                ctx_ref[pl.ds(r0, S), c0:c0 + dkp] = jnp.dot(
                    p.astype(jnp.bfloat16), vh,
                    preferred_element_type=jnp.float32).astype(jnp.bfloat16)
            return carry

        lax.fori_loop(0, Bb, batch_body, 0)

        attn_out = (jnp.dot(ctx_ref[...], wo_ref[...],
                            preferred_element_type=jnp.float32)
                    + bo_ref[...])                                       # (rows, D) f32
        x1 = x_ref[...].reshape(rows, D).astype(jnp.float32) + attn_out  # residual (f32)
        x1_ref[...] = x1
        n2_ref[...] = _layernorm(x1, ln_ref[2], ln_ref[3], eps).astype(jnp.bfloat16)
        acc_ref[...] = jnp.zeros_like(acc_ref)

    # ---- every grid step: one dff chunk of the FFN ----------------------------------------
    hdn = jnp.maximum(
        jnp.dot(n2_ref[...], w1_ref[...], preferred_element_type=jnp.float32)
        + b1_ref[...], 0.0)                                              # (rows, dffb) f32
    acc_ref[...] += jnp.dot(hdn.astype(jnp.bfloat16), w2_ref[...],
                            preferred_element_type=jnp.float32)

    # ---- last dff chunk: residual add + store ----------------------------------------------
    @pl.when(k_idx == nk - 1)
    def _finalize():
        out = x1_ref[...] + acc_ref[...] + b2_ref[...]
        o_ref[...] = out.reshape(Bb, S, D).astype(o_ref.dtype)


def encoder_block_pallas(x, mask, params, *, num_heads, eps=1e-6,
                         batch_block=None, dff_block=None):
    """x: (B, S, D) f32, mask: (B, S) (1 = keep, 0 = mask key)."""
    B, S, D = x.shape
    h = num_heads
    assert D % h == 0, "d_model is not divisible by h"
    dk = D // h
    dkp = ((dk + 127) // 128) * 128          # lane-aligned (padded) head dim
    Dp = h * dkp
    dff = params["w1"].shape[1]

    # batch block: ~512 matmul rows per step; keep >= 2 steps on the "parallel" batch axis
    # (v7x has 2 TensorCores) whenever B >= 2.
    if batch_block is None:
        target_rows = 512
        cap_b = max(B // 2 if B >= 2 else B, 1)
        batch_block = 1
        for c in range(1, B + 1):
            if B % c == 0 and c <= cap_b and c * S <= max(target_rows, S):
                batch_block = c
    Bb = batch_block
    assert B % Bb == 0
    nb = B // Bb
    rows = Bb * S

    # dff chunking: fully resident FFN weights when bf16 w1+w2 fit ~24 MiB, else stream
    # 128-lane multiples (<= 2048) on a second ("arbitrary") grid axis.
    if dff_block is None:
        if 4 * D * dff <= (24 << 20):
            dff_block = dff
        else:
            dff_block = dff
            for c in range(min(dff, 2048), 127, -1):
                if dff % c == 0 and c % 128 == 0:
                    dff_block = c
                    break
    dffb = dff_block
    assert dff % dffb == 0
    nk = dff // dffb

    # additive mask bias: 0 = keep, -1e30 = masked (replaces per-head compare + select).
    mask_bias = jnp.where(mask.reshape(B, 1, S) == 0, -1e30, 0.0).astype(jnp.float32)

    ln_params = jnp.array(
        [params["alpha1"], params["bias1"], params["alpha2"], params["bias2"]],
        dtype=jnp.float32)

    bf = jnp.bfloat16

    def pad_cols(w, b):
        # (D, D) -> (D, Dp), (D,) -> (Dp,): zero-fill each head's columns up to dkp.
        wp = jnp.zeros((D, h, dkp), jnp.float32).at[:, :, :dk].set(
            w.astype(jnp.float32).reshape(D, h, dk))
        bp = jnp.zeros((h, dkp), jnp.float32).at[:, :dk].set(
            b.astype(jnp.float32).reshape(h, dk))
        return wp.reshape(D, Dp), bp.reshape(Dp)

    wq_p, bq_p = pad_cols(params["wq"], params["bq"])
    wk_p, bk_p = pad_cols(params["wk"], params["bk"])
    wv_p, bv_p = pad_cols(params["wv"], params["bv"])
    wqkv = jnp.concatenate([wq_p, wk_p, wv_p], axis=1).astype(bf)          # (D, 3*Dp)
    bqkv = jnp.concatenate([bq_p, bk_p, bv_p]).reshape(1, 3 * Dp).astype(jnp.float32)
    wo = (jnp.zeros((h, dkp, D), jnp.float32)
          .at[:, :dk, :].set(params["wo"].astype(jnp.float32).reshape(h, dk, D))
          .reshape(Dp, D).astype(bf))                                      # (Dp, D)
    bo = params["bo"].reshape(1, D).astype(jnp.float32)
    w1 = params["w1"].astype(bf)
    b1 = params["b1"].reshape(1, dff).astype(jnp.float32)
    w2 = params["w2"].astype(bf)
    b2 = params["b2"].reshape(1, D).astype(jnp.float32)

    # VMEM budget: physical capacity minus headroom (v7x: 64->48 MiB, v5e/v6e: 128->112 MiB).
    try:
        vmem_cap = int(pltpu.get_tpu_info().vmem_capacity_bytes) - (16 << 20)
    except Exception:
        vmem_cap = 48 << 20
    vmem_cap = max(vmem_cap, 32 << 20)
    weight_bytes = 2 * (2 * D * 3 * Dp + 4 * 3 * Dp + 2 * Dp * D + 4 * D + 4 * D)
    ffn_bytes = 4 * (2 * D * dffb + 4 * dffb + 2 * dffb * D)
    io_bytes = 2 * 2 * (4 * rows * D) + 2 * 4 * Bb * S
    scratch_bytes = rows * (2 * 3 * Dp + 2 * Dp + 4 * D + 2 * D + 4 * D)
    vmem_limit = int(min(max(weight_bytes + ffn_bytes + io_bytes + scratch_bytes
                             + (8 << 20), 32 << 20), vmem_cap))

    kernel = functools.partial(encoder_block_kernel, num_heads=h, eps=eps)
    args = (ln_params, x, mask_bias, wqkv, bqkv, wo, bo, w1, b1, w2, b2)

    def build(use_buffered):
        def spec(shape, index_map, nbuf=None):
            if use_buffered and nbuf is not None and hasattr(pl, "Buffered"):
                return pl.BlockSpec(shape, index_map, pipeline_mode=pl.Buffered(nbuf))
            return pl.BlockSpec(shape, index_map)

        resident = 1                       # index never changes -> single buffer
        stream = 1 if nk == 1 else 3       # deeper buffering on streamed FFN chunks
        in_specs = [
            pl.BlockSpec(memory_space=pltpu.MemorySpace.SMEM),             # LN scalars
            pl.BlockSpec((Bb, S, D), lambda i, k: (i, 0, 0)),              # x
            pl.BlockSpec((Bb, 1, S), lambda i, k: (i, 0, 0)),              # mask bias
            spec((D, 3 * Dp), lambda i, k: (0, 0), resident),              # wqkv
            spec((1, 3 * Dp), lambda i, k: (0, 0), resident),              # bqkv
            spec((Dp, D), lambda i, k: (0, 0), resident),                  # wo
            spec((1, D), lambda i, k: (0, 0), resident),                   # bo
            spec((D, dffb), lambda i, k: (0, k), stream),                  # w1 chunk
            spec((1, dffb), lambda i, k: (0, k), stream),                  # b1 chunk
            spec((dffb, D), lambda i, k: (k, 0), stream),                  # w2 chunk
            spec((1, D), lambda i, k: (0, 0), resident),                   # b2
        ]
        return pl.pallas_call(
            kernel,
            out_shape=jax.ShapeDtypeStruct((B, S, D), x.dtype),
            grid=(nb, nk),
            in_specs=in_specs,
            out_specs=pl.BlockSpec((Bb, S, D), lambda i, k: (i, 0, 0)),
            scratch_shapes=[
                pltpu.VMEM((rows, 3 * Dp), jnp.bfloat16),   # fused QKV (head-padded)
                pltpu.VMEM((rows, Dp), jnp.bfloat16),       # per-head context
                pltpu.VMEM((rows, D), jnp.float32),         # attention residual x1
                pltpu.VMEM((rows, D), jnp.bfloat16),        # LN2(x1)
                pltpu.VMEM((rows, D), jnp.float32),         # FFN accumulator
            ],
            compiler_params=pltpu.CompilerParams(
                dimension_semantics=("parallel", "arbitrary"),
                vmem_limit_bytes=vmem_limit),
        )

    try:
        return build(use_buffered=True)(*args)
    except Exception:
        # Fallback in case pipeline_mode=pl.Buffered(...) is unsupported on this JAX/libtpu.
        return build(use_buffered=False)(*args)


# ------------------------- pure-JAX reference ------------------------------
def encoder_block_ref(x, mask, params, *, num_heads, eps=1e-6, mm_dtype=jnp.float32):
    """Reference.  mm_dtype=jnp.bfloat16 mirrors the kernel's MXU input precision."""
    B, S, D = x.shape
    h = num_heads
    dk = D // h

    def ln(y, a, b):
        mean = jnp.mean(y, axis=-1, keepdims=True)
        var = jnp.sum((y - mean) ** 2, axis=-1, keepdims=True) / (D - 1)
        return a * (y - mean) / (jnp.sqrt(var) + eps) + b

    def mm(a, b):
        return jnp.dot(a.astype(mm_dtype), b.astype(mm_dtype),
                       preferred_element_type=jnp.float32)

    n1 = ln(x, params["alpha1"], params["bias1"])
    q = mm(n1, params["wq"]) + params["bq"]
    k = mm(n1, params["wk"]) + params["bk"]
    v = mm(n1, params["wv"]) + params["bv"]
    qh = q.reshape(B, S, h, dk).transpose(0, 2, 1, 3).astype(mm_dtype)
    kh = k.reshape(B, S, h, dk).transpose(0, 2, 1, 3).astype(mm_dtype)
    vh = v.reshape(B, S, h, dk).transpose(0, 2, 1, 3).astype(mm_dtype)
    scores = jnp.einsum("bhqd,bhkd->bhqk", qh, kh,
                        preferred_element_type=jnp.float32) / math.sqrt(dk)
    scores = jnp.where(mask[:, None, None, :] == 0, -1e30, scores)
    attn = jax.nn.softmax(scores, axis=-1)
    ctx = jnp.einsum("bhqk,bhkd->bhqd", attn.astype(mm_dtype), vh,
                     preferred_element_type=jnp.float32)
    ctx = ctx.transpose(0, 2, 1, 3).reshape(B, S, D)
    x1 = x + (mm(ctx, params["wo"]) + params["bo"])
    n2 = ln(x1, params["alpha2"], params["bias2"])
    hdn = jnp.maximum(mm(n2, params["w1"]) + params["b1"], 0.0)
    ff = mm(hdn, params["w2"]) + params["b2"]
    return x1 + ff


if __name__ == "__main__":
    B, S, D, H, DFF = 2, 8, 32, 4, 64

    key = jax.random.PRNGKey(0)
    keys = jax.random.split(key, 16)

    def init(k, shape, fan_in):
        return jax.random.normal(k, shape, jnp.float32) / math.sqrt(fan_in)

    # Weights stored pre-transposed (in, out) relative to nn.Linear's (out, in).
    params = {
        "wq": init(keys[0], (D, D), D), "bq": init(keys[1], (D,), D),
        "wk": init(keys[2], (D, D), D), "bk": init(keys[3], (D,), D),
        "wv": init(keys[4], (D, D), D), "bv": init(keys[5], (D,), D),
        "wo": init(keys[6], (D, D), D), "bo": init(keys[7], (D,), D),
        "w1": init(keys[8], (D, DFF), D), "b1": init(keys[9], (DFF,), D),
        "w2": init(keys[10], (DFF, D), DFF), "b2": init(keys[11], (D,), DFF),
        "alpha1": 1.0, "bias1": 0.0, "alpha2": 1.0, "bias2": 0.0,
    }

    x = jax.random.normal(keys[12], (B, S, D), jnp.float32)
    # mask: keep first 6 keys of batch 0, all keys of batch 1
    mask = jnp.stack([
        jnp.concatenate([jnp.ones((6,)), jnp.zeros((2,))]),
        jnp.ones((S,)),
    ]).astype(jnp.float32)

    out = encoder_block_pallas(x, mask, params, num_heads=H)
    out = jax.block_until_ready(out)

    # Compare against a reference using the same bf16 matmul-input precision as the kernel
    # (kernel additionally uses an EUP approx reciprocal for the softmax denominator).
    ref = encoder_block_ref(x, mask, params, num_heads=H, mm_dtype=jnp.bfloat16)
    assert out.shape == (B, S, D)
    err = float(jnp.max(jnp.abs(out - ref)))
    assert jnp.allclose(out, ref, atol=2e-2, rtol=2e-2), err

    print("KERNEL_OK")
</pallas_src>

<mosaic_0001>
module attributes {stable_mosaic.version = 11 : i64} {
  func.func @encoder_block_kernel(%arg0: i32, %arg1: i32, %arg2: memref<4xf32, #tpu.memory_space<smem>>, %arg3: memref<1x8x32xf32, #tpu.memory_space<vmem>>, %arg4: memref<1x1x8xf32, #tpu.memory_space<vmem>>, %arg5: memref<32x1536xbf16, #tpu.memory_space<vmem>>, %arg6: memref<1x1536xf32, #tpu.memory_space<vmem>>, %arg7: memref<512x32xbf16, #tpu.memory_space<vmem>>, %arg8: memref<1x32xf32, #tpu.memory_space<vmem>>, %arg9: memref<32x64xbf16, #tpu.memory_space<vmem>>, %arg10: memref<1x64xf32, #tpu.memory_space<vmem>>, %arg11: memref<64x32xbf16, #tpu.memory_space<vmem>>, %arg12: memref<1x32xf32, #tpu.memory_space<vmem>>, %arg13: memref<1x8x32xf32, #tpu.memory_space<vmem>>, %arg14: memref<8x1536xbf16, #tpu.memory_space<vmem>>, %arg15: memref<8x512xbf16, #tpu.memory_space<vmem>>, %arg16: memref<8x32xf32, #tpu.memory_space<vmem>>, %arg17: memref<8x32xbf16, #tpu.memory_space<vmem>>, %arg18: memref<8x32xf32, #tpu.memory_space<vmem>>) attributes {dimension_semantics = [#tpu.dimension_semantics<parallel>, #tpu.dimension_semantics<arbitrary>], iteration_bounds = array<i64: 2, 1>, scalar_prefetch = 0 : i64, scratch_operands = 5 : i64, tpu.core_type = #tpu.core_type<tc>, window_params = [{transform_indices = @transform_0, window_bounds = array<i64: 4>}, {transform_indices = @transform_1, window_bounds = array<i64: 1, 8, 32>}, {transform_indices = @transform_2, window_bounds = array<i64: 1, 1, 8>}, {pipeline_mode = #tpu.pipeline_mode<synchronous>, transform_indices = @transform_3, window_bounds = array<i64: 32, 1536>}, {pipeline_mode = #tpu.pipeline_mode<synchronous>, transform_indices = @transform_4, window_bounds = array<i64: 1, 1536>}, {pipeline_mode = #tpu.pipeline_mode<synchronous>, transform_indices = @transform_5, window_bounds = array<i64: 512, 32>}, {pipeline_mode = #tpu.pipeline_mode<synchronous>, transform_indices = @transform_6, window_bounds = array<i64: 1, 32>}, {pipeline_mode = #tpu.pipeline_mode<synchronous>, transform_indices = @transform_7, window_bounds = array<i64: 32, 64>}, {pipeline_mode = #tpu.pipeline_mode<synchronous>, transform_indices = @transform_8, window_bounds = array<i64: 1, 64>}, {pipeline_mode = #tpu.pipeline_mode<synchronous>, transform_indices = @transform_9, window_bounds = array<i64: 64, 32>}, {pipeline_mode = #tpu.pipeline_mode<synchronous>, transform_indices = @transform_10, window_bounds = array<i64: 1, 32>}, {transform_indices = @transform_11, window_bounds = array<i64: 1, 8, 32>}]} {
    %c0_i32 = arith.constant 0 : i32
    %0 = arith.cmpi eq, %arg1, %c0_i32 : i32
    %1 = arith.extui %0 : i1 to i32
    %c0_i32_0 = arith.constant 0 : i32
    %2 = arith.cmpi ne, %1, %c0_i32_0 : i32
    scf.if %2 {
      %c0_16 = arith.constant 0 : index
      %c0_17 = arith.constant 0 : index
      %c0_18 = arith.constant 0 : index
      %20 = vector.load %arg3[%c0_16, %c0_17, %c0_18] : memref<1x8x32xf32, #tpu.memory_space<vmem>>, vector<1x8x32xf32>
      %21 = vector.shape_cast %20 : vector<1x8x32xf32> to vector<8x32xf32>
      %c0_19 = arith.constant 0 : index
      %22 = memref.load %arg2[%c0_19] : memref<4xf32, #tpu.memory_space<smem>>
      %c1 = arith.constant 1 : index
      %23 = memref.load %arg2[%c1] : memref<4xf32, #tpu.memory_space<smem>>
      %cst_20 = arith.constant dense<0.000000e+00> : vector<8xf32>
      %24 = vector.multi_reduction <add>, %21, %cst_20 [1] : vector<8x32xf32> to vector<8xf32>
      %25 = vector.shape_cast %24 : vector<8xf32> to vector<8x1xf32>
      %cst_21 = arith.constant 3.200000e+01 : f32
      %26 = vector.broadcast %cst_21 : f32 to vector<8x1xf32>
      %27 = arith.divf %25, %26 : vector<8x1xf32>
      %28 = vector.broadcast %27 : vector<8x1xf32> to vector<8x32xf32>
      %29 = arith.subf %21, %28 : vector<8x32xf32>
      %30 = arith.mulf %29, %29 : vector<8x32xf32>
      %cst_22 = arith.constant dense<0.000000e+00> : vector<8xf32>
      %31 = vector.multi_reduction <add>, %30, %cst_22 [1] : vector<8x32xf32> to vector<8xf32>
      %32 = vector.shape_cast %31 : vector<8xf32> to vector<8x1xf32>
      %cst_23 = arith.constant 0.0322580636 : f32
      %33 = vector.broadcast %cst_23 : f32 to vector<8x1xf32>
      %34 = arith.mulf %32, %33 : vector<8x1xf32>
      %35 = vector.broadcast %27 : vector<8x1xf32> to vector<8x32xf32>
      %36 = arith.subf %21, %35 : vector<8x32xf32>
      %37 = vector.broadcast %22 : f32 to vector<8x32xf32>
      %38 = arith.mulf %37, %36 : vector<8x32xf32>
      %39 = math.sqrt %34 : vector<8x1xf32>
      %cst_24 = arith.constant 9.99999997E-7 : f32
      %40 = vector.broadcast %cst_24 : f32 to vector<8x1xf32>
      %41 = arith.addf %39, %40 : vector<8x1xf32>
      %42 = vector.broadcast %41 : vector<8x1xf32> to vector<8x32xf32>
      %43 = arith.divf %38, %42 : vector<8x32xf32>
      %44 = vector.broadcast %23 : f32 to vector<8x32xf32>
      %45 = arith.addf %43, %44 : vector<8x32xf32>
      %46 = arith.truncf %45 : vector<8x32xf32> to vector<8x32xbf16>
      %c0_25 = arith.constant 0 : index
      %c0_26 = arith.constant 0 : index
      %47 = vector.load %arg5[%c0_25, %c0_26] : memref<32x1536xbf16, #tpu.memory_space<vmem>>, vector<32x1536xbf16>
      %cst_27 = arith.constant dense<0.000000e+00> : vector<8x1536xf32>
      %48 = tpu.matmul %46, %47, %cst_27 {dimension_numbers = #tpu.dot_dimension_numbers<[1], [0], [0], [1], [0, 0, 1, 1], [], []>} : vector<8x32xbf16>, vector<32x1536xbf16>, vector<8x1536xf32> -> vector<8x1536xf32>
      %c0_28 = arith.constant 0 : index
      %c0_29 = arith.constant 0 : index
      %49 = vector.load %arg6[%c0_28, %c0_29] : memref<1x1536xf32, #tpu.memory_space<vmem>>, vector<1x1536xf32>
      %50 = vector.broadcast %49 : vector<1x1536xf32> to vector<8x1536xf32>
      %51 = arith.addf %48, %50 : vector<8x1536xf32>
      %52 = arith.truncf %51 : vector<8x1536xf32> to vector<8x1536xbf16>
      %c0_30 = arith.constant 0 : index
      %c0_31 = arith.constant 0 : index
      %53 = vector.load %arg14[%c0_30, %c0_31] : memref<8x1536xbf16, #tpu.memory_space<vmem>>, vector<8x1536xbf16>
      tpu.vector_store %arg14[%c0_30, %c0_31], %52 {strides = array<i32>} : memref<8x1536xbf16, #tpu.memory_space<vmem>>, vector<8x1536xbf16>,
      %cst_32 = arith.constant 0.353553385 : f32
      %c0_i32_33 = arith.constant 0 : i32
      %c8_i32 = arith.constant 8 : i32
      %54 = arith.muli %c0_i32_33, %c8_i32 : i32
      %55 = tpu.assume_multiple %54, 8 : i32
      %56 = arith.index_cast %c0_i32_33 : i32 to index
      %c0_34 = arith.constant 0 : index
      %c0_35 = arith.constant 0 : index
      %57 = vector.load %arg4[%56, %c0_34, %c0_35] : memref<1x1x8xf32, #tpu.memory_space<vmem>>, vector<1x1x8xf32>
      %58 = vector.shape_cast %57 : vector<1x1x8xf32> to vector<1x8xf32>
      %59 = arith.index_cast %55 : i32 to index
      %c0_36 = arith.constant 0 : index
      %60 = vector.load %arg14[%59, %c0_36] : memref<8x1536xbf16, #tpu.memory_space<vmem>>, vector<8x128xbf16>
      %61 = arith.index_cast %55 : i32 to index
      %c512 = arith.constant 512 : index
      %62 = vector.load %arg14[%61, %c512] : memref<8x1536xbf16, #tpu.memory_space<vmem>>, vector<8x128xbf16>
      %63 = arith.index_cast %55 : i32 to index
      %c1024 = arith.constant 1024 : index
      %64 = vector.load %arg14[%63, %c1024] : memref<8x1536xbf16, #tpu.memory_space<vmem>>, vector<8x128xbf16>
      %cst_37 = arith.constant dense<0.000000e+00> : vector<8x8xf32>
      %65 = tpu.matmul %60, %62, %cst_37 {dimension_numbers = #tpu.dot_dimension_numbers<[1], [1], [0], [0], [0, 0, 1, 0], [], []>} : vector<8x128xbf16>, vector<8x128xbf16>, vector<8x8xf32> -> vector<8x8xf32>
      %66 = vector.broadcast %cst_32 : f32 to vector<8x8xf32>
      %67 = arith.mulf %65, %66 : vector<8x8xf32>
      %68 = vector.broadcast %58 : vector<1x8xf32> to vector<8x8xf32>
      %69 = arith.addf %67, %68 : vector<8x8xf32>
      %cst_38 = arith.constant dense<0xFF800000> : vector<8xf32>
      %70 = vector.multi_reduction <maximumf>, %69, %cst_38 [1] : vector<8x8xf32> to vector<8xf32>
      %71 = vector.shape_cast %70 : vector<8xf32> to vector<8x1xf32>
      %72 = vector.broadcast %71 : vector<8x1xf32> to vector<8x8xf32>
      %73 = arith.subf %69, %72 : vector<8x8xf32>
      %74 = math.exp %73 : vector<8x8xf32>
      %cst_39 = arith.constant dense<0.000000e+00> : vector<8xf32>
      %75 = vector.multi_reduction <add>, %74, %cst_39 [1] : vector<8x8xf32> to vector<8xf32>
      %76 = vector.shape_cast %75 : vector<8xf32> to vector<8x1xf32>
      %77 = tpu.reciprocal %76 {approx = true} : vector<8x1xf32> -> vector<8x1xf32>
      %78 = vector.broadcast %77 : vector<8x1xf32> to vector<8x8xf32>
      %79 = arith.mulf %74, %78 : vector<8x8xf32>
      %80 = arith.truncf %79 : vector<8x8xf32> to vector<8x8xbf16>
      %cst_40 = arith.constant dense<0.000000e+00> : vector<8x128xf32>
      %81 = tpu.matmul %80, %64, %cst_40 {dimension_numbers = #tpu.dot_dimension_numbers<[1], [0], [0], [1], [0, 0, 1, 1], [], []>} : vector<8x8xbf16>, vector<8x128xbf16>, vector<8x128xf32> -> vector<8x128xf32>
      %82 = arith.truncf %81 : vector<8x128xf32> to vector<8x128xbf16>
      %83 = arith.index_cast %55 : i32 to index
      %c0_41 = arith.constant 0 : index
      %84 = vector.load %arg15[%83, %c0_41] : memref<8x512xbf16, #tpu.memory_space<vmem>>, vector<8x128xbf16>
      tpu.vector_store %arg15[%83, %c0_41], %82 {strides = array<i32>} : memref<8x512xbf16, #tpu.memory_space<vmem>>, vector<8x128xbf16>,
      %85 = arith.index_cast %55 : i32 to index
      %c128 = arith.constant 128 : index
      %86 = vector.load %arg14[%85, %c128] : memref<8x1536xbf16, #tpu.memory_space<vmem>>, vector<8x128xbf16>
      %87 = arith.index_cast %55 : i32 to index
      %c640 = arith.constant 640 : index
      %88 = vector.load %arg14[%87, %c640] : memref<8x1536xbf16, #tpu.memory_space<vmem>>, vector<8x128xbf16>
      %89 = arith.index_cast %55 : i32 to index
      %c1152 = arith.constant 1152 : index
      %90 = vector.load %arg14[%89, %c1152] : memref<8x1536xbf16, #tpu.memory_space<vmem>>, vector<8x128xbf16>
      %cst_42 = arith.constant dense<0.000000e+00> : vector<8x8xf32>
      %91 = tpu.matmul %86, %88, %cst_42 {dimension_numbers = #tpu.dot_dimension_numbers<[1], [1], [0], [0], [0, 0, 1, 0], [], []>} : vector<8x128xbf16>, vector<8x128xbf16>, vector<8x8xf32> -> vector<8x8xf32>
      %92 = vector.broadcast %cst_32 : f32 to vector<8x8xf32>
      %93 = arith.mulf %91, %92 : vector<8x8xf32>
      %94 = vector.broadcast %58 : vector<1x8xf32> to vector<8x8xf32>
      %95 = arith.addf %93, %94 : vector<8x8xf32>
      %cst_43 = arith.constant dense<0xFF800000> : vector<8xf32>
      %96 = vector.multi_reduction <maximumf>, %95, %cst_43 [1] : vector<8x8xf32> to vector<8xf32>
      %97 = vector.shape_cast %96 : vector<8xf32> to vector<8x1xf32>
      %98 = vector.broadcast %97 : vector<8x1xf32> to vector<8x8xf32>
      %99 = arith.subf %95, %98 : vector<8x8xf32>
      %100 = math.exp %99 : vector<8x8xf32>
      %cst_44 = arith.constant dense<0.000000e+00> : vector<8xf32>
      %101 = vector.multi_reduction <add>, %100, %cst_44 [1] : vector<8x8xf32> to vector<8xf32>
      %102 = vector.shape_cast %101 : vector<8xf32> to vector<8x1xf32>
      %103 = tpu.reciprocal %102 {approx = true} : vector<8x1xf32> -> vector<8x1xf32>
      %104 = vector.broadcast %103 : vector<8x1xf32> to vector<8x8xf32>
      %105 = arith.mulf %100, %104 : vector<8x8xf32>
      %106 = arith.truncf %105 : vector<8x8xf32> to vector<8x8xbf16>
      %cst_45 = arith.constant dense<0.000000e+00> : vector<8x128xf32>
      %107 = tpu.matmul %106, %90, %cst_45 {dimension_numbers = #tpu.dot_dimension_numbers<[1], [0], [0], [1], [0, 0, 1, 1], [], []>} : vector<8x8xbf16>, vector<8x128xbf16>, vector<8x128xf32> -> vector<8x128xf32>
      %108 = arith.truncf %107 : vector<8x128xf32> to vector<8x128xbf16>
      %109 = arith.index_cast %55 : i32 to index
      %c128_46 = arith.constant 128 : index
      %110 = vector.load %arg15[%109, %c128_46] : memref<8x512xbf16, #tpu.memory_space<vmem>>, vector<8x128xbf16>
      tpu.vector_store %arg15[%109, %c128_46], %108 {strides = array<i32>} : memref<8x512xbf16, #tpu.memory_space<vmem>>, vector<8x128xbf16>,
      %111 = arith.index_cast %55 : i32 to index
      %c256 = arith.constant 256 : index
      %112 = vector.load %arg14[%111, %c256] : memref<8x1536xbf16, #tpu.memory_space<vmem>>, vector<8x128xbf16>
      %113 = arith.index_cast %55 : i32 to index
      %c768 = arith.constant 768 : index
      %114 = vector.load %arg14[%113, %c768] : memref<8x1536xbf16, #tpu.memory_space<vmem>>, vector<8x128xbf16>
      %115 = arith.index_cast %55 : i32 to index
      %c1280 = arith.constant 1280 : index
      %116 = vector.load %arg14[%115, %c1280] : memref<8x1536xbf16, #tpu.memory_space<vmem>>, vector<8x128xbf16>
      %cst_47 = arith.constant dense<0.000000e+00> : vector<8x8xf32>
      %117 = tpu.matmul %112, %114, %cst_47 {dimension_numbers = #tpu.dot_dimension_numbers<[1], [1], [0], [0], [0, 0, 1, 0], [], []>} : vector<8x128xbf16>, vector<8x128xbf16>, vector<8x8xf32> -> vector<8x8xf32>
      %118 = vector.broadcast %cst_32 : f32 to vector<8x8xf32>
      %119 = arith.mulf %117, %118 : vector<8x8xf32>
      %120 = vector.broadcast %58 : vector<1x8xf32> to vector<8x8xf32>
      %121 = arith.addf %119, %120 : vector<8x8xf32>
      %cst_48 = arith.constant dense<0xFF800000> : vector<8xf32>
      %122 = vector.multi_reduction <maximumf>, %121, %cst_48 [1] : vector<8x8xf32> to vector<8xf32>
      %123 = vector.shape_cast %122 : vector<8xf32> to vector<8x1xf32>
      %124 = vector.broadcast %123 : vector<8x1xf32> to vector<8x8xf32>
      %125 = arith.subf %121, %124 : vector<8x8xf32>
      %126 = math.exp %125 : vector<8x8xf32>
      %cst_49 = arith.constant dense<0.000000e+00> : vector<8xf32>
      %127 = vector.multi_reduction <add>, %126, %cst_49 [1] : vector<8x8xf32> to vector<8xf32>
      %128 = vector.shape_cast %127 : vector<8xf32> to vector<8x1xf32>
      %129 = tpu.reciprocal %128 {approx = true} : vector<8x1xf32> -> vector<8x1xf32>
      %130 = vector.broadcast %129 : vector<8x1xf32> to vector<8x8xf32>
      %131 = arith.mulf %126, %130 : vector<8x8xf32>
      %132 = arith.truncf %131 : vector<8x8xf32> to vector<8x8xbf16>
      %cst_50 = arith.constant dense<0.000000e+00> : vector<8x128xf32>
      %133 = tpu.matmul %132, %116, %cst_50 {dimension_numbers = #tpu.dot_dimension_numbers<[1], [0], [0], [1], [0, 0, 1, 1], [], []>} : vector<8x8xbf16>, vector<8x128xbf16>, vector<8x128xf32> -> vector<8x128xf32>
      %134 = arith.truncf %133 : vector<8x128xf32> to vector<8x128xbf16>
      %135 = arith.index_cast %55 : i32 to index
      %c256_51 = arith.constant 256 : index
      %136 = vector.load %arg15[%135, %c256_51] : memref<8x512xbf16, #tpu.memory_space<vmem>>, vector<8x128xbf16>
      tpu.vector_store %arg15[%135, %c256_51], %134 {strides = array<i32>} : memref<8x512xbf16, #tpu.memory_space<vmem>>, vector<8x128xbf16>,
      %137 = arith.index_cast %55 : i32 to index
      %c384 = arith.constant 384 : index
      %138 = vector.load %arg14[%137, %c384] : memref<8x1536xbf16, #tpu.memory_space<vmem>>, vector<8x128xbf16>
      %139 = arith.index_cast %55 : i32 to index
      %c896 = arith.constant 896 : index
      %140 = vector.load %arg14[%139, %c896] : memref<8x1536xbf16, #tpu.memory_space<vmem>>, vector<8x128xbf16>
      %141 = arith.index_cast %55 : i32 to index
      %c1408 = arith.constant 1408 : index
      %142 = vector.load %arg14[%141, %c1408] : memref<8x1536xbf16, #tpu.memory_space<vmem>>, vector<8x128xbf16>
      %cst_52 = arith.constant dense<0.000000e+00> : vector<8x8xf32>
      %143 = tpu.matmul %138, %140, %cst_52 {dimension_numbers = #tpu.dot_dimension_numbers<[1], [1], [0], [0], [0, 0, 1, 0], [], []>} : vector<8x128xbf16>, vector<8x128xbf16>, vector<8x8xf32> -> vector<8x8xf32>
      %144 = vector.broadcast %cst_32 : f32 to vector<8x8xf32>
      %145 = arith.mulf %143, %144 : vector<8x8xf32>
      %146 = vector.broadcast %58 : vector<1x8xf32> to vector<8x8xf32>
      %147 = arith.addf %145, %146 : vector<8x8xf32>
      %cst_53 = arith.constant dense<0xFF800000> : vector<8xf32>
      %148 = vector.multi_reduction <maximumf>, %147, %cst_53 [1] : vector<8x8xf32> to vector<8xf32>
      %149 = vector.shape_cast %148 : vector<8xf32> to vector<8x1xf32>
      %150 = vector.broadcast %149 : vector<8x1xf32> to vector<8x8xf32>
      %151 = arith.subf %147, %150 : vector<8x8xf32>
      %152 = math.exp %151 : vector<8x8xf32>
      %cst_54 = arith.constant dense<0.000000e+00> : vector<8xf32>
      %153 = vector.multi_reduction <add>, %152, %cst_54 [1] : vector<8x8xf32> to vector<8xf32>
      %154 = vector.shape_cast %153 : vector<8xf32> to vector<8x1xf32>
      %155 = tpu.reciprocal %154 {approx = true} : vector<8x1xf32> -> vector<8x1xf32>
      %156 = vector.broadcast %155 : vector<8x1xf32> to vector<8x8xf32>
      %157 = arith.mulf %152, %156 : vector<8x8xf32>
      %158 = arith.truncf %157 : vector<8x8xf32> to vector<8x8xbf16>
      %cst_55 = arith.constant dense<0.000000e+00> : vector<8x128xf32>
      %159 = tpu.matmul %158, %142, %cst_55 {dimension_numbers = #tpu.dot_dimension_numbers<[1], [0], [0], [1], [0, 0, 1, 1], [], []>} : vector<8x8xbf16>, vector<8x128xbf16>, vector<8x128xf32> -> vector<8x128xf32>
      %160 = arith.truncf %159 : vector<8x128xf32> to vector<8x128xbf16>
      %161 = arith.index_cast %55 : i32 to index
      %c384_56 = arith.constant 384 : index
      %162 = vector.load %arg15[%161, %c384_56] : memref<8x512xbf16, #tpu.memory_space<vmem>>, vector<8x128xbf16>
      tpu.vector_store %arg15[%161, %c384_56], %160 {strides = array<i32>} : memref<8x512xbf16, #tpu.memory_space<vmem>>, vector<8x128xbf16>,
      %c1_i32 = arith.constant 1 : i32
      %c0_57 = arith.constant 0 : index
      %c0_58 = arith.constant 0 : index
      %163 = vector.load %arg15[%c0_57, %c0_58] : memref<8x512xbf16, #tpu.memory_space<vmem>>, vector<8x512xbf16>
      %c0_59 = arith.constant 0 : index
      %c0_60 = arith.constant 0 : index
      %164 = vector.load %arg7[%c0_59, %c0_60] : memref<512x32xbf16, #tpu.memory_space<vmem>>, vector<512x32xbf16>
      %cst_61 = arith.constant dense<0.000000e+00> : vector<8x32xf32>
      %165 = tpu.matmul %163, %164, %cst_61 {dimension_numbers = #tpu.dot_dimension_numbers<[1], [0], [0], [1], [0, 0, 1, 1], [], []>} : vector<8x512xbf16>, vector<512x32xbf16>, vector<8x32xf32> -> vector<8x32xf32>
      %c0_62 = arith.constant 0 : index
      %c0_63 = arith.constant 0 : index
      %166 = vector.load %arg8[%c0_62, %c0_63] : memref<1x32xf32, #tpu.memory_space<vmem>>, vector<1x32xf32>
      %167 = vector.broadcast %166 : vector<1x32xf32> to vector<8x32xf32>
      %168 = arith.addf %165, %167 : vector<8x32xf32>
      %c0_64 = arith.constant 0 : index
      %c0_65 = arith.constant 0 : index
      %c0_66 = arith.constant 0 : index
      %169 = vector.load %arg3[%c0_64, %c0_65, %c0_66] : memref<1x8x32xf32, #tpu.memory_space<vmem>>, vector<1x8x32xf32>
      %170 = vector.shape_cast %169 : vector<1x8x32xf32> to vector<8x32xf32>
      %171 = arith.addf %170, %168 : vector<8x32xf32>
      %c0_67 = arith.constant 0 : index
      %c0_68 = arith.constant 0 : index
      %172 = vector.load %arg16[%c0_67, %c0_68] : memref<8x32xf32, #tpu.memory_space<vmem>>, vector<8x32xf32>
      tpu.vector_store %arg16[%c0_67, %c0_68], %171 {strides = array<i32>} : memref<8x32xf32, #tpu.memory_space<vmem>>, vector<8x32xf32>,
      %c2 = arith.constant 2 : index
      %173 = memref.load %arg2[%c2] : memref<4xf32, #tpu.memory_space<smem>>
      %c3 = arith.constant 3 : index
      %174 = memref.load %arg2[%c3] : memref<4xf32, #tpu.memory_space<smem>>
      %cst_69 = arith.constant dense<0.000000e+00> : vector<8xf32>
      %175 = vector.multi_reduction <add>, %171, %cst_69 [1] : vector<8x32xf32> to vector<8xf32>
      %176 = vector.shape_cast %175 : vector<8xf32> to vector<8x1xf32>
      %cst_70 = arith.constant 3.200000e+01 : f32
      %177 = vector.broadcast %cst_70 : f32 to vector<8x1xf32>
      %178 = arith.divf %176, %177 : vector<8x1xf32>
      %179 = vector.broadcast %178 : vector<8x1xf32> to vector<8x32xf32>
      %180 = arith.subf %171, %179 : vector<8x32xf32>
      %181 = arith.mulf %180, %180 : vector<8x32xf32>
      %cst_71 = arith.constant dense<0.000000e+00> : vector<8xf32>
      %182 = vector.multi_reduction <add>, %181, %cst_71 [1] : vector<8x32xf32> to vector<8xf32>
      %183 = vector.shape_cast %182 : vector<8xf32> to vector<8x1xf32>
      %cst_72 = arith.constant 0.0322580636 : f32
      %184 = vector.broadcast %cst_72 : f32 to vector<8x1xf32>
      %185 = arith.mulf %183, %184 : vector<8x1xf32>
      %186 = vector.broadcast %178 : vector<8x1xf32> to vector<8x32xf32>
      %187 = arith.subf %171, %186 : vector<8x32xf32>
      %188 = vector.broadcast %173 : f32 to vector<8x32xf32>
      %189 = arith.mulf %188, %187 : vector<8x32xf32>
      %190 = math.sqrt %185 : vector<8x1xf32>
      %cst_73 = arith.constant 9.99999997E-7 : f32
      %191 = vector.broadcast %cst_73 : f32 to vector<8x1xf32>
      %192 = arith.addf %190, %191 : vector<8x1xf32>
      %193 = vector.broadcast %192 : vector<8x1xf32> to vector<8x32xf32>
      %194 = arith.divf %189, %193 : vector<8x32xf32>
      %195 = vector.broadcast %174 : f32 to vector<8x32xf32>
      %196 = arith.addf %194, %195 : vector<8x32xf32>
      %197 = arith.truncf %196 : vector<8x32xf32> to vector<8x32xbf16>
      %c0_74 = arith.constant 0 : index
      %c0_75 = arith.constant 0 : index
      %198 = vector.load %arg17[%c0_74, %c0_75] : memref<8x32xbf16, #tpu.memory_space<vmem>>, vector<8x32xbf16>
      tpu.vector_store %arg17[%c0_74, %c0_75], %197 {strides = array<i32>} : memref<8x32xbf16, #tpu.memory_space<vmem>>, vector<8x32xbf16>,
      %cst_76 = arith.constant 0.000000e+00 : f32
      %199 = vector.broadcast %cst_76 : f32 to vector<8x32xf32>
      %c0_77 = arith.constant 0 : index
      %c0_78 = arith.constant 0 : index
      %200 = vector.load %arg18[%c0_77, %c0_78] : memref<8x32xf32, #tpu.memory_space<vmem>>, vector<8x32xf32>
      tpu.vector_store %arg18[%c0_77, %c0_78], %199 {strides = array<i32>} : memref<8x32xf32, #tpu.memory_space<vmem>>, vector<8x32xf32>,
    } else {
    }
    %c0 = arith.constant 0 : index
    %c0_1 = arith.constant 0 : index
    %3 = vector.load %arg17[%c0, %c0_1] : memref<8x32xbf16, #tpu.memory_space<vmem>>, vector<8x32xbf16>
    %c0_2 = arith.constant 0 : index
    %c0_3 = arith.constant 0 : index
    %4 = vector.load %arg9[%c0_2, %c0_3] : memref<32x64xbf16, #tpu.memory_space<vmem>>, vector<32x64xbf16>
    %cst = arith.constant dense<0.000000e+00> : vector<8x64xf32>
    %5 = tpu.matmul %3, %4, %cst {dimension_numbers = #tpu.dot_dimension_numbers<[1], [0], [0], [1], [0, 0, 1, 1], [], []>} : vector<8x32xbf16>, vector<32x64xbf16>, vector<8x64xf32> -> vector<8x64xf32>
    %c0_4 = arith.constant 0 : index
    %c0_5 = arith.constant 0 : index
    %6 = vector.load %arg10[%c0_4, %c0_5] : memref<1x64xf32, #tpu.memory_space<vmem>>, vector<1x64xf32>
    %7 = vector.broadcast %6 : vector<1x64xf32> to vector<8x64xf32>
    %8 = arith.addf %5, %7 : vector<8x64xf32>
    %cst_6 = arith.constant 0.000000e+00 : f32
    %9 = vector.broadcast %cst_6 : f32 to vector<8x64xf32>
    %10 = arith.maximumf %8, %9 : vector<8x64xf32>
    %c0_7 = arith.constant 0 : index
    %c0_8 = arith.constant 0 : index
    %11 = vector.load %arg18[%c0_7, %c0_8] : memref<8x32xf32, #tpu.memory_space<vmem>>, vector<8x32xf32>
    %12 = arith.truncf %10 : vector<8x64xf32> to vector<8x64xbf16>
    %c0_9 = arith.constant 0 : index
    %c0_10 = arith.constant 0 : index
    %13 = vector.load %arg11[%c0_9, %c0_10] : memref<64x32xbf16, #tpu.memory_space<vmem>>, vector<64x32xbf16>
    %cst_11 = arith.constant dense<0.000000e+00> : vector<8x32xf32>
    %14 = tpu.matmul %12, %13, %cst_11 {dimension_numbers = #tpu.dot_dimension_numbers<[1], [0], [0], [1], [0, 0, 1, 1], [], []>} : vector<8x64xbf16>, vector<64x32xbf16>, vector<8x32xf32> -> vector<8x32xf32>
    %15 = arith.addf %11, %14 : vector<8x32xf32>
    %c0_12 = arith.constant 0 : index
    %c0_13 = arith.constant 0 : index
    %16 = vector.load %arg18[%c0_12, %c0_13] : memref<8x32xf32, #tpu.memory_space<vmem>>, vector<8x32xf32>
    tpu.vector_store %arg18[%c0_12, %c0_13], %15 {strides = array<i32>} : memref<8x32xf32, #tpu.memory_space<vmem>>, vector<8x32xf32>,
    %c0_i32_14 = arith.constant 0 : i32
    %17 = arith.cmpi eq, %arg1, %c0_i32_14 : i32
    %18 = arith.extui %17 : i1 to i32
    %c0_i32_15 = arith.constant 0 : i32
    %19 = arith.cmpi ne, %18, %c0_i32_15 : i32
    scf.if %19 {
      %c0_16 = arith.constant 0 : index
      %c0_17 = arith.constant 0 : index
      %20 = vector.load %arg16[%c0_16, %c0_17] : memref<8x32xf32, #tpu.memory_space<vmem>>, vector<8x32xf32>
      %c0_18 = arith.constant 0 : index
      %c0_19 = arith.constant 0 : index
      %21 = vector.load %arg18[%c0_18, %c0_19] : memref<8x32xf32, #tpu.memory_space<vmem>>, vector<8x32xf32>
      %22 = arith.addf %20, %21 : vector<8x32xf32>
      %c0_20 = arith.constant 0 : index
      %c0_21 = arith.constant 0 : index
      %23 = vector.load %arg12[%c0_20, %c0_21] : memref<1x32xf32, #tpu.memory_space<vmem>>, vector<1x32xf32>
      %24 = vector.broadcast %23 : vector<1x32xf32> to vector<8x32xf32>
      %25 = arith.addf %22, %24 : vector<8x32xf32>
      %26 = vector.shape_cast %25 : vector<8x32xf32> to vector<1x8x32xf32>
      %c0_22 = arith.constant 0 : index
      %c0_23 = arith.constant 0 : index
      %c0_24 = arith.constant 0 : index
      %27 = vector.load %arg13[%c0_22, %c0_23, %c0_24] : memref<1x8x32xf32, #tpu.memory_space<vmem>>, vector<1x8x32xf32>
      tpu.vector_store %arg13[%c0_22, %c0_23, %c0_24], %26 {strides = array<i32>} : memref<1x8x32xf32, #tpu.memory_space<vmem>>, vector<1x8x32xf32>,
    } else {
    }
    return
  }
  func.func @transform_0(%arg0: i32, %arg1: i32) -> i32 {
    %c0_i32 = arith.constant 0 : i32
    %c0_i32_0 = arith.constant 0 : i32
    return %c0_i32 : i32
  }
  func.func @transform_1(%arg0: i32, %arg1: i32) -> (i32, i32, i32) {
    %c0_i32 = arith.constant 0 : i32
    %c0_i32_0 = arith.constant 0 : i32
    %c0_i32_1 = arith.constant 0 : i32
    return %arg0, %c0_i32, %c0_i32_0 : i32, i32, i32
  }
  func.func @transform_2(%arg0: i32, %arg1: i32) -> (i32, i32, i32) {
    %c0_i32 = arith.constant 0 : i32
    %c0_i32_0 = arith.constant 0 : i32
    %c0_i32_1 = arith.constant 0 : i32
    return %arg0, %c0_i32, %c0_i32_0 : i32, i32, i32
  }
  func.func @transform_3(%arg0: i32, %arg1: i32) -> (i32, i32) {
    %c0_i32 = arith.constant 0 : i32
    %c0_i32_0 = arith.constant 0 : i32
    %c0_i32_1 = arith.constant 0 : i32
    return %c0_i32, %c0_i32_0 : i32, i32
  }
  func.func @transform_4(%arg0: i32, %arg1: i32) -> (i32, i32) {
    %c0_i32 = arith.constant 0 : i32
    %c0_i32_0 = arith.constant 0 : i32
    %c0_i32_1 = arith.constant 0 : i32
    return %c0_i32, %c0_i32_0 : i32, i32
  }
  func.func @transform_5(%arg0: i32, %arg1: i32) -> (i32, i32) {
    %c0_i32 = arith.constant 0 : i32
    %c0_i32_0 = arith.constant 0 : i32
    %c0_i32_1 = arith.constant 0 : i32
    return %c0_i32, %c0_i32_0 : i32, i32
  }
  func.func @transform_6(%arg0: i32, %arg1: i32) -> (i32, i32) {
    %c0_i32 = arith.constant 0 : i32
    %c0_i32_0 = arith.constant 0 : i32
    %c0_i32_1 = arith.constant 0 : i32
    return %c0_i32, %c0_i32_0 : i32, i32
  }
  func.func @transform_7(%arg0: i32, %arg1: i32) -> (i32, i32) {
    %c0_i32 = arith.constant 0 : i32
    %c0_i32_0 = arith.constant 0 : i32
    return %c0_i32, %arg1 : i32, i32
  }
  func.func @transform_8(%arg0: i32, %arg1: i32) -> (i32, i32) {
    %c0_i32 = arith.constant 0 : i32
    %c0_i32_0 = arith.constant 0 : i32
    return %c0_i32, %arg1 : i32, i32
  }
  func.func @transform_9(%arg0: i32, %arg1: i32) -> (i32, i32) {
    %c0_i32 = arith.constant 0 : i32
    %c0_i32_0 = arith.constant 0 : i32
    return %arg1, %c0_i32 : i32, i32
  }
  func.func @transform_10(%arg0: i32, %arg1: i32) -> (i32, i32) {
    %c0_i32 = arith.constant 0 : i32
    %c0_i32_0 = arith.constant 0 : i32
    %c0_i32_1 = arith.constant 0 : i32
    return %c0_i32, %c0_i32_0 : i32, i32
  }
  func.func @transform_11(%arg0: i32, %arg1: i32) -> (i32, i32, i32) {
    %c0_i32 = arith.constant 0 : i32
    %c0_i32_0 = arith.constant 0 : i32
    %c0_i32_1 = arith.constant 0 : i32
    return %arg0, %c0_i32, %c0_i32_0 : i32, i32, i32
  }
}

module attributes {stable_mosaic.version = 11 : i64} {
  func.func @encoder_block_kernel(%arg0: i32, %arg1: i32, %arg2: memref<4xf32, #tpu.memory_space<smem>>, %arg3: memref<1x8x32xf32, #tpu.memory_space<vmem>>, %arg4: memref<1x1x8xf32, #tpu.memory_space<vmem>>, %arg5: memref<32x1536xbf16, #tpu.memory_space<vmem>>, %arg6: memref<1x1536xf32, #tpu.memory_space<vmem>>, %arg7: memref<512x32xbf16, #tpu.memory_space<vmem>>, %arg8: memref<1x32xf32, #tpu.memory_space<vmem>>, %arg9: memref<32x64xbf16, #tpu.memory_space<vmem>>, %arg10: memref<1x64xf32, #tpu.memory_space<vmem>>, %arg11: memref<64x32xbf16, #tpu.memory_space<vmem>>, %arg12: memref<1x32xf32, #tpu.memory_space<vmem>>, %arg13: memref<1x8x32xf32, #tpu.memory_space<vmem>>, %arg14: memref<8x1536xbf16, #tpu.memory_space<vmem>>, %arg15: memref<8x512xbf16, #tpu.memory_space<vmem>>, %arg16: memref<8x32xf32, #tpu.memory_space<vmem>>, %arg17: memref<8x32xbf16, #tpu.memory_space<vmem>>, %arg18: memref<8x32xf32, #tpu.memory_space<vmem>>) attributes {dimension_semantics = [#tpu.dimension_semantics<parallel>, #tpu.dimension_semantics<arbitrary>], iteration_bounds = array<i64: 2, 1>, scalar_prefetch = 0 : i64, scratch_operands = 5 : i64, tpu.core_type = #tpu.core_type<tc>, window_params = [{transform_indices = @transform_0, window_bounds = array<i64: 4>}, {transform_indices = @transform_1, window_bounds = array<i64: 1, 8, 32>}, {transform_indices = @transform_2, window_bounds = array<i64: 1, 1, 8>}, {pipeline_mode = #tpu.pipeline_mode<synchronous>, transform_indices = @transform_3, window_bounds = array<i64: 32, 1536>}, {pipeline_mode = #tpu.pipeline_mode<synchronous>, transform_indices = @transform_4, window_bounds = array<i64: 1, 1536>}, {pipeline_mode = #tpu.pipeline_mode<synchronous>, transform_indices = @transform_5, window_bounds = array<i64: 512, 32>}, {pipeline_mode = #tpu.pipeline_mode<synchronous>, transform_indices = @transform_6, window_bounds = array<i64: 1, 32>}, {transform_indices = @transform_7, window_bounds = array<i64: 32, 64>}, {transform_indices = @transform_8, window_bounds = array<i64: 1, 64>}, {transform_indices = @transform_9, window_bounds = array<i64: 64, 32>}, {pipeline_mode = #tpu.pipeline_mode<synchronous>, transform_indices = @transform_10, window_bounds = array<i64: 1, 32>}, {transform_indices = @transform_11, window_bounds = array<i64: 1, 8, 32>}]} {
    %c0_i32 = arith.constant 0 : i32
    %0 = arith.cmpi eq, %arg1, %c0_i32 : i32
    %1 = arith.extui %0 : i1 to i32
    %c0_i32_0 = arith.constant 0 : i32
    %2 = arith.cmpi ne, %1, %c0_i32_0 : i32
    scf.if %2 {
      %c0_16 = arith.constant 0 : index
      %c0_17 = arith.constant 0 : index
      %c0_18 = arith.constant 0 : index
      %20 = vector.load %arg3[%c0_16, %c0_17, %c0_18] : memref<1x8x32xf32, #tpu.memory_space<vmem>>, vector<1x8x32xf32>
      %21 = vector.shape_cast %20 : vector<1x8x32xf32> to vector<8x32xf32>
      %c0_19 = arith.constant 0 : index
      %22 = memref.load %arg2[%c0_19] : memref<4xf32, #tpu.memory_space<smem>>
      %c1 = arith.constant 1 : index
      %23 = memref.load %arg2[%c1] : memref<4xf32, #tpu.memory_space<smem>>
      %cst_20 = arith.constant dense<0.000000e+00> : vector<8xf32>
      %24 = vector.multi_reduction <add>, %21, %cst_20 [1] : vector<8x32xf32> to vector<8xf32>
      %25 = vector.shape_cast %24 : vector<8xf32> to vector<8x1xf32>
      %cst_21 = arith.constant 3.200000e+01 : f32
      %26 = vector.broadcast %cst_21 : f32 to vector<8x1xf32>
      %27 = arith.divf %25, %26 : vector<8x1xf32>
      %28 = vector.broadcast %27 : vector<8x1xf32> to vector<8x32xf32>
      %29 = arith.subf %21, %28 : vector<8x32xf32>
      %30 = arith.mulf %29, %29 : vector<8x32xf32>
      %cst_22 = arith.constant dense<0.000000e+00> : vector<8xf32>
      %31 = vector.multi_reduction <add>, %30, %cst_22 [1] : vector<8x32xf32> to vector<8xf32>
      %32 = vector.shape_cast %31 : vector<8xf32> to vector<8x1xf32>
      %cst_23 = arith.constant 0.0322580636 : f32
      %33 = vector.broadcast %cst_23 : f32 to vector<8x1xf32>
      %34 = arith.mulf %32, %33 : vector<8x1xf32>
      %35 = vector.broadcast %27 : vector<8x1xf32> to vector<8x32xf32>
      %36 = arith.subf %21, %35 : vector<8x32xf32>
      %37 = vector.broadcast %22 : f32 to vector<8x32xf32>
      %38 = arith.mulf %37, %36 : vector<8x32xf32>
      %39 = math.sqrt %34 : vector<8x1xf32>
      %cst_24 = arith.constant 9.99999997E-7 : f32
      %40 = vector.broadcast %cst_24 : f32 to vector<8x1xf32>
      %41 = arith.addf %39, %40 : vector<8x1xf32>
      %42 = vector.broadcast %41 : vector<8x1xf32> to vector<8x32xf32>
      %43 = arith.divf %38, %42 : vector<8x32xf32>
      %44 = vector.broadcast %23 : f32 to vector<8x32xf32>
      %45 = arith.addf %43, %44 : vector<8x32xf32>
      %46 = arith.truncf %45 : vector<8x32xf32> to vector<8x32xbf16>
      %c0_25 = arith.constant 0 : index
      %c0_26 = arith.constant 0 : index
      %47 = vector.load %arg5[%c0_25, %c0_26] : memref<32x1536xbf16, #tpu.memory_space<vmem>>, vector<32x1536xbf16>
      %cst_27 = arith.constant dense<0.000000e+00> : vector<8x1536xf32>
      %48 = tpu.matmul %46, %47, %cst_27 {dimension_numbers = #tpu.dot_dimension_numbers<[1], [0], [0], [1], [0, 0, 1, 1], [], []>} : vector<8x32xbf16>, vector<32x1536xbf16>, vector<8x1536xf32> -> vector<8x1536xf32>
      %c0_28 = arith.constant 0 : index
      %c0_29 = arith.constant 0 : index
      %49 = vector.load %arg6[%c0_28, %c0_29] : memref<1x1536xf32, #tpu.memory_space<vmem>>, vector<1x1536xf32>
      %50 = vector.broadcast %49 : vector<1x1536xf32> to vector<8x1536xf32>
      %51 = arith.addf %48, %50 : vector<8x1536xf32>
      %52 = arith.truncf %51 : vector<8x1536xf32> to vector<8x1536xbf16>
      %c0_30 = arith.constant 0 : index
      %c0_31 = arith.constant 0 : index
      %53 = vector.load %arg14[%c0_30, %c0_31] : memref<8x1536xbf16, #tpu.memory_space<vmem>>, vector<8x1536xbf16>
      tpu.vector_store %arg14[%c0_30, %c0_31], %52 {strides = array<i32>} : memref<8x1536xbf16, #tpu.memory_space<vmem>>, vector<8x1536xbf16>,
      %cst_32 = arith.constant 0.353553385 : f32
      %c0_i32_33 = arith.constant 0 : i32
      %c8_i32 = arith.constant 8 : i32
      %54 = arith.muli %c0_i32_33, %c8_i32 : i32
      %55 = tpu.assume_multiple %54, 8 : i32
      %56 = arith.index_cast %c0_i32_33 : i32 to index
      %c0_34 = arith.constant 0 : index
      %c0_35 = arith.constant 0 : index
      %57 = vector.load %arg4[%56, %c0_34, %c0_35] : memref<1x1x8xf32, #tpu.memory_space<vmem>>, vector<1x1x8xf32>
      %58 = vector.shape_cast %57 : vector<1x1x8xf32> to vector<1x8xf32>
      %59 = arith.index_cast %55 : i32 to index
      %c0_36 = arith.constant 0 : index
      %60 = vector.load %arg14[%59, %c0_36] : memref<8x1536xbf16, #tpu.memory_space<vmem>>, vector<8x128xbf16>
      %61 = arith.index_cast %55 : i32 to index
      %c512 = arith.constant 512 : index
      %62 = vector.load %arg14[%61, %c512] : memref<8x1536xbf16, #tpu.memory_space<vmem>>, vector<8x128xbf16>
      %63 = arith.index_cast %55 : i32 to index
      %c1024 = arith.constant 1024 : index
      %64 = vector.load %arg14[%63, %c1024] : memref<8x1536xbf16, #tpu.memory_space<vmem>>, vector<8x128xbf16>
      %cst_37 = arith.constant dense<0.000000e+00> : vector<8x8xf32>
      %65 = tpu.matmul %60, %62, %cst_37 {dimension_numbers = #tpu.dot_dimension_numbers<[1], [1], [0], [0], [0, 0, 1, 0], [], []>} : vector<8x128xbf16>, vector<8x128xbf16>, vector<8x8xf32> -> vector<8x8xf32>
      %66 = vector.broadcast %cst_32 : f32 to vector<8x8xf32>
      %67 = arith.mulf %65, %66 : vector<8x8xf32>
      %68 = vector.broadcast %58 : vector<1x8xf32> to vector<8x8xf32>
      %69 = arith.addf %67, %68 : vector<8x8xf32>
      %cst_38 = arith.constant dense<0xFF800000> : vector<8xf32>
      %70 = vector.multi_reduction <maximumf>, %69, %cst_38 [1] : vector<8x8xf32> to vector<8xf32>
      %71 = vector.shape_cast %70 : vector<8xf32> to vector<8x1xf32>
      %72 = vector.broadcast %71 : vector<8x1xf32> to vector<8x8xf32>
      %73 = arith.subf %69, %72 : vector<8x8xf32>
      %74 = math.exp %73 : vector<8x8xf32>
      %cst_39 = arith.constant dense<0.000000e+00> : vector<8xf32>
      %75 = vector.multi_reduction <add>, %74, %cst_39 [1] : vector<8x8xf32> to vector<8xf32>
      %76 = vector.shape_cast %75 : vector<8xf32> to vector<8x1xf32>
      %77 = tpu.reciprocal %76 {approx = true} : vector<8x1xf32> -> vector<8x1xf32>
      %78 = vector.broadcast %77 : vector<8x1xf32> to vector<8x8xf32>
      %79 = arith.mulf %74, %78 : vector<8x8xf32>
      %80 = arith.truncf %79 : vector<8x8xf32> to vector<8x8xbf16>
      %cst_40 = arith.constant dense<0.000000e+00> : vector<8x128xf32>
      %81 = tpu.matmul %80, %64, %cst_40 {dimension_numbers = #tpu.dot_dimension_numbers<[1], [0], [0], [1], [0, 0, 1, 1], [], []>} : vector<8x8xbf16>, vector<8x128xbf16>, vector<8x128xf32> -> vector<8x128xf32>
      %82 = arith.truncf %81 : vector<8x128xf32> to vector<8x128xbf16>
      %83 = arith.index_cast %55 : i32 to index
      %c0_41 = arith.constant 0 : index
      %84 = vector.load %arg15[%83, %c0_41] : memref<8x512xbf16, #tpu.memory_space<vmem>>, vector<8x128xbf16>
      tpu.vector_store %arg15[%83, %c0_41], %82 {strides = array<i32>} : memref<8x512xbf16, #tpu.memory_space<vmem>>, vector<8x128xbf16>,
      %85 = arith.index_cast %55 : i32 to index
      %c128 = arith.constant 128 : index
      %86 = vector.load %arg14[%85, %c128] : memref<8x1536xbf16, #tpu.memory_space<vmem>>, vector<8x128xbf16>
      %87 = arith.index_cast %55 : i32 to index
      %c640 = arith.constant 640 : index
      %88 = vector.load %arg14[%87, %c640] : memref<8x1536xbf16, #tpu.memory_space<vmem>>, vector<8x128xbf16>
      %89 = arith.index_cast %55 : i32 to index
      %c1152 = arith.constant 1152 : index
      %90 = vector.load %arg14[%89, %c1152] : memref<8x1536xbf16, #tpu.memory_space<vmem>>, vector<8x128xbf16>
      %cst_42 = arith.constant dense<0.000000e+00> : vector<8x8xf32>
      %91 = tpu.matmul %86, %88, %cst_42 {dimension_numbers = #tpu.dot_dimension_numbers<[1], [1], [0], [0], [0, 0, 1, 0], [], []>} : vector<8x128xbf16>, vector<8x128xbf16>, vector<8x8xf32> -> vector<8x8xf32>
      %92 = vector.broadcast %cst_32 : f32 to vector<8x8xf32>
      %93 = arith.mulf %91, %92 : vector<8x8xf32>
      %94 = vector.broadcast %58 : vector<1x8xf32> to vector<8x8xf32>
      %95 = arith.addf %93, %94 : vector<8x8xf32>
      %cst_43 = arith.constant dense<0xFF800000> : vector<8xf32>
      %96 = vector.multi_reduction <maximumf>, %95, %cst_43 [1] : vector<8x8xf32> to vector<8xf32>
      %97 = vector.shape_cast %96 : vector<8xf32> to vector<8x1xf32>
      %98 = vector.broadcast %97 : vector<8x1xf32> to vector<8x8xf32>
      %99 = arith.subf %95, %98 : vector<8x8xf32>
      %100 = math.exp %99 : vector<8x8xf32>
      %cst_44 = arith.constant dense<0.000000e+00> : vector<8xf32>
      %101 = vector.multi_reduction <add>, %100, %cst_44 [1] : vector<8x8xf32> to vector<8xf32>
      %102 = vector.shape_cast %101 : vector<8xf32> to vector<8x1xf32>
      %103 = tpu.reciprocal %102 {approx = true} : vector<8x1xf32> -> vector<8x1xf32>
      %104 = vector.broadcast %103 : vector<8x1xf32> to vector<8x8xf32>
      %105 = arith.mulf %100, %104 : vector<8x8xf32>
      %106 = arith.truncf %105 : vector<8x8xf32> to vector<8x8xbf16>
      %cst_45 = arith.constant dense<0.000000e+00> : vector<8x128xf32>
      %107 = tpu.matmul %106, %90, %cst_45 {dimension_numbers = #tpu.dot_dimension_numbers<[1], [0], [0], [1], [0, 0, 1, 1], [], []>} : vector<8x8xbf16>, vector<8x128xbf16>, vector<8x128xf32> -> vector<8x128xf32>
      %108 = arith.truncf %107 : vector<8x128xf32> to vector<8x128xbf16>
      %109 = arith.index_cast %55 : i32 to index
      %c128_46 = arith.constant 128 : index
      %110 = vector.load %arg15[%109, %c128_46] : memref<8x512xbf16, #tpu.memory_space<vmem>>, vector<8x128xbf16>
      tpu.vector_store %arg15[%109, %c128_46], %108 {strides = array<i32>} : memref<8x512xbf16, #tpu.memory_space<vmem>>, vector<8x128xbf16>,
      %111 = arith.index_cast %55 : i32 to index
      %c256 = arith.constant 256 : index
      %112 = vector.load %arg14[%111, %c256] : memref<8x1536xbf16, #tpu.memory_space<vmem>>, vector<8x128xbf16>
      %113 = arith.index_cast %55 : i32 to index
      %c768 = arith.constant 768 : index
      %114 = vector.load %arg14[%113, %c768] : memref<8x1536xbf16, #tpu.memory_space<vmem>>, vector<8x128xbf16>
      %115 = arith.index_cast %55 : i32 to index
      %c1280 = arith.constant 1280 : index
      %116 = vector.load %arg14[%115, %c1280] : memref<8x1536xbf16, #tpu.memory_space<vmem>>, vector<8x128xbf16>
      %cst_47 = arith.constant dense<0.000000e+00> : vector<8x8xf32>
      %117 = tpu.matmul %112, %114, %cst_47 {dimension_numbers = #tpu.dot_dimension_numbers<[1], [1], [0], [0], [0, 0, 1, 0], [], []>} : vector<8x128xbf16>, vector<8x128xbf16>, vector<8x8xf32> -> vector<8x8xf32>
      %118 = vector.broadcast %cst_32 : f32 to vector<8x8xf32>
      %119 = arith.mulf %117, %118 : vector<8x8xf32>
      %120 = vector.broadcast %58 : vector<1x8xf32> to vector<8x8xf32>
      %121 = arith.addf %119, %120 : vector<8x8xf32>
      %cst_48 = arith.constant dense<0xFF800000> : vector<8xf32>
      %122 = vector.multi_reduction <maximumf>, %121, %cst_48 [1] : vector<8x8xf32> to vector<8xf32>
      %123 = vector.shape_cast %122 : vector<8xf32> to vector<8x1xf32>
      %124 = vector.broadcast %123 : vector<8x1xf32> to vector<8x8xf32>
      %125 = arith.subf %121, %124 : vector<8x8xf32>
      %126 = math.exp %125 : vector<8x8xf32>
      %cst_49 = arith.constant dense<0.000000e+00> : vector<8xf32>
      %127 = vector.multi_reduction <add>, %126, %cst_49 [1] : vector<8x8xf32> to vector<8xf32>
      %128 = vector.shape_cast %127 : vector<8xf32> to vector<8x1xf32>
      %129 = tpu.reciprocal %128 {approx = true} : vector<8x1xf32> -> vector<8x1xf32>
      %130 = vector.broadcast %129 : vector<8x1xf32> to vector<8x8xf32>
      %131 = arith.mulf %126, %130 : vector<8x8xf32>
      %132 = arith.truncf %131 : vector<8x8xf32> to vector<8x8xbf16>
      %cst_50 = arith.constant dense<0.000000e+00> : vector<8x128xf32>
      %133 = tpu.matmul %132, %116, %cst_50 {dimension_numbers = #tpu.dot_dimension_numbers<[1], [0], [0], [1], [0, 0, 1, 1], [], []>} : vector<8x8xbf16>, vector<8x128xbf16>, vector<8x128xf32> -> vector<8x128xf32>
      %134 = arith.truncf %133 : vector<8x128xf32> to vector<8x128xbf16>
      %135 = arith.index_cast %55 : i32 to index
      %c256_51 = arith.constant 256 : index
      %136 = vector.load %arg15[%135, %c256_51] : memref<8x512xbf16, #tpu.memory_space<vmem>>, vector<8x128xbf16>
      tpu.vector_store %arg15[%135, %c256_51], %134 {strides = array<i32>} : memref<8x512xbf16, #tpu.memory_space<vmem>>, vector<8x128xbf16>,
      %137 = arith.index_cast %55 : i32 to index
      %c384 = arith.constant 384 : index
      %138 = vector.load %arg14[%137, %c384] : memref<8x1536xbf16, #tpu.memory_space<vmem>>, vector<8x128xbf16>
      %139 = arith.index_cast %55 : i32 to index
      %c896 = arith.constant 896 : index
      %140 = vector.load %arg14[%139, %c896] : memref<8x1536xbf16, #tpu.memory_space<vmem>>, vector<8x128xbf16>
      %141 = arith.index_cast %55 : i32 to index
      %c1408 = arith.constant 1408 : index
      %142 = vector.load %arg14[%141, %c1408] : memref<8x1536xbf16, #tpu.memory_space<vmem>>, vector<8x128xbf16>
      %cst_52 = arith.constant dense<0.000000e+00> : vector<8x8xf32>
      %143 = tpu.matmul %138, %140, %cst_52 {dimension_numbers = #tpu.dot_dimension_numbers<[1], [1], [0], [0], [0, 0, 1, 0], [], []>} : vector<8x128xbf16>, vector<8x128xbf16>, vector<8x8xf32> -> vector<8x8xf32>
      %144 = vector.broadcast %cst_32 : f32 to vector<8x8xf32>
      %145 = arith.mulf %143, %144 : vector<8x8xf32>
      %146 = vector.broadcast %58 : vector<1x8xf32> to vector<8x8xf32>
      %147 = arith.addf %145, %146 : vector<8x8xf32>
      %cst_53 = arith.constant dense<0xFF800000> : vector<8xf32>
      %148 = vector.multi_reduction <maximumf>, %147, %cst_53 [1] : vector<8x8xf32> to vector<8xf32>
      %149 = vector.shape_cast %148 : vector<8xf32> to vector<8x1xf32>
      %150 = vector.broadcast %149 : vector<8x1xf32> to vector<8x8xf32>
      %151 = arith.subf %147, %150 : vector<8x8xf32>
      %152 = math.exp %151 : vector<8x8xf32>
      %cst_54 = arith.constant dense<0.000000e+00> : vector<8xf32>
      %153 = vector.multi_reduction <add>, %152, %cst_54 [1] : vector<8x8xf32> to vector<8xf32>
      %154 = vector.shape_cast %153 : vector<8xf32> to vector<8x1xf32>
      %155 = tpu.reciprocal %154 {approx = true} : vector<8x1xf32> -> vector<8x1xf32>
      %156 = vector.broadcast %155 : vector<8x1xf32> to vector<8x8xf32>
      %157 = arith.mulf %152, %156 : vector<8x8xf32>
      %158 = arith.truncf %157 : vector<8x8xf32> to vector<8x8xbf16>
      %cst_55 = arith.constant dense<0.000000e+00> : vector<8x128xf32>
      %159 = tpu.matmul %158, %142, %cst_55 {dimension_numbers = #tpu.dot_dimension_numbers<[1], [0], [0], [1], [0, 0, 1, 1], [], []>} : vector<8x8xbf16>, vector<8x128xbf16>, vector<8x128xf32> -> vector<8x128xf32>
      %160 = arith.truncf %159 : vector<8x128xf32> to vector<8x128xbf16>
      %161 = arith.index_cast %55 : i32 to index
      %c384_56 = arith.constant 384 : index
      %162 = vector.load %arg15[%161, %c384_56] : memref<8x512xbf16, #tpu.memory_space<vmem>>, vector<8x128xbf16>
      tpu.vector_store %arg15[%161, %c384_56], %160 {strides = array<i32>} : memref<8x512xbf16, #tpu.memory_space<vmem>>, vector<8x128xbf16>,
      %c1_i32 = arith.constant 1 : i32
      %c0_57 = arith.constant 0 : index
      %c0_58 = arith.constant 0 : index
      %163 = vector.load %arg15[%c0_57, %c0_58] : memref<8x512xbf16, #tpu.memory_space<vmem>>, vector<8x512xbf16>
      %c0_59 = arith.constant 0 : index
      %c0_60 = arith.constant 0 : index
      %164 = vector.load %arg7[%c0_59, %c0_60] : memref<512x32xbf16, #tpu.memory_space<vmem>>, vector<512x32xbf16>
      %cst_61 = arith.constant dense<0.000000e+00> : vector<8x32xf32>
      %165 = tpu.matmul %163, %164, %cst_61 {dimension_numbers = #tpu.dot_dimension_numbers<[1], [0], [0], [1], [0, 0, 1, 1], [], []>} : vector<8x512xbf16>, vector<512x32xbf16>, vector<8x32xf32> -> vector<8x32xf32>
      %c0_62 = arith.constant 0 : index
      %c0_63 = arith.constant 0 : index
      %166 = vector.load %arg8[%c0_62, %c0_63] : memref<1x32xf32, #tpu.memory_space<vmem>>, vector<1x32xf32>
      %167 = vector.broadcast %166 : vector<1x32xf32> to vector<8x32xf32>
      %168 = arith.addf %165, %167 : vector<8x32xf32>
      %c0_64 = arith.constant 0 : index
      %c0_65 = arith.constant 0 : index
      %c0_66 = arith.constant 0 : index
      %169 = vector.load %arg3[%c0_64, %c0_65, %c0_66] : memref<1x8x32xf32, #tpu.memory_space<vmem>>, vector<1x8x32xf32>
      %170 = vector.shape_cast %169 : vector<1x8x32xf32> to vector<8x32xf32>
      %171 = arith.addf %170, %168 : vector<8x32xf32>
      %c0_67 = arith.constant 0 : index
      %c0_68 = arith.constant 0 : index
      %172 = vector.load %arg16[%c0_67, %c0_68] : memref<8x32xf32, #tpu.memory_space<vmem>>, vector<8x32xf32>
      tpu.vector_store %arg16[%c0_67, %c0_68], %171 {strides = array<i32>} : memref<8x32xf32, #tpu.memory_space<vmem>>, vector<8x32xf32>,
      %c2 = arith.constant 2 : index
      %173 = memref.load %arg2[%c2] : memref<4xf32, #tpu.memory_space<smem>>
      %c3 = arith.constant 3 : index
      %174 = memref.load %arg2[%c3] : memref<4xf32, #tpu.memory_space<smem>>
      %cst_69 = arith.constant dense<0.000000e+00> : vector<8xf32>
      %175 = vector.multi_reduction <add>, %171, %cst_69 [1] : vector<8x32xf32> to vector<8xf32>
      %176 = vector.shape_cast %175 : vector<8xf32> to vector<8x1xf32>
      %cst_70 = arith.constant 3.200000e+01 : f32
      %177 = vector.broadcast %cst_70 : f32 to vector<8x1xf32>
      %178 = arith.divf %176, %177 : vector<8x1xf32>
      %179 = vector.broadcast %178 : vector<8x1xf32> to vector<8x32xf32>
      %180 = arith.subf %171, %179 : vector<8x32xf32>
      %181 = arith.mulf %180, %180 : vector<8x32xf32>
      %cst_71 = arith.constant dense<0.000000e+00> : vector<8xf32>
      %182 = vector.multi_reduction <add>, %181, %cst_71 [1] : vector<8x32xf32> to vector<8xf32>
      %183 = vector.shape_cast %182 : vector<8xf32> to vector<8x1xf32>
      %cst_72 = arith.constant 0.0322580636 : f32
      %184 = vector.broadcast %cst_72 : f32 to vector<8x1xf32>
      %185 = arith.mulf %183, %184 : vector<8x1xf32>
      %186 = vector.broadcast %178 : vector<8x1xf32> to vector<8x32xf32>
      %187 = arith.subf %171, %186 : vector<8x32xf32>
      %188 = vector.broadcast %173 : f32 to vector<8x32xf32>
      %189 = arith.mulf %188, %187 : vector<8x32xf32>
      %190 = math.sqrt %185 : vector<8x1xf32>
      %cst_73 = arith.constant 9.99999997E-7 : f32
      %191 = vector.broadcast %cst_73 : f32 to vector<8x1xf32>
      %192 = arith.addf %190, %191 : vector<8x1xf32>
      %193 = vector.broadcast %192 : vector<8x1xf32> to vector<8x32xf32>
      %194 = arith.divf %189, %193 : vector<8x32xf32>
      %195 = vector.broadcast %174 : f32 to vector<8x32xf32>
      %196 = arith.addf %194, %195 : vector<8x32xf32>
      %197 = arith.truncf %196 : vector<8x32xf32> to vector<8x32xbf16>
      %c0_74 = arith.constant 0 : index
      %c0_75 = arith.constant 0 : index
      %198 = vector.load %arg17[%c0_74, %c0_75] : memref<8x32xbf16, #tpu.memory_space<vmem>>, vector<8x32xbf16>
      tpu.vector_store %arg17[%c0_74, %c0_75], %197 {strides = array<i32>} : memref<8x32xbf16, #tpu.memory_space<vmem>>, vector<8x32xbf16>,
      %cst_76 = arith.constant 0.000000e+00 : f32
      %199 = vector.broadcast %cst_76 : f32 to vector<8x32xf32>
      %c0_77 = arith.constant 0 : index
      %c0_78 = arith.constant 0 : index
      %200 = vector.load %arg18[%c0_77, %c0_78] : memref<8x32xf32, #tpu.memory_space<vmem>>, vector<8x32xf32>
      tpu.vector_store %arg18[%c0_77, %c0_78], %199 {strides = array<i32>} : memref<8x32xf32, #tpu.memory_space<vmem>>, vector<8x32xf32>,
    } else {
    }
    %c0 = arith.constant 0 : index
    %c0_1 = arith.constant 0 : index
    %3 = vector.load %arg17[%c0, %c0_1] : memref<8x32xbf16, #tpu.memory_space<vmem>>, vector<8x32xbf16>
    %c0_2 = arith.constant 0 : index
    %c0_3 = arith.constant 0 : index
    %4 = vector.load %arg9[%c0_2, %c0_3] : memref<32x64xbf16, #tpu.memory_space<vmem>>, vector<32x64xbf16>
    %cst = arith.constant dense<0.000000e+00> : vector<8x64xf32>
    %5 = tpu.matmul %3, %4, %cst {dimension_numbers = #tpu.dot_dimension_numbers<[1], [0], [0], [1], [0, 0, 1, 1], [], []>} : vector<8x32xbf16>, vector<32x64xbf16>, vector<8x64xf32> -> vector<8x64xf32>
    %c0_4 = arith.constant 0 : index
    %c0_5 = arith.constant 0 : index
    %6 = vector.load %arg10[%c0_4, %c0_5] : memref<1x64xf32, #tpu.memory_space<vmem>>, vector<1x64xf32>
    %7 = vector.broadcast %6 : vector<1x64xf32> to vector<8x64xf32>
    %8 = arith.addf %5, %7 : vector<8x64xf32>
    %cst_6 = arith.constant 0.000000e+00 : f32
    %9 = vector.broadcast %cst_6 : f32 to vector<8x64xf32>
    %10 = arith.maximumf %8, %9 : vector<8x64xf32>
    %c0_7 = arith.constant 0 : index
    %c0_8 = arith.constant 0 : index
    %11 = vector.load %arg18[%c0_7, %c0_8] : memref<8x32xf32, #tpu.memory_space<vmem>>, vector<8x32xf32>
    %12 = arith.truncf %10 : vector<8x64xf32> to vector<8x64xbf16>
    %c0_9 = arith.constant 0 : index
    %c0_10 = arith.constant 0 : index
    %13 = vector.load %arg11[%c0_9, %c0_10] : memref<64x32xbf16, #tpu.memory_space<vmem>>, vector<64x32xbf16>
    %cst_11 = arith.constant dense<0.000000e+00> : vector<8x32xf32>
    %14 = tpu.matmul %12, %13, %cst_11 {dimension_numbers = #tpu.dot_dimension_numbers<[1], [0], [0], [1], [0, 0, 1, 1], [], []>} : vector<8x64xbf16>, vector<64x32xbf16>, vector<8x32xf32> -> vector<8x32xf32>
    %15 = arith.addf %11, %14 : vector<8x32xf32>
    %c0_12 = arith.constant 0 : index
    %c0_13 = arith.constant 0 : index
    %16 = vector.load %arg18[%c0_12, %c0_13] : memref<8x32xf32, #tpu.memory_space<vmem>>, vector<8x32xf32>
    tpu.vector_store %arg18[%c0_12, %c0_13], %15 {strides = array<i32>} : memref<8x32xf32, #tpu.memory_space<vmem>>, vector<8x32xf32>,
    %c0_i32_14 = arith.constant 0 : i32
    %17 = arith.cmpi eq, %arg1, %c0_i32_14 : i32
    %18 = arith.extui %17 : i1 to i32
    %c0_i32_15 = arith.constant 0 : i32
    %19 = arith.cmpi ne, %18, %c0_i32_15 : i32
    scf.if %19 {
      %c0_16 = arith.constant 0 : index
      %c0_17 = arith.constant 0 : index
      %20 = vector.load %arg16[%c0_16, %c0_17] : memref<8x32xf32, #tpu.memory_space<vmem>>, vector<8x32xf32>
      %c0_18 = arith.constant 0 : index
      %c0_19 = arith.constant 0 : index
      %21 = vector.load %arg18[%c0_18, %c0_19] : memref<8x32xf32, #tpu.memory_space<vmem>>, vector<8x32xf32>
      %22 = arith.addf %20, %21 : vector<8x32xf32>
      %c0_20 = arith.constant 0 : index
      %c0_21 = arith.constant 0 : index
      %23 = vector.load %arg12[%c0_20, %c0_21] : memref<1x32xf32, #tpu.memory_space<vmem>>, vector<1x32xf32>
      %24 = vector.broadcast %23 : vector<1x32xf32> to vector<8x32xf32>
      %25 = arith.addf %22, %24 : vector<8x32xf32>
      %26 = vector.shape_cast %25 : vector<8x32xf32> to vector<1x8x32xf32>
      %c0_22 = arith.constant 0 : index
      %c0_23 = arith.constant 0 : index
      %c0_24 = arith.constant 0 : index
      %27 = vector.load %arg13[%c0_22, %c0_23, %c0_24] : memref<1x8x32xf32, #tpu.memory_space<vmem>>, vector<1x8x32xf32>
      tpu.vector_store %arg13[%c0_22, %c0_23, %c0_24], %26 {strides = array<i32>} : memref<1x8x32xf32, #tpu.memory_space<vmem>>, vector<1x8x32xf32>,
    } else {
    }
    return
  }
  func.func @transform_0(%arg0: i32, %arg1: i32) -> i32 {
    %c0_i32 = arith.constant 0 : i32
    %c0_i32_0 = arith.constant 0 : i32
    return %c0_i32 : i32
  }
  func.func @transform_1(%arg0: i32, %arg1: i32) -> (i32, i32, i32) {
    %c0_i32 = arith.constant 0 : i32
    %c0_i32_0 = arith.constant 0 : i32
    %c0_i32_1 = arith.constant 0 : i32
    return %arg0, %c0_i32, %c0_i32_0 : i32, i32, i32
  }
  func.func @transform_2(%arg0: i32, %arg1: i32) -> (i32, i32, i32) {
    %c0_i32 = arith.constant 0 : i32
    %c0_i32_0 = arith.constant 0 : i32
    %c0_i32_1 = arith.constant 0 : i32
    return %arg0, %c0_i32, %c0_i32_0 : i32, i32, i32
  }
  func.func @transform_3(%arg0: i32, %arg1: i32) -> (i32, i32) {
    %c0_i32 = arith.constant 0 : i32
    %c0_i32_0 = arith.constant 0 : i32
    %c0_i32_1 = arith.constant 0 : i32
    return %c0_i32, %c0_i32_0 : i32, i32
  }
  func.func @transform_4(%arg0: i32, %arg1: i32) -> (i32, i32) {
    %c0_i32 = arith.constant 0 : i32
    %c0_i32_0 = arith.constant 0 : i32
    %c0_i32_1 = arith.constant 0 : i32
    return %c0_i32, %c0_i32_0 : i32, i32
  }
  func.func @transform_5(%arg0: i32, %arg1: i32) -> (i32, i32) {
    %c0_i32 = arith.constant 0 : i32
    %c0_i32_0 = arith.constant 0 : i32
    %c0_i32_1 = arith.constant 0 : i32
    return %c0_i32, %c0_i32_0 : i32, i32
  }
  func.func @transform_6(%arg0: i32, %arg1: i32) -> (i32, i32) {
    %c0_i32 = arith.constant 0 : i32
    %c0_i32_0 = arith.constant 0 : i32
    %c0_i32_1 = arith.constant 0 : i32
    return %c0_i32, %c0_i32_0 : i32, i32
  }
  func.func @transform_7(%arg0: i32, %arg1: i32) -> (i32, i32) {
    %c0_i32 = arith.constant 0 : i32
    %c0_i32_0 = arith.constant 0 : i32
    return %c0_i32, %arg1 : i32, i32
  }
  func.func @transform_8(%arg0: i32, %arg1: i32) -> (i32, i32) {
    %c0_i32 = arith.constant 0 : i32
    %c0_i32_0 = arith.constant 0 : i32
    return %c0_i32, %arg1 : i32, i32
  }
  func.func @transform_9(%arg0: i32, %arg1: i32) -> (i32, i32) {
    %c0_i32 = arith.constant 0 : i32
    %c0_i32_0 = arith.constant 0 : i32
    return %arg1, %c0_i32 : i32, i32
  }
  func.func @transform_10(%arg0: i32, %arg1: i32) -> (i32, i32) {
    %c0_i32 = arith.constant 0 : i32
    %c0_i32_0 = arith.constant 0 : i32
    %c0_i32_1 = arith.constant 0 : i32
    return %c0_i32, %c0_i32_0 : i32, i32
  }
  func.func @transform_11(%arg0: i32, %arg1: i32) -> (i32, i32, i32) {
    %c0_i32 = arith.constant 0 : i32
    %c0_i32_0 = arith.constant 0 : i32
    %c0_i32_1 = arith.constant 0 : i32
    return %arg0, %c0_i32, %c0_i32_0 : i32, i32, i32
  }
}

</mosaic_0001>

<bundles_post_ra>
// kernel: tpu_custom_call.1
= control target key start
LH: loop header
LB: loop body
LE: loop exit
PB: predicated region body
PF: predicated region fallthrough
CT: control target
= control target key end

     0   :  { %s2774_s0 = inlined_call_operand.vmem [shape: f32[4], index: 0, kind: input, shape index: {}]   ;;  %s2775_s1 = inlined_call_operand.vmem [shape: f32[2,8,32], index: 1, kind: input, shape index: {}]   ;;  %s2776_s2 = inlined_call_operand.vmem [shape: f32[2,1,8], index: 2, kind: input, shape index: {}]   ;;  %s2777_s3 = inlined_call_operand.vmem [shape: bf16[32,1536], index: 3, kind: input, shape index: {}]   ;;  %s2778_s4 = inlined_call_operand.vmem [shape: f32[1,1536], index: 4, kind: input, shape index: {}]   ;;  %s2779_s5 = inlined_call_operand.vmem [shape: bf16[512,32], index: 5, kind: input, shape index: {}]   ;;  %s2780_s6 = inlined_call_operand.vmem [shape: f32[1,32], index: 6, kind: input, shape index: {}]   ;;  %s2781_s7 = inlined_call_operand.vmem [shape: bf16[32,64], index: 7, kind: input, shape index: {}]   ;;  %s2782_s8 = inlined_call_operand.vmem [shape: f32[1,64], index: 8, kind: input, shape index: {}]   ;;  %s2783_s9 = inlined_call_operand.vmem [shape: bf16[64,32], index: 9, kind: input, shape index: {}]   ;;  %s2784_s10 = inlined_call_operand.vmem [shape: f32[1,32], index: 10, kind: input, shape index: {}]   ;;  %s2785_s11 = inlined_call_operand.hbm [shape: f32[2,8,32], index: 11, kind: output, shape index: {}]  }
   0x1   :  { %2787 = sst [smem:[#allocation14_spill]] %s2774_s0 }
   0x2   :  { %2788 = sst [smem:[#allocation15_spill]] %s2775_s1 }
   0x3   :  { %16 = vsyncpa [#allocation9], 0 }
   0x4   :  { %17 = vsyncpa [#allocation8], 0 }
   0x5   :  { %19 = vsyncpa [#allocation8 + $0x1], 0  ;;  %s2329_s17 = smov 0   ;;  %s2331_s18 = smov 0  }
   0x6   :  { %s2333_s19 = smov 0   ;;  %s2335_s20 = smov 0  }
   0x7   :  { %s2337_s21 = smov 0   ;;  %s2339_s22 = smov 0  }
   0x8 LB: > { %s1722_s23 = sadd.s32 4294967295, %s2264_s22   ;;  %s1723_s24 = sadd.s32 4294967294, %s2264_s22   ;;  %s2264_s22 = sphi %s2339_s22, %s25_s22   ;;  %s2260_s21 = sphi %s2337_s21, %s2800_s21   ;;  %s2256_s20 = sphi %s2335_s20, %s2799_s20   ;;  %s2252_s19 = sphi %s2333_s19, %s2798_s19   ;;  %s2248_s18 = sphi %s2331_s18, %s2797_s18   ;;  %s2244_s17 = sphi %s2329_s17, %s2796_s17  }
   0x9   : > { %s37_s25 = sadd.s32 1, %s2260_s21  ;;  %s300_s26 = sadd.s32 1, %s2252_s19 }
   0xa   : > { %p39_p0 = scmp.ge.s32.totalorder %s37_s25, 2  ;;  %p310_p1 = scmp.ne.s32.totalorder %s2252_s19, %s2248_s18 }
   0xb   : > { %p311_p2 = scmp.eq.s32.totalorder %s1722_s23, 1  ;;  %p316_p3 = scmp.ne.s32.totalorder %s2248_s18, %s2244_s17 }
   0xc   : > { %s2802_s25 = smov (%p39_p0, %s37_s25), 0  ;;  %p317_p5 = scmp.eq.s32.totalorder %s1723_s24, 1 }
   0xd   : > { %2789 = sst [smem:[#allocation13_spill]] %s2802_s25  ;;  %p2369_p4 = por %p311_p2, %p310_p1 }
   0xe   : > { %s297_s28 = ssub.s32 %s2260_s21, %s2802_s25  ;;  %p1724_p6 = scmp.ge.s32.totalorder %s2264_s22, 1 }
   0xf   : > { %p298_p7 = scmp.eq.s32.totalorder %s297_s28, 0  ;;  %p2376_p8 = por %p317_p5, %p316_p3 }
  0x10   : > { %p324_p9 = scmp.lt.s32.totalorder %s2264_s22, 3  ;;  %p2083_p11 = scmp.eq.s32.totalorder %s1722_s23, 0 }
  0x11   : > { %s2382_s30 = scalar_select %p298_p7, %s2252_s19, %s300_s26  }
  0x12   : > { %p325_p10 = pnand %p1724_p6, %p324_p9  ;;  %s2792_s0 = sld [smem:[#allocation14_spill]] }
  0x13   : > { %s2266_s15 = smov [#allocation7]  }
  0x14   : > { %p2075_p12 = pneg %p325_p10 }
  0x15   : > { %399 = sbr.rel (%p325_p10) target bundleno = 1751 (0x6d7), region = 64 }
  0x16   : > { %p2076_p13 = pnand %p2083_p11, %p2075_p12 }
  0x18   : > { %s336_s14 = sshll.u32 %s2792_s0, 4  ;;  %s337_s14 = int_to_ptr.vmem [resolvable:$true] %s336_s14 }
  0x19   : > { %2078 = dma.vmem_to_smem (!%p2076_p13), %s337_s14, 16, %s2266_s15, [#allocation9]  }
  0x1a   : > { %2235 = dma.done.wait (%p2083_p11), [#allocation9], 16  }
  0x1b   : > { %2237 = vsyncadd (%p2083_p11), [#allocation9], 4294967280 }
  0x1c   : > { %406 = sfence }
  0x1d   : > { %p455_p0 = scmp.lt.s32.totalorder %s2256_s20, 1  ;;  %vm483_vm0 = vcmask 261120   ;;  %s2793_s1 = sld [smem:[#allocation15_spill]]  ;;  %v2267_v2 = vmov 32.0   ;;  %v1785_v16 = vld [vmem:[%s2777_s3 + $0x60] sm:$0xf] }
  0x1e   : > { %2141 = vrcp.f32 %v2267_v2  ;;  %v2025_v17 = vld [vmem:[%s2777_s3 + $0x8c] sm:$0xf0]  ;;  %v2019_v18 = vld [vmem:[%s2777_s3 + $0x64] sm:$0xf]  ;;  %v1787_v20 = vld [vmem:[%s2777_s3 + $0x90] sm:$0xf0] }
  0x1f   : > { %s2389_s16 = scalar_select %p455_p0, %s2256_s20, 1  ;;  %v1786_v19 = vor.u32 %v2025_v17, %v1785_v16  ;;  %v1793_v21 = vld [vmem:[%s2777_s3 + $0x68] sm:$0xf]  ;;  %v2026_v22 = vld [vmem:[%s2777_s3 + $0x94] sm:$0xf0]  ;;  %v1790_v24 = vor.u32 %v2019_v18, %v1787_v20  ;;  %vm918_vm8 = vcmask 1043456  }
  0x20   : > { %v1794_v25 = vor.u32 %v2026_v22, %v1793_v21  ;;  %v2020_v26 = vld [vmem:[%s2777_s3 + $0x6c] sm:$0xf]  ;;  %v1795_v27 = vld [vmem:[%s2777_s3 + $0x98] sm:$0xf0]  ;;  %v1737_v30 = vld [vmem:[%s2777_s3] sm:$0xf] }
  0x21   : > { %s1733_s23 = sshll.u32 %s2389_s16, 3  ;;  %715 = vmatpush.bf16.msra.mxu0 %v1786_v19  ;;  %v1798_v29 = vor.u32 %v2020_v26, %v1795_v27  ;;  %728 = vmatpush.bf16.msra.mxu1 %v1790_v24  ;;  %v2013_v31 = vld [vmem:[%s2777_s3 + $0x2c] sm:$0xf0]  ;;  %v2007_v32 = vld [vmem:[%s2777_s3 + $0x4] sm:$0xf]  ;;  %s481_s13 = sld [smem:[#allocation7]] }
  0x22   : > { %741 = vmatpush.bf16.msra.mxu2 %v1794_v25  ;;  %v1738_v34 = vor.u32 %v2013_v31, %v1737_v30  ;;  %v1739_v35 = vld [vmem:[%s2777_s3 + $0x30] sm:$0xf0]  ;;  %v1745_v36 = vld [vmem:[%s2777_s3 + $0x8] sm:$0xf]  ;;  %v2014_v37 = vld [vmem:[%s2777_s3 + $0x34] sm:$0xf0]  ;;  %s2794_s0 = scalar_lea.vmem %s2776_s2, %s2389_s16 }
  0x23   : > { %s458_s14 = scalar_lea.vmem %s2793_s1, %s1733_s23  ;;  %754 = vmatpush.bf16.msra.mxu3 %v1798_v29  ;;  %v1742_v38 = vor.u32 %v2007_v32, %v1739_v35  ;;  %v1746_v39 = vor.u32 %v2014_v37, %v1745_v36  ;;  %v2008_v40 = vld [vmem:[%s2777_s3 + $0xc] sm:$0xf]  ;;  %v1747_v41 = vld [vmem:[%s2777_s3 + $0x38] sm:$0xf0]  ;;  %v1801_v47 = vld [vmem:[%s2777_s3 + $0x70] sm:$0xf] }
  0x24   : > { %v2399_v0 = vld [vmem:[%s458_s14] sm:$0xff]  ;;  %v2142_v3 = vpop.eup %2141  ;;  %v1750_v43 = vor.u32 %v2008_v40, %v1747_v41  ;;  %v2021_v49 = vld [vmem:[%s2777_s3 + $0x74] sm:$0xf]  ;;  %v1809_v52 = vld [vmem:[%s2777_s3 + $0x78] sm:$0xf]  ;;  %s1734_s14 = sld [smem:[#allocation7 + $0x1]] }
  0x25   : > { %v484_v1 = vsel %vm483_vm0, %v2399_v0, 0.0  ;;  %v488_v4 = vmul.f32 32.0, %v2142_v3  ;;  %vm492_vm1 = vweird.f32 %v2142_v3  ;;  %716 = vmatpush.bf16.msra.mxu0 %v1738_v34  ;;  %729 = vmatpush.bf16.msra.mxu1 %v1742_v38  ;;  %v2027_v48 = vld [vmem:[%s2777_s3 + $0x9c] sm:$0xf0]  ;;  %v1803_v51 = vld [vmem:[%s2777_s3 + $0xa0] sm:$0xf0] }
  0x26   : > { %485 = vadd.xlane.f32.xlu0 %v484_v1  ;;  %742 = vmatpush.bf16.msra.mxu2 %v1746_v39  ;;  %v1802_v50 = vor.u32 %v2027_v48, %v1801_v47  ;;  %v2028_v53 = vld [vmem:[%s2777_s3 + $0xa4] sm:$0xf0]  ;;  %v1806_v55 = vor.u32 %v2021_v49, %v1803_v51  ;;  %v2022_v57 = vld [vmem:[%s2777_s3 + $0x7c] sm:$0xf]  ;;  %v1811_v58 = vld [vmem:[%s2777_s3 + $0xa8] sm:$0xf0] }
  0x27   : > { %v489_v5 = vsub.f32 1.0, %v488_v4  ;;  %755 = vmatpush.bf16.msra.mxu3 %v1750_v43  ;;  %v1810_v56 = vor.u32 %v2028_v53, %v1809_v52  ;;  %v1753_v59 = vld [vmem:[%s2777_s3 + $0x10] sm:$0xf]  ;;  %v1814_v60 = vor.u32 %v2022_v57, %v1811_v58  ;;  %v2015_v61 = vld [vmem:[%s2777_s3 + $0x3c] sm:$0xf0]  ;;  %v501_v20 = vstv %s481_s13  ;;  %s1975_s25 = sld [smem:[#allocation7 + $0x2]] }
  0x28   : > { %v2009_v62 = vld [vmem:[%s2777_s3 + $0x14] sm:$0xf]  ;;  %v1755_v63 = vld [vmem:[%s2777_s3 + $0x40] sm:$0xf0]  ;;  %v1754_v2 = vor.u32 %v2015_v61, %v1753_v59  ;;  %v1761_v4 = vld [vmem:[%s2777_s3 + $0x18] sm:$0xf] }
  0x29   : > { %v490_v6 = vmul.f32 %v2142_v3, %v489_v5  ;;  %767 = vmatpush.bf16.msrb.mxu0 %v1802_v50  ;;  %780 = vmatpush.bf16.msrb.mxu1 %v1806_v55  ;;  %v2016_v5 = vld [vmem:[%s2777_s3 + $0x44] sm:$0xf0]  ;;  %v2029_v29 = vld [vmem:[%s2777_s3 + $0xac] sm:$0xf0]  ;;  %v2023_v30 = vld [vmem:[%s2777_s3 + $0x84] sm:$0xf] }
  0x2a   : > { %793 = vmatpush.bf16.msrb.mxu2 %v1810_v56  ;;  %v531_v25 = vstv %s1734_s14  ;;  %v1825_v31 = vld [vmem:[%s2777_s3 + $0x88] sm:$0xf]  ;;  %v2024_v34 = vld [vmem:[%s2777_s3 + $0x8c] sm:$0xf]  ;;  %v1827_v35 = vld [vmem:[%s2777_s3 + $0xb8] sm:$0xf0] }
  0x2b   : > { %v491_v7 = vadd.f32 %v2142_v3, %v490_v6  ;;  %v2010_v6 = vld [vmem:[%s2777_s3 + $0x1c] sm:$0xf]  ;;  %806 = vmatpush.bf16.msrb.mxu3 %v1814_v60  ;;  %v1769_v39 = vld [vmem:[%s2777_s3 + $0x20] sm:$0xf]  ;;  %v2017_v40 = vld [vmem:[%s2777_s3 + $0x4c] sm:$0xf0] }
  0x2c   : > { %v2011_v43 = vld [vmem:[%s2777_s3 + $0x24] sm:$0xf]  ;;  %v2012_v47 = vld [vmem:[%s2777_s3 + $0x2c] sm:$0xf]  ;;  %v1779_v48 = vld [vmem:[%s2777_s3 + $0x58] sm:$0xf0]  ;;  %v1770_v49 = vor.u32 %v2017_v40, %v1769_v39 }
  0x2d   : > { %v2403_v8 = vsel %vm492_vm1, %v2142_v3, %v491_v7  ;;  %v1758_v3 = vor.u32 %v2009_v62, %v1755_v63  ;;  %768 = vmatpush.bf16.msrb.mxu0 %v1754_v2  ;;  %v1782_v52 = vor.u32 %v2012_v47, %v1779_v48  ;;  %v558_v53 = vld [vmem:[%s2778_s4] sm:$0xff]  ;;  %vm902_vm9 = vcmask 64512   ;;  %s1976_s28 = sld [smem:[#allocation7 + $0x3]]  ;;  %s452_s12 = sand.u32 1, %s2248_s18  }
  0x2e   : > { %v563_v55 = vperm.slane %v558_v53, 1  ;;  %v564_v61 = vperm.slane %v558_v53, 2  ;;  %v565_v62 = vperm.slane %v558_v53, 3  ;;  %vm1469_vm1 = vcmask 257024   ;;  %s2004_s16 = sshll.u32 %s2256_s20, 3  ;;  %s1577_s20 = scalar_lea.sflag [#allocation8], %s452_s12 }
  0x2f   : > { %781 = vmatpush.bf16.msrb.mxu1 %v1758_v3 }
  0x99   : > { %v486_v9 = vpop.xlane.xlu0 %485 }
  0x9a   : > { %v494_v10 = vmul.f32 %v2403_v8, %v486_v9  ;;  %v1762_v9 = vor.u32 %v2016_v5, %v1761_v4 }
  0x9c   : > { %v2407_v11 = vsub.f32 %v2399_v0, %v494_v10  ;;  %v1763_v10 = vld [vmem:[%s2777_s3 + $0x48] sm:$0xf0]  ;;  %794 = vmatpush.bf16.msrb.mxu2 %v1762_v9  ;;  %v567_v9 = vperm.slane %v558_v53, 5 }
  0x9e   : > { %v496_v12 = vmul.f32 %v2407_v11, %v2407_v11 }
  0xa0   : > { %v497_v13 = vsel %vm483_vm0, %v496_v12, 0.0 }
  0xa1   : > { %498 = vadd.xlane.f32.xlu0 %v497_v13  ;;  %v1766_v13 = vor.u32 %v2010_v6, %v1763_v10 }
  0xa3   : > { %807 = vmatpush.bf16.msrb.mxu3 %v1766_v13 }
 0x114   : > { %v499_v14 = vpop.xlane.xlu0 %498 }
 0x115   : > { %v2412_v15 = vmul.f32 0.032258064, %v499_v14 }
 0x117   : > { %2143 = vrsqrt.f32 %v2412_v15  ;;  %vm510_vm2 = vcmp.eq.f32.partialorder %v2412_v15, inf  ;;  %vm512_vm3 = vcmp.eq.f32.partialorder %v2412_v15, 0.0  ;;  %v513_v45 = vand.u32 2147483648, %v2412_v15 }
 0x11d   : > { %v2144_v23 = vpop.eup %2143 }
 0x11e   : > { %v504_v28 = vmul.f32 %v2144_v23, %v2412_v15 }
 0x120   : > { %v505_v33 = vmul.f32 %v2144_v23, %v504_v28  ;;  %v1817_v28 = vld [vmem:[%s2777_s3 + $0x80] sm:$0xf] }
 0x121   : > { %v1818_v37 = vor.u32 %v2029_v29, %v1817_v28 }
 0x122   : > { %v506_v42 = vmul.f32 0.5, %v505_v33  ;;  %v2030_v33 = vld [vmem:[%s2777_s3 + $0xb4] sm:$0xf0] }
 0x123   : > { %v1826_v41 = vor.u32 %v2030_v33, %v1825_v31 }
 0x124   : > { %v507_v44 = vsub.f32 1.5, %v506_v42  ;;  %v1830_v42 = vor.u32 %v2024_v34, %v1827_v35 }
 0x126   : > { %v508_v46 = vmul.f32 %v2144_v23, %v507_v44  ;;  %v502_v23 = vmul.f32 %v501_v20, %v2407_v11  ;;  %v1819_v11 = vld [vmem:[%s2777_s3 + $0xb0] sm:$0xf0] }
 0x127   : > { %v1822_v38 = vor.u32 %v2023_v30, %v1819_v11  ;;  %v1771_v44 = vld [vmem:[%s2777_s3 + $0x50] sm:$0xf0] }
 0x128   : > { %v509_v54 = vmul.f32 %v508_v46, %v2412_v15  ;;  %v2018_v46 = vld [vmem:[%s2777_s3 + $0x54] sm:$0xf0]  ;;  %v1774_v50 = vor.u32 %v2011_v43, %v1771_v44 }
 0x12a   : > { %v511_v1 = vsel %vm510_vm2, %v2412_v15, %v509_v54  ;;  %v562_v54 = vperm.slane %v558_v53, 0  ;;  %vm1545_vm2 = vcmask 523264  }
 0x12b   : > { %v514_v7 = vsel %vm512_vm3, %v513_v45, %v511_v1  ;;  %v1777_v45 = vld [vmem:[%s2777_s3 + $0x28] sm:$0xf] }
 0x12c   : > { %v515_v12 = vadd.f32 1e-06, %v514_v7  ;;  %v1778_v51 = vor.u32 %v2018_v46, %v1777_v45  ;;  %v566_v7 = vperm.slane %v558_v53, 4 }
 0x12e   : > { %2145 = vrcp.f32 %v515_v12  ;;  %v527_v15 = vand.u32 2147483648, %v515_v12  ;;  %v525_v19 = vand.u32 2147483647, %v515_v12  ;;  %vm521_vm5 = vweird.f32 %v515_v12 }
 0x130   : > { %v528_v22 = vor.u32 1.1754944e-38, %v527_v15  ;;  %vm526_vm7 = vcmp.eq.f32.partialorder %v525_v19, 8.507059e+37  ;;  %v569_v19 = vperm.slane %v558_v53, 7 }
 0x134   : > { %v2146_v14 = vpop.eup %2145 }
 0x135   : > { %v517_v16 = vmul.f32 %v2146_v14, %v515_v12  ;;  %vm522_vm4 = vweird.f32 %v2146_v14 }
 0x136   : > { %vm523_vm6 = vmor %vm521_vm5, %vm522_vm4 }
 0x137   : > { %v518_v17 = vsub.f32 1.0, %v517_v16 }
 0x139   : > { %v519_v18 = vmul.f32 %v2146_v14, %v518_v17 }
 0x13b   : > { %v520_v21 = vadd.f32 %v2146_v14, %v519_v18  ;;  %v568_v18 = vperm.slane %v558_v53, 6 }
 0x13d   : > { %v524_v24 = vsel %vm523_vm6, %v2146_v14, %v520_v21 }
 0x13e   : > { %v529_v26 = vsel %vm526_vm7, %v528_v22, %v524_v24 }
 0x13f   : > { %v530_v27 = vmul.f32 %v529_v26, %v502_v23 }
 0x141   : > { %v532_v32 = vadd.f32 %v531_v25, %v530_v27  ;;  %v559_v27 = vld [vmem:[%s2778_s4 + $0x8] sm:$0xf] }
 0x142   : > { %v570_v30 = vperm.slane %v559_v27, 0  ;;  %v571_v11 = vperm.slane %v559_v27, 1  ;;  %v573_v43 = vperm.slane %v559_v27, 3 }
 0x143   : > { %v533_v36 = vpack.c.bf16 %v532_v32, %v532_v32 }
 0x145   : > { %1831 = vmatmul.msk.bf16.vlgmr.msra.gmra.mxu0 %vm483_vm0, %v533_v36  ;;  %1832 = vmatmul.msk.bf16.vlgmr.msra.gmra.mxu1 %vm483_vm0, %v533_v36 }
 0x146   : > { %1833 = vmatmul.msk.bf16.vlgmr.msra.gmra.mxu2 %vm483_vm0, %v533_v36  ;;  %1834 = vmatmul.msk.bf16.vlgmr.msra.gmra.mxu3 %vm483_vm0, %v533_v36 }
 0x147   : > { %819 = vmatpush.bf16.msra.mxu0 %v1818_v37  ;;  %832 = vmatpush.bf16.msra.mxu1 %v1822_v38 }
 0x148   : > { %845 = vmatpush.bf16.msra.mxu2 %v1826_v41  ;;  %858 = vmatpush.bf16.msra.mxu3 %v1830_v42  ;;  %v572_v42 = vperm.slane %v559_v27, 2 }
 0x14b   : > { %820 = vmatpush.bf16.msra.mxu0 %v1770_v49  ;;  %833 = vmatpush.bf16.msra.mxu1 %v1774_v50 }
 0x14c   : > { %846 = vmatpush.bf16.msra.mxu2 %v1778_v51  ;;  %859 = vmatpush.bf16.msra.mxu3 %v1782_v52 }
 0x155   : > { %1835 = vmatmul.msk.bf16.vlgmr.msrb.gmra.mxu0 %vm483_vm0, %v533_v36  ;;  %1836 = vmatmul.msk.bf16.vlgmr.msrb.gmra.mxu1 %vm483_vm0, %v533_v36 }
 0x156   : > { %1837 = vmatmul.msk.bf16.vlgmr.msrb.gmra.mxu2 %vm483_vm0, %v533_v36  ;;  %1838 = vmatmul.msk.bf16.vlgmr.msrb.gmra.mxu3 %vm483_vm0, %v533_v36 }
 0x165   : > { %1839 = vmatmul.msk.bf16.vlgmr.msra.gmra.mxu0 %vm483_vm0, %v533_v36  ;;  %1840 = vmatmul.msk.bf16.vlgmr.msra.gmra.mxu1 %vm483_vm0, %v533_v36 }
 0x166   : > { %1841 = vmatmul.msk.bf16.vlgmr.msra.gmra.mxu2 %vm483_vm0, %v533_v36  ;;  %1842 = vmatmul.msk.bf16.vlgmr.msra.gmra.mxu3 %vm483_vm0, %v533_v36 }
 0x1c2   : > { %v718_v56 = vpop.f32.mrf.mxu0  ;;  %v731_v57 = vpop.f32.mrf.mxu1 }
 0x1c3   : > { %v719_v58 = vadd.f32 %v718_v56, %v562_v54  ;;  %v732_v59 = vadd.f32 %v731_v57, %v563_v55 }
 0x1c5   : > { %v865_v60 = vpack.c.bf16 %v732_v59, %v719_v58 }
 0x1c7   : > { %871 = vst [vmem:[#allocation2] sm:$0xff] %v865_v60 }
 0x1c9   : > { %v744_v63 = vpop.f32.mrf.mxu2  ;;  %v757_v1 = vpop.f32.mrf.mxu3 }
 0x1ca   : > { %v745_v2 = vadd.f32 %v744_v63, %v564_v61  ;;  %v758_v3 = vadd.f32 %v757_v1, %v565_v62  ;;  %v720_v4 = vpop.f32.mrf.mxu0  ;;  %v733_v5 = vpop.f32.mrf.mxu1 }
 0x1cc   : > { %v866_v6 = vpack.c.bf16 %v758_v3, %v745_v2  ;;  %v2137_v2 = vld [vmem:[%s2794_s0] ss:$0 sm:$0xff]  ;;  %s1732_s0 = sshll.u32 %s452_s12, 3 }
 0x1cd   : > { %s454_s15 = scalar_lea.vmem [#allocation10], %s1732_s0  ;;  %s2202_s0 = scalar_lea.hbm %s2785_s11, 16 }
 0x1ce   : > { %872 = vst [vmem:[#allocation2 + $0x8] sm:$0xff] %v866_v6  ;;  %v881_v40 = vld [vmem:[#allocation2] sm:$0xf]  ;;  %v940_v41 = vld [vmem:[#allocation2 + $0x4] sm:$0xf]  ;;  %s1589_s23 = sshll.u32 %s454_s15, 4  ;;  %s1590_s23 = int_to_ptr.vmem [resolvable:$true] %s1589_s23 }
 0x1d1   : > { %v746_v10 = vpop.f32.mrf.mxu2  ;;  %v759_v12 = vpop.f32.mrf.mxu3 }
 0x1d2   : > { %v770_v13 = vpop.f32.mrf.mxu0  ;;  %v783_v14 = vpop.f32.mrf.mxu1 }
 0x1d3   : > { %v771_v16 = vadd.f32 %v770_v13, %v566_v7  ;;  %v784_v17 = vadd.f32 %v783_v14, %v567_v9 }
 0x1d5   : > { %v867_v15 = vpack.c.bf16 %v784_v17, %v771_v16  ;;  %v991_v59 = vld [vmem:[#allocation2 + $0x8] sm:$0xf]  ;;  %v1042_v62 = vld [vmem:[#allocation2 + $0xc] sm:$0xf] }
 0x1d7   : > { %873 = vst [vmem:[#allocation2 + $0x10] sm:$0xff] %v867_v15 }
 0x1d9   : > { %v796_v20 = vpop.f32.mrf.mxu2  ;;  %v809_v21 = vpop.f32.mrf.mxu3 }
 0x1da   : > { %v797_v22 = vadd.f32 %v796_v20, %v568_v18  ;;  %v810_v23 = vadd.f32 %v809_v21, %v569_v19  ;;  %v772_v24 = vpop.f32.mrf.mxu0  ;;  %v785_v25 = vpop.f32.mrf.mxu1 }
 0x1dc   : > { %v868_v26 = vpack.c.bf16 %v810_v23, %v797_v22 }
 0x1de   : > { %874 = vst [vmem:[#allocation2 + $0x18] sm:$0xff] %v868_v26  ;;  %v882_v28 = vld [vmem:[#allocation2 + $0x10] sm:$0xf]  ;;  %v941_v29 = vld [vmem:[#allocation2 + $0x14] sm:$0xf] }
 0x1df   : > { %891 = vmatpush.bf16.xpose.msrb.mxu0 %v882_v28  ;;  %950 = vmatpush.bf16.xpose.msrb.mxu2 %v941_v29 }
 0x1e1   : > { %v798_v31 = vpop.f32.mrf.mxu2  ;;  %v811_v32 = vpop.f32.mrf.mxu3 }
 0x1e2   : > { %v822_v33 = vpop.f32.mrf.mxu0  ;;  %v835_v34 = vpop.f32.mrf.mxu1 }
 0x1e3   : > { %v823_v35 = vadd.f32 %v822_v33, %v570_v30  ;;  %v836_v36 = vadd.f32 %v835_v34, %v571_v11 }
 0x1e5   : > { %v869_v37 = vpack.c.bf16 %v836_v36, %v823_v35  ;;  %v992_v38 = vld [vmem:[#allocation2 + $0x18] sm:$0xf]  ;;  %v1043_v39 = vld [vmem:[#allocation2 + $0x1c] sm:$0xf] }
 0x1e6   : > { %892 = vmatmul.bf16.vlgmr.msrb.gmra.mxu0 %v881_v40  ;;  %951 = vmatmul.bf16.vlgmr.msrb.gmra.mxu2 %v940_v41 }
 0x1e7   : > { %1001 = vmatpush.bf16.xpose.msra.mxu0 %v992_v38  ;;  %1052 = vmatpush.bf16.xpose.msra.mxu2 %v1043_v39  ;;  %875 = vst [vmem:[#allocation2 + $0x20] sm:$0xff] %v869_v37 }
 0x1e9   : > { %v848_v44 = vpop.f32.mrf.mxu2  ;;  %v861_v45 = vpop.f32.mrf.mxu3 }
 0x1ea   : > { %v849_v46 = vadd.f32 %v848_v44, %v572_v42  ;;  %v862_v47 = vadd.f32 %v861_v45, %v573_v43  ;;  %v824_v48 = vpop.f32.mrf.mxu0  ;;  %v837_v49 = vpop.f32.mrf.mxu1  ;;  %v2038_v43 = vld [vmem:[%s2779_s5 + $0x38] sm:$0xff]  ;;  %v2037_v45 = vld [vmem:[%s2779_s5 + $0x30] sm:$0xff] }
 0x1eb   : > { %v2036_v49 = vld [vmem:[%s2779_s5 + $0x28] sm:$0xff] }
 0x1ec   : > { %v870_v50 = vpack.c.bf16 %v862_v47, %v849_v46 }
 0x1ee   : > { %876 = vst [vmem:[#allocation2 + $0x28] sm:$0xff] %v870_v50  ;;  %v883_v51 = vld [vmem:[#allocation2 + $0x20] sm:$0xf]  ;;  %v942_v52 = vld [vmem:[#allocation2 + $0x24] sm:$0xf] }
 0x1ef   : > { %v920_v53 = vsel %vm918_vm8, %v883_v51, 0  ;;  %v974_v54 = vsel %vm918_vm8, %v942_v52, 0  ;;  %1369 = vmatpush.bf16.msrb.mxu0 %v2038_v43  ;;  %v2035_v51 = vld [vmem:[%s2779_s5 + $0x20] sm:$0xff] }
 0x1f0   : > { %929 = vmatpush.bf16.msrb.mxu1 %v920_v53  ;;  %983 = vmatpush.bf16.msrb.mxu3 %v974_v54  ;;  %v2046_v54 = vld [vmem:[%s2779_s5 + $0x78] sm:$0xff] }
 0x1f1   : > { %v850_v55 = vpop.f32.mrf.mxu2  ;;  %v863_v56 = vpop.f32.mrf.mxu3 }
 0x1f2   : > { %v2045_v56 = vld [vmem:[%s2779_s5 + $0x70] sm:$0xff] }
 0x1f3   : > { %1370 = vmatpush.bf16.msrb.mxu0 %v2037_v45 }
 0x1f5   : > { %v993_v57 = vld [vmem:[#allocation2 + $0x28] sm:$0xf]  ;;  %v1044_v58 = vld [vmem:[#allocation2 + $0x2c] sm:$0xf] }
 0x1f6   : > { %v1025_v60 = vsel %vm918_vm8, %v993_v57, 0  ;;  %v1076_v61 = vsel %vm918_vm8, %v1044_v58, 0  ;;  %1002 = vmatmul.bf16.vlgmr.msra.gmra.mxu0 %v991_v59  ;;  %1053 = vmatmul.bf16.vlgmr.msra.gmra.mxu2 %v1042_v62  ;;  %v2043_v62 = vld [vmem:[%s2779_s5 + $0x60] sm:$0xff] }
 0x1f7   : > { %1034 = vmatpush.bf16.msra.mxu1 %v1025_v60  ;;  %1085 = vmatpush.bf16.msra.mxu3 %v1076_v61  ;;  %v2044_v60 = vld [vmem:[%s2779_s5 + $0x68] sm:$0xff] }
 0x1f8   : > { %1371 = vmatpush.bf16.msrb.mxu0 %v2036_v49 }
 0x1fc   : > { %1372 = vmatpush.bf16.msrb.mxu0 %v2035_v51 }
 0x263   : > { %v893_v63 = vpop.f32.mrf.mxu0 }
 0x264   : > { %v897_v6 = vmul.f32 0.35355338, %v893_v63 }
 0x266   : > { %v901_v10 = vadd.f32 %v2137_v2, %v897_v6  ;;  %v2062_v6 = vld [vmem:[%s2779_s5 + $0xf8] sm:$0xff] }
 0x268   : > { %v903_v13 = vsel %vm902_vm9, %v901_v10, -inf }
 0x269   : > { %v952_v1 = vpop.f32.mrf.mxu2 }
 0x26a   : > { %v956_v3 = vmul.f32 0.35355338, %v952_v1 }
 0x26b   : > { %v895_v4 = vpop.f32.mrf.mxu0 }
 0x26c   : > { %v957_v5 = vadd.f32 %v2137_v2, %v956_v3  ;;  %v2034_v3 = vld [vmem:[%s2779_s5 + $0x18] sm:$0xff] }
 0x26d   : > { %v2042_v4 = vld [vmem:[%s2779_s5 + $0x58] sm:$0xff]  ;;  %1373 = vmatpush.bf16.msrb.mxu0 %v2034_v3 }
 0x26e   : > { %v958_v7 = vsel %vm902_vm9, %v957_v5, -inf }
 0x26f   : > { %959 = vmax.xlane.f32.xlu1 %v958_v7  ;;  %v2033_v7 = vld [vmem:[%s2779_s5 + $0x10] sm:$0xff] }
 0x271   : > { %v954_v9 = vpop.f32.mrf.mxu2  ;;  %1374 = vmatpush.bf16.msrb.mxu0 %v2033_v7 }
 0x272   : > { %v2041_v9 = vld [vmem:[%s2779_s5 + $0x50] sm:$0xff] }
 0x273   : > { %v1003_v12 = vpop.f32.mrf.mxu0 }
 0x274   : > { %v1007_v18 = vmul.f32 0.35355338, %v1003_v12  ;;  %v2061_v12 = vld [vmem:[%s2779_s5 + $0xf0] sm:$0xff] }
 0x276   : > { %v1008_v21 = vadd.f32 %v2137_v2, %v1007_v18  ;;  %v2039_v18 = vld [vmem:[%s2779_s5 + $0x40] sm:$0xff] }
 0x277   : > { %904 = vmax.xlane.f32.xlu1 %v903_v13  ;;  %v2032_v13 = vld [vmem:[%s2779_s5 + $0x8] sm:$0xff] }
 0x278   : > { %v1009_v22 = vsel %vm902_vm9, %v1008_v21, -inf  ;;  %1375 = vmatpush.bf16.msrb.mxu0 %v2032_v13 }
 0x279   : > { %v1054_v14 = vpop.f32.mrf.mxu2 }
 0x27a   : > { %v1058_v16 = vmul.f32 0.35355338, %v1054_v14  ;;  %v2040_v14 = vld [vmem:[%s2779_s5 + $0x48] sm:$0xff] }
 0x27b   : > { %v1005_v17 = vpop.f32.mrf.mxu0 }
 0x27c   : > { %v1059_v15 = vadd.f32 %v2137_v2, %v1058_v16  ;;  %v2052_v16 = vld [vmem:[%s2779_s5 + $0xa8] sm:$0xff] }
 0x27d   : > { %v2060_v17 = vld [vmem:[%s2779_s5 + $0xe8] sm:$0xff] }
 0x27e   : > { %v1060_v19 = vsel %vm902_vm9, %v1059_v15, -inf }
 0x27f   : > { %1061 = vmax.xlane.f32.xlu2 %v1060_v19  ;;  %v2051_v19 = vld [vmem:[%s2779_s5 + $0xa0] sm:$0xff] }
 0x281   : > { %v1056_v20 = vpop.f32.mrf.mxu2 }
 0x282   : > { %v2059_v20 = vld [vmem:[%s2779_s5 + $0xe0] sm:$0xff] }
 0x287   : > { %1010 = vmax.xlane.f32.xlu2 %v1009_v22  ;;  %v2058_v22 = vld [vmem:[%s2779_s5 + $0xd8] sm:$0xff] }
 0x2e2   : > { %v960_v23 = vpop.xlane.xlu1 %959 }
 0x2e3   : > { %v961_v24 = vsub.f32 %v957_v5, %v960_v23  ;;  %v2054_v5 = vld [vmem:[%s2779_s5 + $0xb8] sm:$0xff]  ;;  %v2049_v23 = vld [vmem:[%s2779_s5 + $0x90] sm:$0xff] }
 0x2e4   : > { %1395 = vmatpush.bf16.msrb.mxu2 %v2054_v5 }
 0x2e5   : > { %v962_v25 = vmul.f32 1.442695, %v961_v24  ;;  %v2057_v24 = vld [vmem:[%s2779_s5 + $0xd0] sm:$0xff] }
 0x2e7   : > { %2147 = vpow2.f32 %v962_v25  ;;  %v2048_v25 = vld [vmem:[%s2779_s5 + $0x88] sm:$0xff] }
 0x2ea   : > { %v905_v26 = vpop.xlane.xlu1 %904 }
 0x2eb   : > { %v906_v27 = vsub.f32 %v901_v10, %v905_v26  ;;  %v2053_v10 = vld [vmem:[%s2779_s5 + $0xb0] sm:$0xff]  ;;  %v2056_v26 = vld [vmem:[%s2779_s5 + $0xc8] sm:$0xff] }
 0x2ec   : > { %1396 = vmatpush.bf16.msrb.mxu2 %v2053_v10 }
 0x2ed   : > { %v2148_v28 = vpop.eup %2147  ;;  %v907_v29 = vmul.f32 1.442695, %v906_v27  ;;  %v2047_v27 = vld [vmem:[%s2779_s5 + $0x80] sm:$0xff] }
 0x2ee   : > { %v964_v30 = vsel %vm902_vm9, %v2148_v28, 0.0 }
 0x2ef   : > { %2149 = vpow2.f32 %v907_v29  ;;  %965 = vadd.xlane.f32.xlu0 %v964_v30 }
 0x2f0   : > { %1397 = vmatpush.bf16.msrb.mxu2 %v2052_v16 }
 0x2f2   : > { %v1062_v11 = vpop.xlane.xlu2 %1061 }
 0x2f3   : > { %v1063_v31 = vsub.f32 %v1059_v15, %v1062_v11  ;;  %v2031_v15 = vld [vmem:[%s2779_s5] sm:$0xff] }
 0x2f4   : > { %1376 = vmatpush.bf16.msrb.mxu0 %v2031_v15  ;;  %1398 = vmatpush.bf16.msrb.mxu2 %v2051_v19 }
 0x2f5   : > { %v2150_v32 = vpop.eup %2149  ;;  %v1064_v33 = vmul.f32 1.442695, %v1063_v31 }
 0x2f6   : > { %v909_v34 = vsel %vm902_vm9, %v2150_v32, 0.0 }
 0x2f7   : > { %910 = vadd.xlane.f32.xlu1 %v909_v34  ;;  %2151 = vpow2.f32 %v1064_v33 }
 0x2fa   : > { %v1011_v35 = vpop.xlane.xlu2 %1010 }
 0x2fb   : > { %v1012_v36 = vsub.f32 %v1008_v21, %v1011_v35  ;;  %v2050_v21 = vld [vmem:[%s2779_s5 + $0x98] sm:$0xff] }
 0x2fc   : > { %1399 = vmatpush.bf16.msrb.mxu2 %v2050_v21 }
 0x2fd   : > { %v2152_v37 = vpop.eup %2151  ;;  %v1013_v38 = vmul.f32 1.442695, %v1012_v36 }
 0x2fe   : > { %v1066_v39 = vsel %vm902_vm9, %v2152_v37, 0.0 }
 0x2ff   : > { %2153 = vpow2.f32 %v1013_v38  ;;  %1067 = vadd.xlane.f32.xlu2 %v1066_v39 }
 0x300   : > { %1400 = vmatpush.bf16.msrb.mxu2 %v2049_v23  ;;  %v2067_v23 = vld [vmem:[%s2783_s9 + $0x10] sm:$0xff] }
 0x304   : > { %1401 = vmatpush.bf16.msrb.mxu2 %v2048_v25 }
 0x305   : > { %v2154_v40 = vpop.eup %2153 }
 0x306   : > { %v1015_v41 = vsel %vm902_vm9, %v2154_v40, 0.0 }
 0x307   : > { %1016 = vadd.xlane.f32.xlu0 %v1015_v41 }
 0x308   : > { %1402 = vmatpush.bf16.msrb.mxu2 %v2047_v27 }
 0x362   : > { %v966_v42 = vpop.xlane.xlu0 %965 }
 0x363   : > { %2155 = vrcp.f32 %v966_v42 }
 0x369   : > { %v2156_v44 = vpop.eup %2155 }
 0x36a   : > { %v968_v46 = vmul.f32 %v2156_v44, %v2148_v28  ;;  %v911_v47 = vpop.xlane.xlu1 %910  ;;  %v2055_v28 = vld [vmem:[%s2779_s5 + $0xc0] sm:$0xff] }
 0x36b   : > { %2157 = vrcp.f32 %v911_v47 }
 0x36c   : > { %v969_v48 = vpack.c.bf16 %v968_v46, %v968_v46 }
 0x36e   : > { %1844 = vmatmul.msk.bf16.vlgmr.msrb.gmra.mxu3 %vm902_vm9, %v969_v48 }
 0x36f   : > { %1408 = vmatpush.bf16.msrb.mxu3 %v2062_v6 }
 0x371   : > { %v2158_v50 = vpop.eup %2157 }
 0x372   : > { %v913_v52 = vmul.f32 %v2158_v50, %v2150_v32  ;;  %v1068_v53 = vpop.xlane.xlu2 %1067 }
 0x373   : > { %2159 = vrcp.f32 %v1068_v53  ;;  %1409 = vmatpush.bf16.msrb.mxu3 %v2061_v12  ;;  %v2064_v12 = vld [vmem:[%s2781_s7 + $0x8] sm:$0xff] }
 0x374   : > { %v914_v55 = vpack.c.bf16 %v913_v52, %v913_v52  ;;  %1503 = vmatpush.bf16.msra.mxu0 %v2064_v12 }
 0x376   : > { %1843 = vmatmul.msk.bf16.vlgmr.msrb.gmra.mxu1 %vm902_vm9, %v914_v55 }
 0x377   : > { %1382 = vmatpush.bf16.msrb.mxu1 %v2046_v54  ;;  %1410 = vmatpush.bf16.msrb.mxu3 %v2060_v17  ;;  %v2138_v54 = vld [vmem:[%s2780_s6] ss:$0 sm:$0xff] }
 0x379   : > { %v2160_v57 = vpop.eup %2159 }
 0x37a   : > { %v1070_v58 = vmul.f32 %v2160_v57, %v2152_v37  ;;  %v1017_v59 = vpop.xlane.xlu0 %1016 }
 0x37b   : > { %1383 = vmatpush.bf16.msrb.mxu1 %v2045_v56  ;;  %2161 = vrcp.f32 %v1017_v59  ;;  %1411 = vmatpush.bf16.msrb.mxu3 %v2059_v20 }
 0x37c   : > { %v1071_v61 = vpack.c.bf16 %v1070_v58, %v1070_v58 }
 0x37e   : > { %1846 = vmatmul.msk.bf16.vlgmr.msra.gmra.mxu3 %vm902_vm9, %v1071_v61 }
 0x37f   : > { %1384 = vmatpush.bf16.msrb.mxu1 %v2044_v60  ;;  %1412 = vmatpush.bf16.msrb.mxu3 %v2058_v22  ;;  %v2068_v22 = vld [vmem:[%s2783_s9 + $0x18] sm:$0xff] }
 0x381   : > { %v2162_v63 = vpop.eup %2161 }
 0x382   : > { %v1019_v1 = vmul.f32 %v2162_v63, %v2154_v40 }
 0x383   : > { %1385 = vmatpush.bf16.msrb.mxu1 %v2043_v62  ;;  %1413 = vmatpush.bf16.msrb.mxu3 %v2057_v24 }
 0x384   : > { %v1020_v2 = vpack.c.bf16 %v1019_v1, %v1019_v1 }
 0x386   : > { %1845 = vmatmul.msk.bf16.vlgmr.msra.gmra.mxu1 %vm902_vm9, %v1020_v2 }
 0x387   : > { %1386 = vmatpush.bf16.msrb.mxu1 %v2042_v4  ;;  %1414 = vmatpush.bf16.msrb.mxu3 %v2056_v26 }
 0x38b   : > { %1387 = vmatpush.bf16.msrb.mxu1 %v2041_v9  ;;  %1415 = vmatpush.bf16.msrb.mxu3 %v2055_v28 }
 0x38f   : > { %1388 = vmatpush.bf16.msrb.mxu1 %v2040_v14 }
 0x393   : > { %1389 = vmatpush.bf16.msrb.mxu1 %v2039_v18 }
 0x397   : > { %1553 = vmatpush.bf16.msra.mxu1 %v2068_v22 }
 0x39b   : > { %1554 = vmatpush.bf16.msra.mxu1 %v2067_v23 }
 0x3f1   : > { %v985_v29 = vpop.f32.mrf.mxu3 }
 0x3f2   : > { %v989_v30 = vpack.c.bf16 %v985_v29, %v985_v29 }
 0x3f3   : > { %v931_v11 = vpop.f32.mrf.mxu1 }
 0x3f4   : > { %990 = vst [vmem:[#allocation3 + $0x4] sm:$0xf] %v989_v30  ;;  %v935_v31 = vpack.c.bf16 %v931_v11, %v931_v11  ;;  %v1436_v30 = vstv %s1975_s25 }
 0x3f6   : > { %939 = vst [vmem:[#allocation3] sm:$0xf] %v935_v31 }
 0x3f9   : > { %v987_v32 = vpop.f32.mrf.mxu3 }
 0x3fb   : > { %v933_v33 = vpop.f32.mrf.mxu1 }
 0x3fd   : > { %v1093_v34 = vld [vmem:[#allocation3] sm:$0xff] }
 0x3fe   : > { %v1165_v35 = vunpack.c.l.b16 %v1093_v34  ;;  %v1166_v36 = vunpack.c.h.b16 %v1093_v34 }
 0x400   : > { %v1169_v37 = vpack.c.b16 %v1165_v35, %v1165_v35  ;;  %v1170_v38 = vpack.c.b16 %v1166_v36, %v1166_v36  ;;  %v1466_v35 = vstv %s1976_s28  ;;  %s1587_s28 = scalar_lea.hbm %s2785_s11, %s2004_s16 }
 0x401   : > { %v1087_v39 = vpop.f32.mrf.mxu3  ;;  %s1591_s24 = sshll.u32 %s1587_s28, 4  ;;  %s1592_s24 = int_to_ptr.hbm [resolvable:$true] %s1591_s24 }
 0x402   : > { %1377 = vmatmul.bf16.vlgmr.msrb.gmra.mxu0 %v1169_v37  ;;  %1390 = vmatmul.bf16.vlgmr.msrb.gmra.mxu1 %v1170_v38  ;;  %v1091_v40 = vpack.c.bf16 %v1087_v39, %v1087_v39  ;;  %s2196_s26 = sshra.s32 %s1592_s24, 4  ;;  %s2197_s26 = int_to_ptr.hbm [resolvable:$true] %s2196_s26 }
 0x403   : > { %v1036_v41 = vpop.f32.mrf.mxu1  ;;  %s2198_s16 = scalar_lea.hbm %s2197_s26, 8  ;;  %p2203_p5 = scmp.lt.s32.totalorder %s2197_s26, %s2785_s11 }
 0x404   : > { %1092 = vst [vmem:[#allocation3 + $0xc] sm:$0xf] %v1091_v40  ;;  %v1040_v42 = vpack.c.bf16 %v1036_v41, %v1036_v41  ;;  %v2066_v40 = vld [vmem:[%s2783_s9 + $0x8] sm:$0xff]  ;;  %v2065_v41 = vld [vmem:[%s2783_s9] sm:$0xff]  ;;  %p2199_p1 = scmp.ne.s32.totalorder %s2197_s26, %s2198_s16  ;;  %p2204_p6 = scmp.lt.s32.totalorder %s2202_s0, %s2198_s16 }
 0x405   : > { %1555 = vmatpush.bf16.msra.mxu1 %v2066_v40 }
 0x406   : > { %1041 = vst [vmem:[#allocation3 + $0x8] sm:$0xf] %v1040_v42  ;;  %v2268_v42 = vmov 0.0   ;;  %p2200_p2 = pnand %p2199_p1, %p2369_p4  ;;  %p2205_p7 = por %p2204_p6, %p2203_p5 }
 0x407   : > { %1471 = vst.msk [vmem:[#allocation6] sm:$0xff] %vm483_vm0, %v2268_v42 }
 0x408   : > { %p2201_p3 = pneg %p2200_p2 }
 0x409   : > { %v1089_v43 = vpop.f32.mrf.mxu3  ;;  %1556 = vmatpush.bf16.msra.mxu1 %v2065_v41 }
 0x40a   : > { %v2139_v43 = vld [vmem:[%s2782_s8] ss:$0 sm:$0xff]  ;;  %p2206_p9 = pnand %p2205_p7, %p2201_p3 }
 0x40b   : > { %v1038_v44 = vpop.f32.mrf.mxu1 }
 0x40d   : > { %v1094_v45 = vld [vmem:[#allocation3 + $0x8] sm:$0xff] }
 0x40e   : > { %v1167_v46 = vunpack.c.l.b16 %v1094_v45  ;;  %v1168_v47 = vunpack.c.h.b16 %v1094_v45 }
 0x410   : > { %v1171_v48 = vpack.c.b16 %v1167_v46, %v1167_v46  ;;  %v1172_v49 = vpack.c.b16 %v1168_v47, %v1168_v47 }
 0x412   : > { %1403 = vmatmul.bf16.vlgmr.msrb.gmra.mxu2 %v1171_v48  ;;  %1416 = vmatmul.bf16.vlgmr.msrb.gmra.mxu3 %v1172_v49  ;;  %v1511_v49 = vld [vmem:[#allocation6] sm:$0xff] }
 0x47f   : > { %v1378_v50 = vpop.f32.mrf.mxu0  ;;  %v1391_v51 = vpop.f32.mrf.mxu1 }
 0x480   : > { %v1379_v55 = vadd.f32 %v2138_v54, %v1378_v50 }
 0x482   : > { %v1392_v56 = vadd.f32 %v1391_v51, %v1379_v55 }
 0x487   : > { %v1380_v52 = vpop.f32.mrf.mxu0  ;;  %v1393_v53 = vpop.f32.mrf.mxu1 }
 0x488   : > { %v2140_v53 = vld [vmem:[%s2784_s10] ss:$0 sm:$0xff] }
 0x495   : > { %v1404_v57 = vpop.f32.mrf.mxu2  ;;  %v1417_v58 = vpop.f32.mrf.mxu3 }
 0x496   : > { %v1405_v59 = vadd.f32 %v1404_v57, %v1392_v56 }
 0x498   : > { %v1418_v60 = vadd.f32 %v1417_v58, %v1405_v59 }
 0x49a   : > { %v1422_v61 = vadd.f32 %v1418_v60, %v2399_v0 }
 0x49c   : > { %1423 = vst.msk [vmem:[#allocation4] sm:$0xff] %vm483_vm0, %v1422_v61  ;;  %v1426_v62 = vsel %vm483_vm0, %v1422_v61, 0.0 }
 0x49d   : > { %v1406_v63 = vpop.f32.mrf.mxu2  ;;  %v1419_v1 = vpop.f32.mrf.mxu3  ;;  %1427 = vadd.xlane.f32.xlu1 %v1426_v62 }
 0x4a3   : > { %v1567_v54 = vld [vmem:[#allocation4] sm:$0xff] }
 0x510   : > { %v1428_v2 = vpop.xlane.xlu1 %1427 }
 0x511   : > { %v1429_v3 = vmul.f32 %v1428_v2, %v2403_v8  ;;  %v2063_v8 = vld [vmem:[%s2781_s7] sm:$0xff] }
 0x512   : > { %1504 = vmatpush.bf16.msra.mxu0 %v2063_v8 }
 0x513   : > { %v1430_v4 = vsub.f32 %v1422_v61, %v1429_v3 }
 0x515   : > { %v1431_v5 = vmul.f32 %v1430_v4, %v1430_v4  ;;  %v1437_v32 = vmul.f32 %v1436_v30, %v1430_v4 }
 0x517   : > { %v1432_v6 = vsel %vm483_vm0, %v1431_v5, 0.0 }
 0x518   : > { %1433 = vadd.xlane.f32.xlu2 %v1432_v6 }
 0x58b   : > { %v1434_v7 = vpop.xlane.xlu2 %1433 }
 0x58c   : > { %v1435_v9 = vmul.f32 0.032258064, %v1434_v7 }
 0x58e   : > { %2163 = vrsqrt.f32 %v1435_v9  ;;  %vm1445_vm10 = vcmp.eq.f32.partialorder %v1435_v9, inf  ;;  %v1448_v18 = vand.u32 2147483648, %v1435_v9  ;;  %vm1447_vm11 = vcmp.eq.f32.partialorder %v1435_v9, 0.0 }
 0x594   : > { %v2164_v10 = vpop.eup %2163 }
 0x595   : > { %v1439_v0 = vmul.f32 %v2164_v10, %v1435_v9 }
 0x597   : > { %v1440_v13 = vmul.f32 %v2164_v10, %v1439_v0 }
 0x599   : > { %v1441_v14 = vmul.f32 0.5, %v1440_v13 }
 0x59b   : > { %v1442_v16 = vsub.f32 1.5, %v1441_v14 }
 0x59d   : > { %v1443_v17 = vmul.f32 %v2164_v10, %v1442_v16 }
 0x59f   : > { %v1444_v15 = vmul.f32 %v1443_v17, %v1435_v9 }
 0x5a1   : > { %v1446_v19 = vsel %vm1445_vm10, %v1435_v9, %v1444_v15 }
 0x5a2   : > { %v1449_v20 = vsel %vm1447_vm11, %v1448_v18, %v1446_v19 }
 0x5a3   : > { %v1450_v21 = vadd.f32 1e-06, %v1449_v20 }
 0x5a5   : > { %2165 = vrcp.f32 %v1450_v21  ;;  %v1462_v27 = vand.u32 2147483648, %v1450_v21  ;;  %v1460_v29 = vand.u32 2147483647, %v1450_v21  ;;  %vm1456_vm13 = vweird.f32 %v1450_v21 }
 0x5a7   : > { %v1463_v31 = vor.u32 1.1754944e-38, %v1462_v27  ;;  %vm1461_vm15 = vcmp.eq.f32.partialorder %v1460_v29, 8.507059e+37 }
 0x5ab   : > { %v2166_v24 = vpop.eup %2165 }
 0x5ac   : > { %v1452_v25 = vmul.f32 %v2166_v24, %v1450_v21  ;;  %vm1457_vm12 = vweird.f32 %v2166_v24 }
 0x5ad   : > { %vm1458_vm14 = vmor %vm1456_vm13, %vm1457_vm12 }
 0x5ae   : > { %v1453_v26 = vsub.f32 1.0, %v1452_v25 }
 0x5b0   : > { %v1454_v28 = vmul.f32 %v2166_v24, %v1453_v26 }
 0x5b2   : > { %v1455_v11 = vadd.f32 %v2166_v24, %v1454_v28 }
 0x5b4   : > { %v1459_v33 = vsel %vm1458_vm14, %v2166_v24, %v1455_v11 }
 0x5b5   : > { %v1464_v34 = vsel %vm1461_vm15, %v1463_v31, %v1459_v33 }
 0x5b6   : > { %v1465_v36 = vmul.f32 %v1464_v34, %v1437_v32 }
 0x5b8   : > { %v1467_v37 = vadd.f32 %v1466_v35, %v1465_v36 }
 0x5ba   : > { %v1468_v38 = vpack.c.bf16 %v1467_v37, %v1467_v37 }
 0x5bc   : > { %1470 = vst.msk [vmem:[#allocation5] sm:$0xf] %vm1469_vm1, %v1468_v38 }
 0x5c3   : > { %v1472_v39 = vld [vmem:[#allocation5] sm:$0xf] }
 0x5c4   : > { %1985 = vmatmul.msk.bf16.vlgmr.msra.gmra.mxu0 %vm483_vm0, %v1472_v39 }
 0x641   : > { %v1506_v44 = vpop.f32.mrf.mxu0 }
 0x642   : > { %v1507_v45 = vadd.f32 %v2139_v43, %v1506_v44 }
 0x644   : > { %v1510_v46 = vmax.f32 %v1507_v45, 0.0 }
 0x646   : > { %v1512_v47 = vpack.c.bf16 %v1510_v46, %v1510_v46 }
 0x648   : > { %2002 = vmatmul.msk.bf16.vlgmr.msra.gmra.mxu1 %vm1545_vm2, %v1512_v47 }
 0x649   : > { %v1508_v48 = vpop.f32.mrf.mxu0 }
 0x6c5   : > { %v1558_v50 = vpop.f32.mrf.mxu1 }
 0x6c6   : > { %v1562_v51 = vadd.f32 %v1558_v50, %v1511_v49 }
 0x6c8   : > { %1563 = vst.msk [vmem:[#allocation6] sm:$0xff] %vm483_vm0, %v1562_v51 }
 0x6cd   : > { %v1560_v52 = vpop.f32.mrf.mxu1 }
 0x6cf   : > { %v1568_v55 = vld [vmem:[#allocation6] sm:$0xff] }
 0x6d0   : > { %v1569_v56 = vadd.f32 %v1568_v55, %v1567_v54 }
 0x6d2   : > { %v1574_v57 = vadd.f32 %v2140_v53, %v1569_v56 }
 0x6d4   : > { %1575 = vst.msk [vmem:[%s454_s15] sm:$0xff] %vm483_vm0, %v1574_v57 }
 0x6d5   : > { %2209 = shalt.err (!%p2206_p9)
}
 0x6d6   : > { %2073 = dma.vmem_to_hbm [thread:$0]  (%p2369_p4), %s1590_s23, 128, %s1592_s24, %s1577_s20  }
 0x6d7 PF: > { %p2085_p10 = scmp.ge.s32.totalorder %s2264_s22, 2  ;;  %s1603_s12 = sand.u32 1, %s2244_s17  }
 0x6d8   : > { %s1604_s14 = scalar_lea.sflag [#allocation8], %s1603_s12 }
 0x6d9   : > { %p2080_p11 = pnand %p2085_p10, %p2376_p8 }
 0x6db   : > { %p2081_p12 = pneg %p2080_p11 }
 0x6dd   : > { %2239 = dma.done.wait (%p2081_p12), %s1604_s14, 128  }
 0x6de   : > { %2241 = vsyncadd (%p2081_p12), %s1604_s14, 4294967168  ;;  %s25_s22 = sadd.s32 1, %s2264_s22   ;;  %s2795_s27 = sld [smem:[#allocation13_spill]] }
 0x6df   : > { %p22_p13 = scmp.ge.s32.totalorder %s25_s22, 4   ;;  %s2796_s17 = smov %s2248_s18 }
 0x6e0   : > { %s2797_s18 = smov %s2252_s19  ;;  %s2798_s19 = smov %s2382_s30 }
 0x6e1   : > { %s2799_s20 = smov %s2260_s21  ;;  %24 = sbr.rel (!%p22_p13) target bundleno = 8 (0x8), region = 126 }
 0x6e4   : > { %s2800_s21 = smov %s2795_s27 }
 0x6e6   :  { %1610 = vsyncpa [#allocation8], 1 }
 0x6e7   :  { %1612 = vsyncpa [#allocation8 + $0x1], 1 }
 0x6e8   :  { %1613 = vsyncpa [#allocation9], 1 }
 0x6e9   :  { %1615 = vsyncpa [#allocation9 + $0x1], 1 }

// kernel: tpu_custom_call.1
= control target key start
LH: loop header
LB: loop body
LE: loop exit
PB: predicated region body
PF: predicated region fallthrough
CT: control target
= control target key end

     0   :  { %s2774_s0 = inlined_call_operand.vmem [shape: f32[4], index: 0, kind: input, shape index: {}]   ;;  %s2775_s1 = inlined_call_operand.vmem [shape: f32[2,8,32], index: 1, kind: input, shape index: {}]   ;;  %s2776_s2 = inlined_call_operand.vmem [shape: f32[2,1,8], index: 2, kind: input, shape index: {}]   ;;  %s2777_s3 = inlined_call_operand.vmem [shape: bf16[32,1536], index: 3, kind: input, shape index: {}]   ;;  %s2778_s4 = inlined_call_operand.vmem [shape: f32[1,1536], index: 4, kind: input, shape index: {}]   ;;  %s2779_s5 = inlined_call_operand.vmem [shape: bf16[512,32], index: 5, kind: input, shape index: {}]   ;;  %s2780_s6 = inlined_call_operand.vmem [shape: f32[1,32], index: 6, kind: input, shape index: {}]   ;;  %s2781_s7 = inlined_call_operand.vmem [shape: bf16[32,64], index: 7, kind: input, shape index: {}]   ;;  %s2782_s8 = inlined_call_operand.vmem [shape: f32[1,64], index: 8, kind: input, shape index: {}]   ;;  %s2783_s9 = inlined_call_operand.vmem [shape: bf16[64,32], index: 9, kind: input, shape index: {}]   ;;  %s2784_s10 = inlined_call_operand.vmem [shape: f32[1,32], index: 10, kind: input, shape index: {}]   ;;  %s2785_s11 = inlined_call_operand.hbm [shape: f32[2,8,32], index: 11, kind: output, shape index: {}]  }
   0x1   :  { %2787 = sst [smem:[#allocation14_spill]] %s2774_s0 }
   0x2   :  { %2788 = sst [smem:[#allocation15_spill]] %s2775_s1 }
   0x3   :  { %16 = vsyncpa [#allocation9], 0 }
   0x4   :  { %17 = vsyncpa [#allocation8], 0 }
   0x5   :  { %19 = vsyncpa [#allocation8 + $0x1], 0  ;;  %s2329_s17 = smov 0   ;;  %s2331_s18 = smov 0  }
   0x6   :  { %s2333_s19 = smov 0   ;;  %s2335_s20 = smov 0  }
   0x7   :  { %s2337_s21 = smov 0   ;;  %s2339_s22 = smov 0  }
   0x8 LB: > { %s1722_s23 = sadd.s32 4294967295, %s2264_s22   ;;  %s1723_s24 = sadd.s32 4294967294, %s2264_s22   ;;  %s2264_s22 = sphi %s2339_s22, %s25_s22   ;;  %s2260_s21 = sphi %s2337_s21, %s2800_s21   ;;  %s2256_s20 = sphi %s2335_s20, %s2799_s20   ;;  %s2252_s19 = sphi %s2333_s19, %s2798_s19   ;;  %s2248_s18 = sphi %s2331_s18, %s2797_s18   ;;  %s2244_s17 = sphi %s2329_s17, %s2796_s17  }
   0x9   : > { %s37_s25 = sadd.s32 1, %s2260_s21  ;;  %s300_s26 = sadd.s32 1, %s2252_s19 }
   0xa   : > { %p39_p0 = scmp.ge.s32.totalorder %s37_s25, 2  ;;  %p310_p1 = scmp.ne.s32.totalorder %s2252_s19, %s2248_s18 }
   0xb   : > { %p311_p2 = scmp.eq.s32.totalorder %s1722_s23, 1  ;;  %p316_p3 = scmp.ne.s32.totalorder %s2248_s18, %s2244_s17 }
   0xc   : > { %s2802_s25 = smov (%p39_p0, %s37_s25), 0  ;;  %p317_p5 = scmp.eq.s32.totalorder %s1723_s24, 1 }
   0xd   : > { %2789 = sst [smem:[#allocation13_spill]] %s2802_s25  ;;  %p2369_p4 = por %p311_p2, %p310_p1 }
   0xe   : > { %s297_s28 = ssub.s32 %s2260_s21, %s2802_s25  ;;  %p1724_p6 = scmp.ge.s32.totalorder %s2264_s22, 1 }
   0xf   : > { %p298_p7 = scmp.eq.s32.totalorder %s297_s28, 0  ;;  %p2376_p8 = por %p317_p5, %p316_p3 }
  0x10   : > { %p324_p9 = scmp.lt.s32.totalorder %s2264_s22, 3  ;;  %p2083_p11 = scmp.eq.s32.totalorder %s1722_s23, 0 }
  0x11   : > { %s2382_s30 = scalar_select %p298_p7, %s2252_s19, %s300_s26  }
  0x12   : > { %p325_p10 = pnand %p1724_p6, %p324_p9  ;;  %s2792_s0 = sld [smem:[#allocation14_spill]] }
  0x13   : > { %s2266_s15 = smov [#allocation7]  }
  0x14   : > { %p2075_p12 = pneg %p325_p10 }
  0x15   : > { %399 = sbr.rel (%p325_p10) target bundleno = 1751 (0x6d7), region = 64 }
  0x16   : > { %p2076_p13 = pnand %p2083_p11, %p2075_p12 }
  0x18   : > { %s336_s14 = sshll.u32 %s2792_s0, 4  ;;  %s337_s14 = int_to_ptr.vmem [resolvable:$true] %s336_s14 }
  0x19   : > { %2078 = dma.vmem_to_smem (!%p2076_p13), %s337_s14, 16, %s2266_s15, [#allocation9]  }
  0x1a   : > { %2235 = dma.done.wait (%p2083_p11), [#allocation9], 16  }
  0x1b   : > { %2237 = vsyncadd (%p2083_p11), [#allocation9], 4294967280 }
  0x1c   : > { %406 = sfence }
  0x1d   : > { %p455_p0 = scmp.lt.s32.totalorder %s2256_s20, 1  ;;  %vm483_vm0 = vcmask 261120   ;;  %s2793_s1 = sld [smem:[#allocation15_spill]]  ;;  %v2267_v2 = vmov 32.0   ;;  %v1785_v16 = vld [vmem:[%s2777_s3 + $0x60] sm:$0xf] }
  0x1e   : > { %2141 = vrcp.f32 %v2267_v2  ;;  %v2025_v17 = vld [vmem:[%s2777_s3 + $0x8c] sm:$0xf0]  ;;  %v2019_v18 = vld [vmem:[%s2777_s3 + $0x64] sm:$0xf]  ;;  %v1787_v20 = vld [vmem:[%s2777_s3 + $0x90] sm:$0xf0] }
  0x1f   : > { %s2389_s16 = scalar_select %p455_p0, %s2256_s20, 1  ;;  %v1786_v19 = vor.u32 %v2025_v17, %v1785_v16  ;;  %v1793_v21 = vld [vmem:[%s2777_s3 + $0x68] sm:$0xf]  ;;  %v2026_v22 = vld [vmem:[%s2777_s3 + $0x94] sm:$0xf0]  ;;  %v1790_v24 = vor.u32 %v2019_v18, %v1787_v20  ;;  %vm918_vm8 = vcmask 1043456  }
  0x20   : > { %v1794_v25 = vor.u32 %v2026_v22, %v1793_v21  ;;  %v2020_v26 = vld [vmem:[%s2777_s3 + $0x6c] sm:$0xf]  ;;  %v1795_v27 = vld [vmem:[%s2777_s3 + $0x98] sm:$0xf0]  ;;  %v1737_v30 = vld [vmem:[%s2777_s3] sm:$0xf] }
  0x21   : > { %s1733_s23 = sshll.u32 %s2389_s16, 3  ;;  %715 = vmatpush.bf16.msra.mxu0 %v1786_v19  ;;  %v1798_v29 = vor.u32 %v2020_v26, %v1795_v27  ;;  %728 = vmatpush.bf16.msra.mxu1 %v1790_v24  ;;  %v2013_v31 = vld [vmem:[%s2777_s3 + $0x2c] sm:$0xf0]  ;;  %v2007_v32 = vld [vmem:[%s2777_s3 + $0x4] sm:$0xf]  ;;  %s481_s13 = sld [smem:[#allocation7]] }
  0x22   : > { %741 = vmatpush.bf16.msra.mxu2 %v1794_v25  ;;  %v1738_v34 = vor.u32 %v2013_v31, %v1737_v30  ;;  %v1739_v35 = vld [vmem:[%s2777_s3 + $0x30] sm:$0xf0]  ;;  %v1745_v36 = vld [vmem:[%s2777_s3 + $0x8] sm:$0xf]  ;;  %v2014_v37 = vld [vmem:[%s2777_s3 + $0x34] sm:$0xf0]  ;;  %s2794_s0 = scalar_lea.vmem %s2776_s2, %s2389_s16 }
  0x23   : > { %s458_s14 = scalar_lea.vmem %s2793_s1, %s1733_s23  ;;  %754 = vmatpush.bf16.msra.mxu3 %v1798_v29  ;;  %v1742_v38 = vor.u32 %v2007_v32, %v1739_v35  ;;  %v1746_v39 = vor.u32 %v2014_v37, %v1745_v36  ;;  %v2008_v40 = vld [vmem:[%s2777_s3 + $0xc] sm:$0xf]  ;;  %v1747_v41 = vld [vmem:[%s2777_s3 + $0x38] sm:$0xf0]  ;;  %v1801_v47 = vld [vmem:[%s2777_s3 + $0x70] sm:$0xf] }
  0x24   : > { %v2399_v0 = vld [vmem:[%s458_s14] sm:$0xff]  ;;  %v2142_v3 = vpop.eup %2141  ;;  %v1750_v43 = vor.u32 %v2008_v40, %v1747_v41  ;;  %v2021_v49 = vld [vmem:[%s2777_s3 + $0x74] sm:$0xf]  ;;  %v1809_v52 = vld [vmem:[%s2777_s3 + $0x78] sm:$0xf]  ;;  %s1734_s14 = sld [smem:[#allocation7 + $0x1]] }
  0x25   : > { %v484_v1 = vsel %vm483_vm0, %v2399_v0, 0.0  ;;  %v488_v4 = vmul.f32 32.0, %v2142_v3  ;;  %vm492_vm1 = vweird.f32 %v2142_v3  ;;  %716 = vmatpush.bf16.msra.mxu0 %v1738_v34  ;;  %729 = vmatpush.bf16.msra.mxu1 %v1742_v38  ;;  %v2027_v48 = vld [vmem:[%s2777_s3 + $0x9c] sm:$0xf0]  ;;  %v1803_v51 = vld [vmem:[%s2777_s3 + $0xa0] sm:$0xf0] }
  0x26   : > { %485 = vadd.xlane.f32.xlu0 %v484_v1  ;;  %742 = vmatpush.bf16.msra.mxu2 %v1746_v39  ;;  %v1802_v50 = vor.u32 %v2027_v48, %v1801_v47  ;;  %v2028_v53 = vld [vmem:[%s2777_s3 + $0xa4] sm:$0xf0]  ;;  %v1806_v55 = vor.u32 %v2021_v49, %v1803_v51  ;;  %v2022_v57 = vld [vmem:[%s2777_s3 + $0x7c] sm:$0xf]  ;;  %v1811_v58 = vld [vmem:[%s2777_s3 + $0xa8] sm:$0xf0] }
  0x27   : > { %v489_v5 = vsub.f32 1.0, %v488_v4  ;;  %755 = vmatpush.bf16.msra.mxu3 %v1750_v43  ;;  %v1810_v56 = vor.u32 %v2028_v53, %v1809_v52  ;;  %v1753_v59 = vld [vmem:[%s2777_s3 + $0x10] sm:$0xf]  ;;  %v1814_v60 = vor.u32 %v2022_v57, %v1811_v58  ;;  %v2015_v61 = vld [vmem:[%s2777_s3 + $0x3c] sm:$0xf0]  ;;  %v501_v20 = vstv %s481_s13  ;;  %s1975_s25 = sld [smem:[#allocation7 + $0x2]] }
  0x28   : > { %v2009_v62 = vld [vmem:[%s2777_s3 + $0x14] sm:$0xf]  ;;  %v1755_v63 = vld [vmem:[%s2777_s3 + $0x40] sm:$0xf0]  ;;  %v1754_v2 = vor.u32 %v2015_v61, %v1753_v59  ;;  %v1761_v4 = vld [vmem:[%s2777_s3 + $0x18] sm:$0xf] }
  0x29   : > { %v490_v6 = vmul.f32 %v2142_v3, %v489_v5  ;;  %767 = vmatpush.bf16.msrb.mxu0 %v1802_v50  ;;  %780 = vmatpush.bf16.msrb.mxu1 %v1806_v55  ;;  %v2016_v5 = vld [vmem:[%s2777_s3 + $0x44] sm:$0xf0]  ;;  %v2029_v29 = vld [vmem:[%s2777_s3 + $0xac] sm:$0xf0]  ;;  %v2023_v30 = vld [vmem:[%s2777_s3 + $0x84] sm:$0xf] }
  0x2a   : > { %793 = vmatpush.bf16.msrb.mxu2 %v1810_v56  ;;  %v531_v25 = vstv %s1734_s14  ;;  %v1825_v31 = vld [vmem:[%s2777_s3 + $0x88] sm:$0xf]  ;;  %v2024_v34 = vld [vmem:[%s2777_s3 + $0x8c] sm:$0xf]  ;;  %v1827_v35 = vld [vmem:[%s2777_s3 + $0xb8] sm:$0xf0] }
  0x2b   : > { %v491_v7 = vadd.f32 %v2142_v3, %v490_v6  ;;  %v2010_v6 = vld [vmem:[%s2777_s3 + $0x1c] sm:$0xf]  ;;  %806 = vmatpush.bf16.msrb.mxu3 %v1814_v60  ;;  %v1769_v39 = vld [vmem:[%s2777_s3 + $0x20] sm:$0xf]  ;;  %v2017_v40 = vld [vmem:[%s2777_s3 + $0x4c] sm:$0xf0] }
  0x2c   : > { %v2011_v43 = vld [vmem:[%s2777_s3 + $0x24] sm:$0xf]  ;;  %v2012_v47 = vld [vmem:[%s2777_s3 + $0x2c] sm:$0xf]  ;;  %v1779_v48 = vld [vmem:[%s2777_s3 + $0x58] sm:$0xf0]  ;;  %v1770_v49 = vor.u32 %v2017_v40, %v1769_v39 }
  0x2d   : > { %v2403_v8 = vsel %vm492_vm1, %v2142_v3, %v491_v7  ;;  %v1758_v3 = vor.u32 %v2009_v62, %v1755_v63  ;;  %768 = vmatpush.bf16.msrb.mxu0 %v1754_v2  ;;  %v1782_v52 = vor.u32 %v2012_v47, %v1779_v48  ;;  %v558_v53 = vld [vmem:[%s2778_s4] sm:$0xff]  ;;  %vm902_vm9 = vcmask 64512   ;;  %s1976_s28 = sld [smem:[#allocation7 + $0x3]]  ;;  %s452_s12 = sand.u32 1, %s2248_s18  }
  0x2e   : > { %v563_v55 = vperm.slane %v558_v53, 1  ;;  %v564_v61 = vperm.slane %v558_v53, 2  ;;  %v565_v62 = vperm.slane %v558_v53, 3  ;;  %vm1469_vm1 = vcmask 257024   ;;  %s2004_s16 = sshll.u32 %s2256_s20, 3  ;;  %s1577_s20 = scalar_lea.sflag [#allocation8], %s452_s12 }
  0x2f   : > { %781 = vmatpush.bf16.msrb.mxu1 %v1758_v3 }
  0x99   : > { %v486_v9 = vpop.xlane.xlu0 %485 }
  0x9a   : > { %v494_v10 = vmul.f32 %v2403_v8, %v486_v9  ;;  %v1762_v9 = vor.u32 %v2016_v5, %v1761_v4 }
  0x9c   : > { %v2407_v11 = vsub.f32 %v2399_v0, %v494_v10  ;;  %v1763_v10 = vld [vmem:[%s2777_s3 + $0x48] sm:$0xf0]  ;;  %794 = vmatpush.bf16.msrb.mxu2 %v1762_v9  ;;  %v567_v9 = vperm.slane %v558_v53, 5 }
  0x9e   : > { %v496_v12 = vmul.f32 %v2407_v11, %v2407_v11 }
  0xa0   : > { %v497_v13 = vsel %vm483_vm0, %v496_v12, 0.0 }
  0xa1   : > { %498 = vadd.xlane.f32.xlu0 %v497_v13  ;;  %v1766_v13 = vor.u32 %v2010_v6, %v1763_v10 }
  0xa3   : > { %807 = vmatpush.bf16.msrb.mxu3 %v1766_v13 }
 0x114   : > { %v499_v14 = vpop.xlane.xlu0 %498 }
 0x115   : > { %v2412_v15 = vmul.f32 0.032258064, %v499_v14 }
 0x117   : > { %2143 = vrsqrt.f32 %v2412_v15  ;;  %vm510_vm2 = vcmp.eq.f32.partialorder %v2412_v15, inf  ;;  %vm512_vm3 = vcmp.eq.f32.partialorder %v2412_v15, 0.0  ;;  %v513_v45 = vand.u32 2147483648, %v2412_v15 }
 0x11d   : > { %v2144_v23 = vpop.eup %2143 }
 0x11e   : > { %v504_v28 = vmul.f32 %v2144_v23, %v2412_v15 }
 0x120   : > { %v505_v33 = vmul.f32 %v2144_v23, %v504_v28  ;;  %v1817_v28 = vld [vmem:[%s2777_s3 + $0x80] sm:$0xf] }
 0x121   : > { %v1818_v37 = vor.u32 %v2029_v29, %v1817_v28 }
 0x122   : > { %v506_v42 = vmul.f32 0.5, %v505_v33  ;;  %v2030_v33 = vld [vmem:[%s2777_s3 + $0xb4] sm:$0xf0] }
 0x123   : > { %v1826_v41 = vor.u32 %v2030_v33, %v1825_v31 }
 0x124   : > { %v507_v44 = vsub.f32 1.5, %v506_v42  ;;  %v1830_v42 = vor.u32 %v2024_v34, %v1827_v35 }
 0x126   : > { %v508_v46 = vmul.f32 %v2144_v23, %v507_v44  ;;  %v502_v23 = vmul.f32 %v501_v20, %v2407_v11  ;;  %v1819_v11 = vld [vmem:[%s2777_s3 + $0xb0] sm:$0xf0] }
 0x127   : > { %v1822_v38 = vor.u32 %v2023_v30, %v1819_v11  ;;  %v1771_v44 = vld [vmem:[%s2777_s3 + $0x50] sm:$0xf0] }
 0x128   : > { %v509_v54 = vmul.f32 %v508_v46, %v2412_v15  ;;  %v2018_v46 = vld [vmem:[%s2777_s3 + $0x54] sm:$0xf0]  ;;  %v1774_v50 = vor.u32 %v2011_v43, %v1771_v44 }
 0x12a   : > { %v511_v1 = vsel %vm510_vm2, %v2412_v15, %v509_v54  ;;  %v562_v54 = vperm.slane %v558_v53, 0  ;;  %vm1545_vm2 = vcmask 523264  }
 0x12b   : > { %v514_v7 = vsel %vm512_vm3, %v513_v45, %v511_v1  ;;  %v1777_v45 = vld [vmem:[%s2777_s3 + $0x28] sm:$0xf] }
 0x12c   : > { %v515_v12 = vadd.f32 1e-06, %v514_v7  ;;  %v1778_v51 = vor.u32 %v2018_v46, %v1777_v45  ;;  %v566_v7 = vperm.slane %v558_v53, 4 }
 0x12e   : > { %2145 = vrcp.f32 %v515_v12  ;;  %v527_v15 = vand.u32 2147483648, %v515_v12  ;;  %v525_v19 = vand.u32 2147483647, %v515_v12  ;;  %vm521_vm5 = vweird.f32 %v515_v12 }
 0x130   : > { %v528_v22 = vor.u32 1.1754944e-38, %v527_v15  ;;  %vm526_vm7 = vcmp.eq.f32.partialorder %v525_v19, 8.507059e+37  ;;  %v569_v19 = vperm.slane %v558_v53, 7 }
 0x134   : > { %v2146_v14 = vpop.eup %2145 }
 0x135   : > { %v517_v16 = vmul.f32 %v2146_v14, %v515_v12  ;;  %vm522_vm4 = vweird.f32 %v2146_v14 }
 0x136   : > { %vm523_vm6 = vmor %vm521_vm5, %vm522_vm4 }
 0x137   : > { %v518_v17 = vsub.f32 1.0, %v517_v16 }
 0x139   : > { %v519_v18 = vmul.f32 %v2146_v14, %v518_v17 }
 0x13b   : > { %v520_v21 = vadd.f32 %v2146_v14, %v519_v18  ;;  %v568_v18 = vperm.slane %v558_v53, 6 }
 0x13d   : > { %v524_v24 = vsel %vm523_vm6, %v2146_v14, %v520_v21 }
 0x13e   : > { %v529_v26 = vsel %vm526_vm7, %v528_v22, %v524_v24 }
 0x13f   : > { %v530_v27 = vmul.f32 %v529_v26, %v502_v23 }
 0x141   : > { %v532_v32 = vadd.f32 %v531_v25, %v530_v27  ;;  %v559_v27 = vld [vmem:[%s2778_s4 + $0x8] sm:$0xf] }
 0x142   : > { %v570_v30 = vperm.slane %v559_v27, 0  ;;  %v571_v11 = vperm.slane %v559_v27, 1  ;;  %v573_v43 = vperm.slane %v559_v27, 3 }
 0x143   : > { %v533_v36 = vpack.c.bf16 %v532_v32, %v532_v32 }
 0x145   : > { %1831 = vmatmul.msk.bf16.vlgmr.msra.gmra.mxu0 %vm483_vm0, %v533_v36  ;;  %1832 = vmatmul.msk.bf16.vlgmr.msra.gmra.mxu1 %vm483_vm0, %v533_v36 }
 0x146   : > { %1833 = vmatmul.msk.bf16.vlgmr.msra.gmra.mxu2 %vm483_vm0, %v533_v36  ;;  %1834 = vmatmul.msk.bf16.vlgmr.msra.gmra.mxu3 %vm483_vm0, %v533_v36 }
 0x147   : > { %819 = vmatpush.bf16.msra.mxu0 %v1818_v37  ;;  %832 = vmatpush.bf16.msra.mxu1 %v1822_v38 }
 0x148   : > { %845 = vmatpush.bf16.msra.mxu2 %v1826_v41  ;;  %858 = vmatpush.bf16.msra.mxu3 %v1830_v42  ;;  %v572_v42 = vperm.slane %v559_v27, 2 }
 0x14b   : > { %820 = vmatpush.bf16.msra.mxu0 %v1770_v49  ;;  %833 = vmatpush.bf16.msra.mxu1 %v1774_v50 }
 0x14c   : > { %846 = vmatpush.bf16.msra.mxu2 %v1778_v51  ;;  %859 = vmatpush.bf16.msra.mxu3 %v1782_v52 }
 0x155   : > { %1835 = vmatmul.msk.bf16.vlgmr.msrb.gmra.mxu0 %vm483_vm0, %v533_v36  ;;  %1836 = vmatmul.msk.bf16.vlgmr.msrb.gmra.mxu1 %vm483_vm0, %v533_v36 }
 0x156   : > { %1837 = vmatmul.msk.bf16.vlgmr.msrb.gmra.mxu2 %vm483_vm0, %v533_v36  ;;  %1838 = vmatmul.msk.bf16.vlgmr.msrb.gmra.mxu3 %vm483_vm0, %v533_v36 }
 0x165   : > { %1839 = vmatmul.msk.bf16.vlgmr.msra.gmra.mxu0 %vm483_vm0, %v533_v36  ;;  %1840 = vmatmul.msk.bf16.vlgmr.msra.gmra.mxu1 %vm483_vm0, %v533_v36 }
 0x166   : > { %1841 = vmatmul.msk.bf16.vlgmr.msra.gmra.mxu2 %vm483_vm0, %v533_v36  ;;  %1842 = vmatmul.msk.bf16.vlgmr.msra.gmra.mxu3 %vm483_vm0, %v533_v36 }
 0x1c2   : > { %v718_v56 = vpop.f32.mrf.mxu0  ;;  %v731_v57 = vpop.f32.mrf.mxu1 }
 0x1c3   : > { %v719_v58 = vadd.f32 %v718_v56, %v562_v54  ;;  %v732_v59 = vadd.f32 %v731_v57, %v563_v55 }
 0x1c5   : > { %v865_v60 = vpack.c.bf16 %v732_v59, %v719_v58 }
 0x1c7   : > { %871 = vst [vmem:[#allocation2] sm:$0xff] %v865_v60 }
 0x1c9   : > { %v744_v63 = vpop.f32.mrf.mxu2  ;;  %v757_v1 = vpop.f32.mrf.mxu3 }
 0x1ca   : > { %v745_v2 = vadd.f32 %v744_v63, %v564_v61  ;;  %v758_v3 = vadd.f32 %v757_v1, %v565_v62  ;;  %v720_v4 = vpop.f32.mrf.mxu0  ;;  %v733_v5 = vpop.f32.mrf.mxu1 }
 0x1cc   : > { %v866_v6 = vpack.c.bf16 %v758_v3, %v745_v2  ;;  %v2137_v2 = vld [vmem:[%s2794_s0] ss:$0 sm:$0xff]  ;;  %s1732_s0 = sshll.u32 %s452_s12, 3 }
 0x1cd   : > { %s454_s15 = scalar_lea.vmem [#allocation10], %s1732_s0  ;;  %s2202_s0 = scalar_lea.hbm %s2785_s11, 16 }
 0x1ce   : > { %872 = vst [vmem:[#allocation2 + $0x8] sm:$0xff] %v866_v6  ;;  %v881_v40 = vld [vmem:[#allocation2] sm:$0xf]  ;;  %v940_v41 = vld [vmem:[#allocation2 + $0x4] sm:$0xf]  ;;  %s1589_s23 = sshll.u32 %s454_s15, 4  ;;  %s1590_s23 = int_to_ptr.vmem [resolvable:$true] %s1589_s23 }
 0x1d1   : > { %v746_v10 = vpop.f32.mrf.mxu2  ;;  %v759_v12 = vpop.f32.mrf.mxu3 }
 0x1d2   : > { %v770_v13 = vpop.f32.mrf.mxu0  ;;  %v783_v14 = vpop.f32.mrf.mxu1 }
 0x1d3   : > { %v771_v16 = vadd.f32 %v770_v13, %v566_v7  ;;  %v784_v17 = vadd.f32 %v783_v14, %v567_v9 }
 0x1d5   : > { %v867_v15 = vpack.c.bf16 %v784_v17, %v771_v16  ;;  %v991_v59 = vld [vmem:[#allocation2 + $0x8] sm:$0xf]  ;;  %v1042_v62 = vld [vmem:[#allocation2 + $0xc] sm:$0xf] }
 0x1d7   : > { %873 = vst [vmem:[#allocation2 + $0x10] sm:$0xff] %v867_v15 }
 0x1d9   : > { %v796_v20 = vpop.f32.mrf.mxu2  ;;  %v809_v21 = vpop.f32.mrf.mxu3 }
 0x1da   : > { %v797_v22 = vadd.f32 %v796_v20, %v568_v18  ;;  %v810_v23 = vadd.f32 %v809_v21, %v569_v19  ;;  %v772_v24 = vpop.f32.mrf.mxu0  ;;  %v785_v25 = vpop.f32.mrf.mxu1 }
 0x1dc   : > { %v868_v26 = vpack.c.bf16 %v810_v23, %v797_v22 }
 0x1de   : > { %874 = vst [vmem:[#allocation2 + $0x18] sm:$0xff] %v868_v26  ;;  %v882_v28 = vld [vmem:[#allocation2 + $0x10] sm:$0xf]  ;;  %v941_v29 = vld [vmem:[#allocation2 + $0x14] sm:$0xf] }
 0x1df   : > { %891 = vmatpush.bf16.xpose.msrb.mxu0 %v882_v28  ;;  %950 = vmatpush.bf16.xpose.msrb.mxu2 %v941_v29 }
 0x1e1   : > { %v798_v31 = vpop.f32.mrf.mxu2  ;;  %v811_v32 = vpop.f32.mrf.mxu3 }
 0x1e2   : > { %v822_v33 = vpop.f32.mrf.mxu0  ;;  %v835_v34 = vpop.f32.mrf.mxu1 }
 0x1e3   : > { %v823_v35 = vadd.f32 %v822_v33, %v570_v30  ;;  %v836_v36 = vadd.f32 %v835_v34, %v571_v11 }
 0x1e5   : > { %v869_v37 = vpack.c.bf16 %v836_v36, %v823_v35  ;;  %v992_v38 = vld [vmem:[#allocation2 + $0x18] sm:$0xf]  ;;  %v1043_v39 = vld [vmem:[#allocation2 + $0x1c] sm:$0xf] }
 0x1e6   : > { %892 = vmatmul.bf16.vlgmr.msrb.gmra.mxu0 %v881_v40  ;;  %951 = vmatmul.bf16.vlgmr.msrb.gmra.mxu2 %v940_v41 }
 0x1e7   : > { %1001 = vmatpush.bf16.xpose.msra.mxu0 %v992_v38  ;;  %1052 = vmatpush.bf16.xpose.msra.mxu2 %v1043_v39  ;;  %875 = vst [vmem:[#allocation2 + $0x20] sm:$0xff] %v869_v37 }
 0x1e9   : > { %v848_v44 = vpop.f32.mrf.mxu2  ;;  %v861_v45 = vpop.f32.mrf.mxu3 }
 0x1ea   : > { %v849_v46 = vadd.f32 %v848_v44, %v572_v42  ;;  %v862_v47 = vadd.f32 %v861_v45, %v573_v43  ;;  %v824_v48 = vpop.f32.mrf.mxu0  ;;  %v837_v49 = vpop.f32.mrf.mxu1  ;;  %v2038_v43 = vld [vmem:[%s2779_s5 + $0x38] sm:$0xff]  ;;  %v2037_v45 = vld [vmem:[%s2779_s5 + $0x30] sm:$0xff] }
 0x1eb   : > { %v2036_v49 = vld [vmem:[%s2779_s5 + $0x28] sm:$0xff] }
 0x1ec   : > { %v870_v50 = vpack.c.bf16 %v862_v47, %v849_v46 }
 0x1ee   : > { %876 = vst [vmem:[#allocation2 + $0x28] sm:$0xff] %v870_v50  ;;  %v883_v51 = vld [vmem:[#allocation2 + $0x20] sm:$0xf]  ;;  %v942_v52 = vld [vmem:[#allocation2 + $0x24] sm:$0xf] }
 0x1ef   : > { %v920_v53 = vsel %vm918_vm8, %v883_v51, 0  ;;  %v974_v54 = vsel %vm918_vm8, %v942_v52, 0  ;;  %1369 = vmatpush.bf16.msrb.mxu0 %v2038_v43  ;;  %v2035_v51 = vld [vmem:[%s2779_s5 + $0x20] sm:$0xff] }
 0x1f0   : > { %929 = vmatpush.bf16.msrb.mxu1 %v920_v53  ;;  %983 = vmatpush.bf16.msrb.mxu3 %v974_v54  ;;  %v2046_v54 = vld [vmem:[%s2779_s5 + $0x78] sm:$0xff] }
 0x1f1   : > { %v850_v55 = vpop.f32.mrf.mxu2  ;;  %v863_v56 = vpop.f32.mrf.mxu3 }
 0x1f2   : > { %v2045_v56 = vld [vmem:[%s2779_s5 + $0x70] sm:$0xff] }
 0x1f3   : > { %1370 = vmatpush.bf16.msrb.mxu0 %v2037_v45 }
 0x1f5   : > { %v993_v57 = vld [vmem:[#allocation2 + $0x28] sm:$0xf]  ;;  %v1044_v58 = vld [vmem:[#allocation2 + $0x2c] sm:$0xf] }
 0x1f6   : > { %v1025_v60 = vsel %vm918_vm8, %v993_v57, 0  ;;  %v1076_v61 = vsel %vm918_vm8, %v1044_v58, 0  ;;  %1002 = vmatmul.bf16.vlgmr.msra.gmra.mxu0 %v991_v59  ;;  %1053 = vmatmul.bf16.vlgmr.msra.gmra.mxu2 %v1042_v62  ;;  %v2043_v62 = vld [vmem:[%s2779_s5 + $0x60] sm:$0xff] }
 0x1f7   : > { %1034 = vmatpush.bf16.msra.mxu1 %v1025_v60  ;;  %1085 = vmatpush.bf16.msra.mxu3 %v1076_v61  ;;  %v2044_v60 = vld [vmem:[%s2779_s5 + $0x68] sm:$0xff] }
 0x1f8   : > { %1371 = vmatpush.bf16.msrb.mxu0 %v2036_v49 }
 0x1fc   : > { %1372 = vmatpush.bf16.msrb.mxu0 %v2035_v51 }
 0x263   : > { %v893_v63 = vpop.f32.mrf.mxu0 }
 0x264   : > { %v897_v6 = vmul.f32 0.35355338, %v893_v63 }
 0x266   : > { %v901_v10 = vadd.f32 %v2137_v2, %v897_v6  ;;  %v2062_v6 = vld [vmem:[%s2779_s5 + $0xf8] sm:$0xff] }
 0x268   : > { %v903_v13 = vsel %vm902_vm9, %v901_v10, -inf }
 0x269   : > { %v952_v1 = vpop.f32.mrf.mxu2 }
 0x26a   : > { %v956_v3 = vmul.f32 0.35355338, %v952_v1 }
 0x26b   : > { %v895_v4 = vpop.f32.mrf.mxu0 }
 0x26c   : > { %v957_v5 = vadd.f32 %v2137_v2, %v956_v3  ;;  %v2034_v3 = vld [vmem:[%s2779_s5 + $0x18] sm:$0xff] }
 0x26d   : > { %v2042_v4 = vld [vmem:[%s2779_s5 + $0x58] sm:$0xff]  ;;  %1373 = vmatpush.bf16.msrb.mxu0 %v2034_v3 }
 0x26e   : > { %v958_v7 = vsel %vm902_vm9, %v957_v5, -inf }
 0x26f   : > { %959 = vmax.xlane.f32.xlu1 %v958_v7  ;;  %v2033_v7 = vld [vmem:[%s2779_s5 + $0x10] sm:$0xff] }
 0x271   : > { %v954_v9 = vpop.f32.mrf.mxu2  ;;  %1374 = vmatpush.bf16.msrb.mxu0 %v2033_v7 }
 0x272   : > { %v2041_v9 = vld [vmem:[%s2779_s5 + $0x50] sm:$0xff] }
 0x273   : > { %v1003_v12 = vpop.f32.mrf.mxu0 }
 0x274   : > { %v1007_v18 = vmul.f32 0.35355338, %v1003_v12  ;;  %v2061_v12 = vld [vmem:[%s2779_s5 + $0xf0] sm:$0xff] }
 0x276   : > { %v1008_v21 = vadd.f32 %v2137_v2, %v1007_v18  ;;  %v2039_v18 = vld [vmem:[%s2779_s5 + $0x40] sm:$0xff] }
 0x277   : > { %904 = vmax.xlane.f32.xlu1 %v903_v13  ;;  %v2032_v13 = vld [vmem:[%s2779_s5 + $0x8] sm:$0xff] }
 0x278   : > { %v1009_v22 = vsel %vm902_vm9, %v1008_v21, -inf  ;;  %1375 = vmatpush.bf16.msrb.mxu0 %v2032_v13 }
 0x279   : > { %v1054_v14 = vpop.f32.mrf.mxu2 }
 0x27a   : > { %v1058_v16 = vmul.f32 0.35355338, %v1054_v14  ;;  %v2040_v14 = vld [vmem:[%s2779_s5 + $0x48] sm:$0xff] }
 0x27b   : > { %v1005_v17 = vpop.f32.mrf.mxu0 }
 0x27c   : > { %v1059_v15 = vadd.f32 %v2137_v2, %v1058_v16  ;;  %v2052_v16 = vld [vmem:[%s2779_s5 + $0xa8] sm:$0xff] }
 0x27d   : > { %v2060_v17 = vld [vmem:[%s2779_s5 + $0xe8] sm:$0xff] }
 0x27e   : > { %v1060_v19 = vsel %vm902_vm9, %v1059_v15, -inf }
 0x27f   : > { %1061 = vmax.xlane.f32.xlu2 %v1060_v19  ;;  %v2051_v19 = vld [vmem:[%s2779_s5 + $0xa0] sm:$0xff] }
 0x281   : > { %v1056_v20 = vpop.f32.mrf.mxu2 }
 0x282   : > { %v2059_v20 = vld [vmem:[%s2779_s5 + $0xe0] sm:$0xff] }
 0x287   : > { %1010 = vmax.xlane.f32.xlu2 %v1009_v22  ;;  %v2058_v22 = vld [vmem:[%s2779_s5 + $0xd8] sm:$0xff] }
 0x2e2   : > { %v960_v23 = vpop.xlane.xlu1 %959 }
 0x2e3   : > { %v961_v24 = vsub.f32 %v957_v5, %v960_v23  ;;  %v2054_v5 = vld [vmem:[%s2779_s5 + $0xb8] sm:$0xff]  ;;  %v2049_v23 = vld [vmem:[%s2779_s5 + $0x90] sm:$0xff] }
 0x2e4   : > { %1395 = vmatpush.bf16.msrb.mxu2 %v2054_v5 }
 0x2e5   : > { %v962_v25 = vmul.f32 1.442695, %v961_v24  ;;  %v2057_v24 = vld [vmem:[%s2779_s5 + $0xd0] sm:$0xff] }
 0x2e7   : > { %2147 = vpow2.f32 %v962_v25  ;;  %v2048_v25 = vld [vmem:[%s2779_s5 + $0x88] sm:$0xff] }
 0x2ea   : > { %v905_v26 = vpop.xlane.xlu1 %904 }
 0x2eb   : > { %v906_v27 = vsub.f32 %v901_v10, %v905_v26  ;;  %v2053_v10 = vld [vmem:[%s2779_s5 + $0xb0] sm:$0xff]  ;;  %v2056_v26 = vld [vmem:[%s2779_s5 + $0xc8] sm:$0xff] }
 0x2ec   : > { %1396 = vmatpush.bf16.msrb.mxu2 %v2053_v10 }
 0x2ed   : > { %v2148_v28 = vpop.eup %2147  ;;  %v907_v29 = vmul.f32 1.442695, %v906_v27  ;;  %v2047_v27 = vld [vmem:[%s2779_s5 + $0x80] sm:$0xff] }
 0x2ee   : > { %v964_v30 = vsel %vm902_vm9, %v2148_v28, 0.0 }
 0x2ef   : > { %2149 = vpow2.f32 %v907_v29  ;;  %965 = vadd.xlane.f32.xlu0 %v964_v30 }
 0x2f0   : > { %1397 = vmatpush.bf16.msrb.mxu2 %v2052_v16 }
 0x2f2   : > { %v1062_v11 = vpop.xlane.xlu2 %1061 }
 0x2f3   : > { %v1063_v31 = vsub.f32 %v1059_v15, %v1062_v11  ;;  %v2031_v15 = vld [vmem:[%s2779_s5] sm:$0xff] }
 0x2f4   : > { %1376 = vmatpush.bf16.msrb.mxu0 %v2031_v15  ;;  %1398 = vmatpush.bf16.msrb.mxu2 %v2051_v19 }
 0x2f5   : > { %v2150_v32 = vpop.eup %2149  ;;  %v1064_v33 = vmul.f32 1.442695, %v1063_v31 }
 0x2f6   : > { %v909_v34 = vsel %vm902_vm9, %v2150_v32, 0.0 }
 0x2f7   : > { %910 = vadd.xlane.f32.xlu1 %v909_v34  ;;  %2151 = vpow2.f32 %v1064_v33 }
 0x2fa   : > { %v1011_v35 = vpop.xlane.xlu2 %1010 }
 0x2fb   : > { %v1012_v36 = vsub.f32 %v1008_v21, %v1011_v35  ;;  %v2050_v21 = vld [vmem:[%s2779_s5 + $0x98] sm:$0xff] }
 0x2fc   : > { %1399 = vmatpush.bf16.msrb.mxu2 %v2050_v21 }
 0x2fd   : > { %v2152_v37 = vpop.eup %2151  ;;  %v1013_v38 = vmul.f32 1.442695, %v1012_v36 }
 0x2fe   : > { %v1066_v39 = vsel %vm902_vm9, %v2152_v37, 0.0 }
 0x2ff   : > { %2153 = vpow2.f32 %v1013_v38  ;;  %1067 = vadd.xlane.f32.xlu2 %v1066_v39 }
 0x300   : > { %1400 = vmatpush.bf16.msrb.mxu2 %v2049_v23  ;;  %v2067_v23 = vld [vmem:[%s2783_s9 + $0x10] sm:$0xff] }
 0x304   : > { %1401 = vmatpush.bf16.msrb.mxu2 %v2048_v25 }
 0x305   : > { %v2154_v40 = vpop.eup %2153 }
 0x306   : > { %v1015_v41 = vsel %vm902_vm9, %v2154_v40, 0.0 }
 0x307   : > { %1016 = vadd.xlane.f32.xlu0 %v1015_v41 }
 0x308   : > { %1402 = vmatpush.bf16.msrb.mxu2 %v2047_v27 }
 0x362   : > { %v966_v42 = vpop.xlane.xlu0 %965 }
 0x363   : > { %2155 = vrcp.f32 %v966_v42 }
 0x369   : > { %v2156_v44 = vpop.eup %2155 }
 0x36a   : > { %v968_v46 = vmul.f32 %v2156_v44, %v2148_v28  ;;  %v911_v47 = vpop.xlane.xlu1 %910  ;;  %v2055_v28 = vld [vmem:[%s2779_s5 + $0xc0] sm:$0xff] }
 0x36b   : > { %2157 = vrcp.f32 %v911_v47 }
 0x36c   : > { %v969_v48 = vpack.c.bf16 %v968_v46, %v968_v46 }
 0x36e   : > { %1844 = vmatmul.msk.bf16.vlgmr.msrb.gmra.mxu3 %vm902_vm9, %v969_v48 }
 0x36f   : > { %1408 = vmatpush.bf16.msrb.mxu3 %v2062_v6 }
 0x371   : > { %v2158_v50 = vpop.eup %2157 }
 0x372   : > { %v913_v52 = vmul.f32 %v2158_v50, %v2150_v32  ;;  %v1068_v53 = vpop.xlane.xlu2 %1067 }
 0x373   : > { %2159 = vrcp.f32 %v1068_v53  ;;  %1409 = vmatpush.bf16.msrb.mxu3 %v2061_v12  ;;  %v2064_v12 = vld [vmem:[%s2781_s7 + $0x8] sm:$0xff] }
 0x374   : > { %v914_v55 = vpack.c.bf16 %v913_v52, %v913_v52  ;;  %1503 = vmatpush.bf16.msra.mxu0 %v2064_v12 }
 0x376   : > { %1843 = vmatmul.msk.bf16.vlgmr.msrb.gmra.mxu1 %vm902_vm9, %v914_v55 }
 0x377   : > { %1382 = vmatpush.bf16.msrb.mxu1 %v2046_v54  ;;  %1410 = vmatpush.bf16.msrb.mxu3 %v2060_v17  ;;  %v2138_v54 = vld [vmem:[%s2780_s6] ss:$0 sm:$0xff] }
 0x379   : > { %v2160_v57 = vpop.eup %2159 }
 0x37a   : > { %v1070_v58 = vmul.f32 %v2160_v57, %v2152_v37  ;;  %v1017_v59 = vpop.xlane.xlu0 %1016 }
 0x37b   : > { %1383 = vmatpush.bf16.msrb.mxu1 %v2045_v56  ;;  %2161 = vrcp.f32 %v1017_v59  ;;  %1411 = vmatpush.bf16.msrb.mxu3 %v2059_v20 }
 0x37c   : > { %v1071_v61 = vpack.c.bf16 %v1070_v58, %v1070_v58 }
 0x37e   : > { %1846 = vmatmul.msk.bf16.vlgmr.msra.gmra.mxu3 %vm902_vm9, %v1071_v61 }
 0x37f   : > { %1384 = vmatpush.bf16.msrb.mxu1 %v2044_v60  ;;  %1412 = vmatpush.bf16.msrb.mxu3 %v2058_v22  ;;  %v2068_v22 = vld [vmem:[%s2783_s9 + $0x18] sm:$0xff] }
 0x381   : > { %v2162_v63 = vpop.eup %2161 }
 0x382   : > { %v1019_v1 = vmul.f32 %v2162_v63, %v2154_v40 }
 0x383   : > { %1385 = vmatpush.bf16.msrb.mxu1 %v2043_v62  ;;  %1413 = vmatpush.bf16.msrb.mxu3 %v2057_v24 }
 0x384   : > { %v1020_v2 = vpack.c.bf16 %v1019_v1, %v1019_v1 }
 0x386   : > { %1845 = vmatmul.msk.bf16.vlgmr.msra.gmra.mxu1 %vm902_vm9, %v1020_v2 }
 0x387   : > { %1386 = vmatpush.bf16.msrb.mxu1 %v2042_v4  ;;  %1414 = vmatpush.bf16.msrb.mxu3 %v2056_v26 }
 0x38b   : > { %1387 = vmatpush.bf16.msrb.mxu1 %v2041_v9  ;;  %1415 = vmatpush.bf16.msrb.mxu3 %v2055_v28 }
 0x38f   : > { %1388 = vmatpush.bf16.msrb.mxu1 %v2040_v14 }
 0x393   : > { %1389 = vmatpush.bf16.msrb.mxu1 %v2039_v18 }
 0x397   : > { %1553 = vmatpush.bf16.msra.mxu1 %v2068_v22 }
 0x39b   : > { %1554 = vmatpush.bf16.msra.mxu1 %v2067_v23 }
 0x3f1   : > { %v985_v29 = vpop.f32.mrf.mxu3 }
 0x3f2   : > { %v989_v30 = vpack.c.bf16 %v985_v29, %v985_v29 }
 0x3f3   : > { %v931_v11 = vpop.f32.mrf.mxu1 }
 0x3f4   : > { %990 = vst [vmem:[#allocation3 + $0x4] sm:$0xf] %v989_v30  ;;  %v935_v31 = vpack.c.bf16 %v931_v11, %v931_v11  ;;  %v1436_v30 = vstv %s1975_s25 }
 0x3f6   : > { %939 = vst [vmem:[#allocation3] sm:$0xf] %v935_v31 }
 0x3f9   : > { %v987_v32 = vpop.f32.mrf.mxu3 }
 0x3fb   : > { %v933_v33 = vpop.f32.mrf.mxu1 }
 0x3fd   : > { %v1093_v34 = vld [vmem:[#allocation3] sm:$0xff] }
 0x3fe   : > { %v1165_v35 = vunpack.c.l.b16 %v1093_v34  ;;  %v1166_v36 = vunpack.c.h.b16 %v1093_v34 }
 0x400   : > { %v1169_v37 = vpack.c.b16 %v1165_v35, %v1165_v35  ;;  %v1170_v38 = vpack.c.b16 %v1166_v36, %v1166_v36  ;;  %v1466_v35 = vstv %s1976_s28  ;;  %s1587_s28 = scalar_lea.hbm %s2785_s11, %s2004_s16 }
 0x401   : > { %v1087_v39 = vpop.f32.mrf.mxu3  ;;  %s1591_s24 = sshll.u32 %s1587_s28, 4  ;;  %s1592_s24 = int_to_ptr.hbm [resolvable:$true] %s1591_s24 }
 0x402   : > { %1377 = vmatmul.bf16.vlgmr.msrb.gmra.mxu0 %v1169_v37  ;;  %1390 = vmatmul.bf16.vlgmr.msrb.gmra.mxu1 %v1170_v38  ;;  %v1091_v40 = vpack.c.bf16 %v1087_v39, %v1087_v39  ;;  %s2196_s26 = sshra.s32 %s1592_s24, 4  ;;  %s2197_s26 = int_to_ptr.hbm [resolvable:$true] %s2196_s26 }
 0x403   : > { %v1036_v41 = vpop.f32.mrf.mxu1  ;;  %s2198_s16 = scalar_lea.hbm %s2197_s26, 8  ;;  %p2203_p5 = scmp.lt.s32.totalorder %s2197_s26, %s2785_s11 }
 0x404   : > { %1092 = vst [vmem:[#allocation3 + $0xc] sm:$0xf] %v1091_v40  ;;  %v1040_v42 = vpack.c.bf16 %v1036_v41, %v1036_v41  ;;  %v2066_v40 = vld [vmem:[%s2783_s9 + $0x8] sm:$0xff]  ;;  %v2065_v41 = vld [vmem:[%s2783_s9] sm:$0xff]  ;;  %p2199_p1 = scmp.ne.s32.totalorder %s2197_s26, %s2198_s16  ;;  %p2204_p6 = scmp.lt.s32.totalorder %s2202_s0, %s2198_s16 }
 0x405   : > { %1555 = vmatpush.bf16.msra.mxu1 %v2066_v40 }
 0x406   : > { %1041 = vst [vmem:[#allocation3 + $0x8] sm:$0xf] %v1040_v42  ;;  %v2268_v42 = vmov 0.0   ;;  %p2200_p2 = pnand %p2199_p1, %p2369_p4  ;;  %p2205_p7 = por %p2204_p6, %p2203_p5 }
 0x407   : > { %1471 = vst.msk [vmem:[#allocation6] sm:$0xff] %vm483_vm0, %v2268_v42 }
 0x408   : > { %p2201_p3 = pneg %p2200_p2 }
 0x409   : > { %v1089_v43 = vpop.f32.mrf.mxu3  ;;  %1556 = vmatpush.bf16.msra.mxu1 %v2065_v41 }
 0x40a   : > { %v2139_v43 = vld [vmem:[%s2782_s8] ss:$0 sm:$0xff]  ;;  %p2206_p9 = pnand %p2205_p7, %p2201_p3 }
 0x40b   : > { %v1038_v44 = vpop.f32.mrf.mxu1 }
 0x40d   : > { %v1094_v45 = vld [vmem:[#allocation3 + $0x8] sm:$0xff] }
 0x40e   : > { %v1167_v46 = vunpack.c.l.b16 %v1094_v45  ;;  %v1168_v47 = vunpack.c.h.b16 %v1094_v45 }
 0x410   : > { %v1171_v48 = vpack.c.b16 %v1167_v46, %v1167_v46  ;;  %v1172_v49 = vpack.c.b16 %v1168_v47, %v1168_v47 }
 0x412   : > { %1403 = vmatmul.bf16.vlgmr.msrb.gmra.mxu2 %v1171_v48  ;;  %1416 = vmatmul.bf16.vlgmr.msrb.gmra.mxu3 %v1172_v49  ;;  %v1511_v49 = vld [vmem:[#allocation6] sm:$0xff] }
 0x47f   : > { %v1378_v50 = vpop.f32.mrf.mxu0  ;;  %v1391_v51 = vpop.f32.mrf.mxu1 }
 0x480   : > { %v1379_v55 = vadd.f32 %v2138_v54, %v1378_v50 }
 0x482   : > { %v1392_v56 = vadd.f32 %v1391_v51, %v1379_v55 }
 0x487   : > { %v1380_v52 = vpop.f32.mrf.mxu0  ;;  %v1393_v53 = vpop.f32.mrf.mxu1 }
 0x488   : > { %v2140_v53 = vld [vmem:[%s2784_s10] ss:$0 sm:$0xff] }
 0x495   : > { %v1404_v57 = vpop.f32.mrf.mxu2  ;;  %v1417_v58 = vpop.f32.mrf.mxu3 }
 0x496   : > { %v1405_v59 = vadd.f32 %v1404_v57, %v1392_v56 }
 0x498   : > { %v1418_v60 = vadd.f32 %v1417_v58, %v1405_v59 }
 0x49a   : > { %v1422_v61 = vadd.f32 %v1418_v60, %v2399_v0 }
 0x49c   : > { %1423 = vst.msk [vmem:[#allocation4] sm:$0xff] %vm483_vm0, %v1422_v61  ;;  %v1426_v62 = vsel %vm483_vm0, %v1422_v61, 0.0 }
 0x49d   : > { %v1406_v63 = vpop.f32.mrf.mxu2  ;;  %v1419_v1 = vpop.f32.mrf.mxu3  ;;  %1427 = vadd.xlane.f32.xlu1 %v1426_v62 }
 0x4a3   : > { %v1567_v54 = vld [vmem:[#allocation4] sm:$0xff] }
 0x510   : > { %v1428_v2 = vpop.xlane.xlu1 %1427 }
 0x511   : > { %v1429_v3 = vmul.f32 %v1428_v2, %v2403_v8  ;;  %v2063_v8 = vld [vmem:[%s2781_s7] sm:$0xff] }
 0x512   : > { %1504 = vmatpush.bf16.msra.mxu0 %v2063_v8 }
 0x513   : > { %v1430_v4 = vsub.f32 %v1422_v61, %v1429_v3 }
 0x515   : > { %v1431_v5 = vmul.f32 %v1430_v4, %v1430_v4  ;;  %v1437_v32 = vmul.f32 %v1436_v30, %v1430_v4 }
 0x517   : > { %v1432_v6 = vsel %vm483_vm0, %v1431_v5, 0.0 }
 0x518   : > { %1433 = vadd.xlane.f32.xlu2 %v1432_v6 }
 0x58b   : > { %v1434_v7 = vpop.xlane.xlu2 %1433 }
 0x58c   : > { %v1435_v9 = vmul.f32 0.032258064, %v1434_v7 }
 0x58e   : > { %2163 = vrsqrt.f32 %v1435_v9  ;;  %vm1445_vm10 = vcmp.eq.f32.partialorder %v1435_v9, inf  ;;  %v1448_v18 = vand.u32 2147483648, %v1435_v9  ;;  %vm1447_vm11 = vcmp.eq.f32.partialorder %v1435_v9, 0.0 }
 0x594   : > { %v2164_v10 = vpop.eup %2163 }
 0x595   : > { %v1439_v0 = vmul.f32 %v2164_v10, %v1435_v9 }
 0x597   : > { %v1440_v13 = vmul.f32 %v2164_v10, %v1439_v0 }
 0x599   : > { %v1441_v14 = vmul.f32 0.5, %v1440_v13 }
 0x59b   : > { %v1442_v16 = vsub.f32 1.5, %v1441_v14 }
 0x59d   : > { %v1443_v17 = vmul.f32 %v2164_v10, %v1442_v16 }
 0x59f   : > { %v1444_v15 = vmul.f32 %v1443_v17, %v1435_v9 }
 0x5a1   : > { %v1446_v19 = vsel %vm1445_vm10, %v1435_v9, %v1444_v15 }
 0x5a2   : > { %v1449_v20 = vsel %vm1447_vm11, %v1448_v18, %v1446_v19 }
 0x5a3   : > { %v1450_v21 = vadd.f32 1e-06, %v1449_v20 }
 0x5a5   : > { %2165 = vrcp.f32 %v1450_v21  ;;  %v1462_v27 = vand.u32 2147483648, %v1450_v21  ;;  %v1460_v29 = vand.u32 2147483647, %v1450_v21  ;;  %vm1456_vm13 = vweird.f32 %v1450_v21 }
 0x5a7   : > { %v1463_v31 = vor.u32 1.1754944e-38, %v1462_v27  ;;  %vm1461_vm15 = vcmp.eq.f32.partialorder %v1460_v29, 8.507059e+37 }
 0x5ab   : > { %v2166_v24 = vpop.eup %2165 }
 0x5ac   : > { %v1452_v25 = vmul.f32 %v2166_v24, %v1450_v21  ;;  %vm1457_vm12 = vweird.f32 %v2166_v24 }
 0x5ad   : > { %vm1458_vm14 = vmor %vm1456_vm13, %vm1457_vm12 }
 0x5ae   : > { %v1453_v26 = vsub.f32 1.0, %v1452_v25 }
 0x5b0   : > { %v1454_v28 = vmul.f32 %v2166_v24, %v1453_v26 }
 0x5b2   : > { %v1455_v11 = vadd.f32 %v2166_v24, %v1454_v28 }
 0x5b4   : > { %v1459_v33 = vsel %vm1458_vm14, %v2166_v24, %v1455_v11 }
 0x5b5   : > { %v1464_v34 = vsel %vm1461_vm15, %v1463_v31, %v1459_v33 }
 0x5b6   : > { %v1465_v36 = vmul.f32 %v1464_v34, %v1437_v32 }
 0x5b8   : > { %v1467_v37 = vadd.f32 %v1466_v35, %v1465_v36 }
 0x5ba   : > { %v1468_v38 = vpack.c.bf16 %v1467_v37, %v1467_v37 }
 0x5bc   : > { %1470 = vst.msk [vmem:[#allocation5] sm:$0xf] %vm1469_vm1, %v1468_v38 }
 0x5c3   : > { %v1472_v39 = vld [vmem:[#allocation5] sm:$0xf] }
 0x5c4   : > { %1985 = vmatmul.msk.bf16.vlgmr.msra.gmra.mxu0 %vm483_vm0, %v1472_v39 }
 0x641   : > { %v1506_v44 = vpop.f32.mrf.mxu0 }
 0x642   : > { %v1507_v45 = vadd.f32 %v2139_v43, %v1506_v44 }
 0x644   : > { %v1510_v46 = vmax.f32 %v1507_v45, 0.0 }
 0x646   : > { %v1512_v47 = vpack.c.bf16 %v1510_v46, %v1510_v46 }
 0x648   : > { %2002 = vmatmul.msk.bf16.vlgmr.msra.gmra.mxu1 %vm1545_vm2, %v1512_v47 }
 0x649   : > { %v1508_v48 = vpop.f32.mrf.mxu0 }
 0x6c5   : > { %v1558_v50 = vpop.f32.mrf.mxu1 }
 0x6c6   : > { %v1562_v51 = vadd.f32 %v1558_v50, %v1511_v49 }
 0x6c8   : > { %1563 = vst.msk [vmem:[#allocation6] sm:$0xff] %vm483_vm0, %v1562_v51 }
 0x6cd   : > { %v1560_v52 = vpop.f32.mrf.mxu1 }
 0x6cf   : > { %v1568_v55 = vld [vmem:[#allocation6] sm:$0xff] }
 0x6d0   : > { %v1569_v56 = vadd.f32 %v1568_v55, %v1567_v54 }
 0x6d2   : > { %v1574_v57 = vadd.f32 %v2140_v53, %v1569_v56 }
 0x6d4   : > { %1575 = vst.msk [vmem:[%s454_s15] sm:$0xff] %vm483_vm0, %v1574_v57 }
 0x6d5   : > { %2209 = shalt.err (!%p2206_p9)
}
 0x6d6   : > { %2073 = dma.vmem_to_hbm [thread:$0]  (%p2369_p4), %s1590_s23, 128, %s1592_s24, %s1577_s20  }
 0x6d7 PF: > { %p2085_p10 = scmp.ge.s32.totalorder %s2264_s22, 2  ;;  %s1603_s12 = sand.u32 1, %s2244_s17  }
 0x6d8   : > { %s1604_s14 = scalar_lea.sflag [#allocation8], %s1603_s12 }
 0x6d9   : > { %p2080_p11 = pnand %p2085_p10, %p2376_p8 }
 0x6db   : > { %p2081_p12 = pneg %p2080_p11 }
 0x6dd   : > { %2239 = dma.done.wait (%p2081_p12), %s1604_s14, 128  }
 0x6de   : > { %2241 = vsyncadd (%p2081_p12), %s1604_s14, 4294967168  ;;  %s25_s22 = sadd.s32 1, %s2264_s22   ;;  %s2795_s27 = sld [smem:[#allocation13_spill]] }
 0x6df   : > { %p22_p13 = scmp.ge.s32.totalorder %s25_s22, 4   ;;  %s2796_s17 = smov %s2248_s18 }
 0x6e0   : > { %s2797_s18 = smov %s2252_s19  ;;  %s2798_s19 = smov %s2382_s30 }
 0x6e1   : > { %s2799_s20 = smov %s2260_s21  ;;  %24 = sbr.rel (!%p22_p13) target bundleno = 8 (0x8), region = 126 }
 0x6e4   : > { %s2800_s21 = smov %s2795_s27 }
 0x6e6   :  { %1610 = vsyncpa [#allocation8], 1 }
 0x6e7   :  { %1612 = vsyncpa [#allocation8 + $0x1], 1 }
 0x6e8   :  { %1613 = vsyncpa [#allocation9], 1 }
 0x6e9   :  { %1615 = vsyncpa [#allocation9 + $0x1], 1 }

</bundles_post_ra>
